<compile_context>
chip_gen: v6e
topology: v6e:2x2x1
jax: 0.10.0
libtpu: 0.0.40
codegen_flags: <defaults>
</compile_context>

<pallas_src>
import jax
import jax.numpy as jnp
from jax.experimental import pallas as pl
from jax.experimental.pallas import tpu as pltpu

V_THRESHOLD = 0.005   # module default v_threshold
BN_EPS = 1e-5         # torch.nn.BatchNorm1d default eps


def _make_fused_kernel(T, H):
    """Kernel closure over static chunk count T and hidden size H."""

    def kernel(sig_ref,            # SMEM (1,)        sigmoid(plif_w)
               x_ref,              # (2N, F)          row-stacked views
               a_ref,              # (2N, 2N)         block-diag GCN-normalized adjacency
               arow_ref,           # (2N, 1)          rowsum(A) per view
               w1_ref,             # (F, T*H)         block-diag folded chunk weights
               c1_ref,             # (1, T*H)         folded chunk-BN shift (routed through A)
               b1_ref,             # (1, T*H)         per-chunk conv bias
               ws_ref,             # (H, H)           folded shared conv weight (single copy)
               cs_ref,             # (1, H)           folded shared-BN shift (routed through A)
               bs_ref,             # (1, H)           shared conv bias
               cz_ref,             # (1, H)           decoder column-sum  sum_o wlin[:, o]
               spikes_ref,         # out (2N, T*H)    bf16, lane-dense spikes
               z_ref):             # out (2N, T)      f32
        x = x_ref[...]                                 # [2N, F]
        a = a_ref[...]                                 # [2N, 2N]
        arow = arow_ref[...]                           # [2N, 1]

        # ---- all-chunk GCNConv (per-chunk BN folded into w1/c1) ----
        h = jnp.dot(x, w1_ref[...], preferred_element_type=jnp.float32)       # [2N, T*H]
        h = jnp.dot(a, h, preferred_element_type=jnp.float32)
        h = h + arow * c1_ref[...] + b1_ref[...]       # rank-1 bias broadcast on the VPU

        # ---- ELU ----
        h = jnp.where(h > 0.0, h, jnp.exp(h) - 1.0)

        # ---- shared GCNConv: A @ (h_t @ Wsf) == (A @ h_t) @ Wsf, so do the big
        #      A matmul once on the slab, then the tiny [H,H] weight per chunk ----
        p = jnp.dot(a, h, preferred_element_type=jnp.float32)                 # [2N, T*H]
        wsf = ws_ref[...]                              # [H, H]
        bias_s = arow * cs_ref[...] + bs_ref[...]      # [2N, H], hoisted out of the loop
        cz = cz_ref[...]                               # [1, H],  hoisted out of the loop
        sig = sig_ref[0]

        # ---- PLIF spiking neuron, reset='zero', membrane carried over T chunks;
        #      decode accumulated in-loop from the live spike value ----
        n2 = x.shape[0]
        v = jnp.zeros((n2, H), jnp.float32)
        spike_cols = []
        z_cols = []
        for t in range(T):                             # static unroll, T is small
            g = jnp.dot(p[:, t * H:(t + 1) * H], wsf,
                        preferred_element_type=jnp.float32) + bias_s          # [2N, H]
            v = v + (g - v) * sig
            spike = (v >= V_THRESHOLD).astype(jnp.float32)
            v = v * (1.0 - spike)
            spike_cols.append(spike)
            # decode: lin(spike).sum(1) == spike @ colsum(wlin); VPU mul + lane reduce
            z_cols.append(jnp.sum(spike * cz, axis=1, keepdims=True))         # [2N, 1]

        # assemble lane-dense slabs once; single stores (no per-chunk masked vst)
        spikes_ref[...] = jnp.concatenate(spike_cols, axis=1).astype(spikes_ref.dtype)
        z_ref[...] = jnp.concatenate(z_cols, axis=1)   # [2N, T] (tiny: one vreg-column)

    return kernel


def _fold_params(a_hat, params, T):
    """Fold eval-mode BNs / decoder into fused weights & rank-1 bias terms (host side)."""
    Tc, _, C = params["bn1_g"].shape
    assert Tc == T
    H = params["ws"].shape[0]
    F = T * C
    arowsum = jnp.sum(a_hat, axis=1, keepdims=True)                       # [N, 1]  (A @ 1)

    # per-chunk BN folded into per-chunk GCN lin weight / bias
    scale1 = params["bn1_g"] * jax.lax.rsqrt(params["bn1_v"] + BN_EPS)    # [T,1,C]
    shift1 = params["bn1_b"] - params["bn1_m"] * scale1                   # [T,1,C]
    w1f = scale1.transpose(0, 2, 1) * params["w1"]                        # [T,C,H]
    c1 = jnp.einsum("tic,tch->tih", shift1, params["w1"])                 # [T,1,H]
    w1_bd = jnp.zeros((F, T * H), jnp.float32)
    for t in range(T):
        w1_bd = w1_bd.at[t * C:(t + 1) * C, t * H:(t + 1) * H].set(w1f[t])
    c1_row = c1[:, 0, :].reshape(1, T * H)                                # [1, T*H]
    b1_row = params["b1"][:, 0, :].reshape(1, T * H)                      # [1, T*H]
    # the BN shift propagates through A_hat: A @ (1 ⊗ c) = rowsum(A) ⊗ c  (done in-kernel)

    # shared BN folded into the single shared conv weight (NOT kron'd block-diag)
    scale_s = params["sbn_g"] * jax.lax.rsqrt(params["sbn_v"] + BN_EPS)   # [1,H]
    shift_s = params["sbn_b"] - params["sbn_m"] * scale_s                 # [1,H]
    ws_f = scale_s[0][:, None] * params["ws"]                             # [H,H]
    cs = shift_s @ params["ws"]                                           # [1,H]
    bs = params["bs"]                                                     # [1,H]

    # decoder: lin(spike).sum(1) == spike @ colsum(wlin)
    cz = jnp.sum(params["wlin"], axis=1).reshape(1, H)                    # [1,H]

    sig = jax.nn.sigmoid(params["plif_w"]).reshape(1).astype(jnp.float32)  # SMEM scalar

    return w1_bd, c1_row, b1_row, ws_f, cs, bs, cz, sig, arowsum


def spikegcl_forward(x, a_hat, params, T, perm):
    """Both contrastive views row-stacked into one pallas_call step.
    Returns ((z1, z2), (s1, s2))."""
    N, F = x.shape
    H = params["ws"].shape[0]
    TH = T * H
    N2 = 2 * N

    (w1_bd, c1_row, b1_row, ws_f, cs, bs, cz, sig, arowsum) = _fold_params(a_hat, params, T)

    # dropedge p=0.0 -> second view uses the same graph; shuffle feature columns.
    # Row-stack the two views into one grid step (single-TC chips run grid steps
    # serially, so fusing removes a pipeline step and doubles MXU M-occupancy);
    # the shared graph becomes a block-diagonal adjacency.
    x2 = jnp.concatenate([x, x[:, perm]], axis=0)                         # [2N, F]
    a2 = jnp.zeros((N2, N2), jnp.float32)
    a2 = a2.at[:N, :N].set(a_hat).at[N:, N:].set(a_hat)                   # [2N, 2N]
    arow2 = jnp.concatenate([arowsum, arowsum], axis=0)                   # [2N, 1]

    def full2(shape):
        return pl.BlockSpec(shape, lambda i, _s=shape: (0,) * len(_s))

    spikes, z = pl.pallas_call(
        _make_fused_kernel(T, H),
        grid=(1,),
        in_specs=[
            pl.BlockSpec(memory_space=pltpu.MemorySpace.SMEM),   # sigmoid(plif_w)
            full2((N2, F)),                                      # row-stacked x
            full2((N2, N2)),                                     # block-diag A_hat
            full2((N2, 1)),                                      # rowsum(A)
            full2((F, TH)),                                      # block-diag W1 (BN folded)
            full2((1, TH)),                                      # chunk BN shift row
            full2((1, TH)),                                      # chunk conv bias row
            full2((H, H)),                                       # folded shared conv weight
            full2((1, H)),                                       # shared BN shift row
            full2((1, H)),                                       # shared conv bias row
            full2((1, H)),                                       # decoder column-sum
        ],
        out_specs=(
            full2((N2, TH)),                                     # lane-dense spikes (bf16)
            full2((N2, T)),                                      # z
        ),
        out_shape=(
            jax.ShapeDtypeStruct((N2, TH), jnp.bfloat16),
            jax.ShapeDtypeStruct((N2, T), jnp.float32),
        ),
        compiler_params=pltpu.CompilerParams(
            dimension_semantics=("arbitrary",)),
    )(sig, x2, a2, arow2, w1_bd, c1_row, b1_row, ws_f, cs, bs, cz)

    # back to the module's layout: spikes [T, N, H], z [T, N] per view
    s = spikes.astype(jnp.float32).reshape(2, N, T, H).transpose(0, 2, 1, 3)  # [2, T, N, H]
    zz = z.reshape(2, N, T).transpose(0, 2, 1)                                # [2, T, N]
    return (zz[0], zz[1]), (s[0], s[1])


# ---------------- pure-JAX reference (mirrors the PyTorch module math) ----------------
def reference_encode_decode(x, a_hat, p, T):
    N, F = x.shape
    C = F // T
    H = p["ws"].shape[0]
    hp = jax.lax.Precision.HIGHEST
    v = jnp.zeros((N, H), jnp.float32)
    spikes, zs = [], []
    for t in range(T):
        xc = x[:, t * C:(t + 1) * C]
        xc = (xc - p["bn1_m"][t]) * (p["bn1_g"][t] * jax.lax.rsqrt(p["bn1_v"][t] + BN_EPS)) + p["bn1_b"][t]
        h = jnp.dot(a_hat, jnp.dot(xc, p["w1"][t], precision=hp), precision=hp) + p["b1"][t]
        h = jnp.where(h > 0.0, h, jnp.exp(h) - 1.0)
        h = (h - p["sbn_m"]) * (p["sbn_g"] * jax.lax.rsqrt(p["sbn_v"] + BN_EPS)) + p["sbn_b"]
        h = jnp.dot(a_hat, jnp.dot(h, p["ws"], precision=hp), precision=hp) + p["bs"]
        sig = jax.nn.sigmoid(p["plif_w"][0, 0])
        v = v + (h - v) * sig
        spike = (v >= V_THRESHOLD).astype(jnp.float32)
        v = v * (1.0 - spike)
        spikes.append(spike)
        zs.append(jnp.sum(jnp.dot(spike, p["wlin"], precision=hp), axis=1))
    return jnp.stack(spikes), jnp.stack(zs)


if __name__ == "__main__":
    key = jax.random.PRNGKey(0)
    N, T, C, H, O = 64, 8, 4, 32, 8     # nodes, time steps, chunk, hidden, out
    F = T * C                            # in_channels = 32
    ks = jax.random.split(key, 20)

    # node features
    x = jax.random.normal(ks[0], (N, F), jnp.float32)

    # random graph -> symmetric adjacency with self loops -> GCN normalization
    num_edges = 256
    src = jax.random.randint(ks[1], (num_edges,), 0, N)
    dst = jax.random.randint(ks[2], (num_edges,), 0, N)
    A = jnp.zeros((N, N), jnp.float32).at[src, dst].set(1.0)
    A = jnp.maximum(A, A.T)
    A = A * (1.0 - jnp.eye(N, dtype=jnp.float32)) + jnp.eye(N, dtype=jnp.float32)
    deg = jnp.sum(A, axis=1)
    d_inv_sqrt = jax.lax.rsqrt(deg)
    a_hat = d_inv_sqrt[:, None] * A * d_inv_sqrt[None, :]   # D^-1/2 (A+I) D^-1/2

    # deterministic synthetic parameters (shapes follow the module __init__)
    params = {
        "bn1_g": 1.0 + 0.1 * jax.random.normal(ks[3], (T, 1, C), jnp.float32),
        "bn1_b": 0.1 * jax.random.normal(ks[4], (T, 1, C), jnp.float32),
        "bn1_m": 0.1 * jax.random.normal(ks[5], (T, 1, C), jnp.float32),
        "bn1_v": 1.0 + 0.1 * jnp.abs(jax.random.normal(ks[6], (T, 1, C), jnp.float32)),
        "w1": jax.random.normal(ks[7], (T, C, H), jnp.float32) / jnp.sqrt(C),
        "b1": 0.1 * jax.random.normal(ks[8], (T, 1, H), jnp.float32),
        "sbn_g": 1.0 + 0.1 * jax.random.normal(ks[9], (1, H), jnp.float32),
        "sbn_b": 0.1 * jax.random.normal(ks[10], (1, H), jnp.float32),
        "sbn_m": 0.1 * jax.random.normal(ks[11], (1, H), jnp.float32),
        "sbn_v": 1.0 + 0.1 * jnp.abs(jax.random.normal(ks[12], (1, H), jnp.float32)),
        "ws": jax.random.normal(ks[13], (H, H), jnp.float32) / jnp.sqrt(H),
        "bs": 0.1 * jax.random.normal(ks[14], (1, H), jnp.float32),
        "plif_w": jnp.full((1, 1), 1.0, jnp.float32),   # PLIF init tau = 1.0
        "wlin": jax.random.normal(ks[15], (H, O), jnp.float32) / jnp.sqrt(H),
    }

    # feature shuffle for the second view (torch.randperm equivalent)
    perm = jax.random.permutation(ks[16], F)

    (z1, z2), (s1, s2) = spikegcl_forward(x, a_hat, params, T, perm)
    z1, z2, s1, s2 = jax.block_until_ready((z1, z2, s1, s2))

    # tolerant correctness check against the pure-JAX reference
    # (the spiking threshold can flip for values within float error of
    #  v_threshold, and the kernel regroups the f32 matmuls, so require
    #  near-total rather than exact agreement)
    s1_r, z1_r = reference_encode_decode(x, a_hat, params, T)
    s2_r, z2_r = reference_encode_decode(x[:, perm], a_hat, params, T)
    spike_match = float(jnp.mean((s1 == s1_r).astype(jnp.float32)))
    spike_match2 = float(jnp.mean((s2 == s2_r).astype(jnp.float32)))
    z_bad = float(jnp.mean((jnp.abs(z1 - z1_r) > 1e-2).astype(jnp.float32)))
    z2_bad = float(jnp.mean((jnp.abs(z2 - z2_r) > 1e-2).astype(jnp.float32)))
    assert spike_match > 0.995, f"spike mismatch fraction too high: {1 - spike_match}"
    assert spike_match2 > 0.995, f"spike mismatch fraction too high (view 2): {1 - spike_match2}"
    assert z_bad < 0.01 and z2_bad < 0.01, (z_bad, z2_bad)

    print("KERNEL_OK")
</pallas_src>

<mosaic_0001>
module attributes {stable_mosaic.version = 11 : i64} {
  func.func @kernel(%arg0: i32, %arg1: memref<1xf32, #tpu.memory_space<smem>>, %arg2: memref<128x32xf32, #tpu.memory_space<vmem>>, %arg3: memref<128x128xf32, #tpu.memory_space<vmem>>, %arg4: memref<128x1xf32, #tpu.memory_space<vmem>>, %arg5: memref<32x256xf32, #tpu.memory_space<vmem>>, %arg6: memref<1x256xf32, #tpu.memory_space<vmem>>, %arg7: memref<1x256xf32, #tpu.memory_space<vmem>>, %arg8: memref<32x32xf32, #tpu.memory_space<vmem>>, %arg9: memref<1x32xf32, #tpu.memory_space<vmem>>, %arg10: memref<1x32xf32, #tpu.memory_space<vmem>>, %arg11: memref<1x32xf32, #tpu.memory_space<vmem>>, %arg12: memref<128x256xbf16, #tpu.memory_space<vmem>>, %arg13: memref<128x8xf32, #tpu.memory_space<vmem>>) attributes {dimension_semantics = [#tpu.dimension_semantics<arbitrary>], iteration_bounds = array<i64: 1>, scalar_prefetch = 0 : i64, scratch_operands = 0 : i64, tpu.core_type = #tpu.core_type<tc>, window_params = [{transform_indices = @transform_0, window_bounds = array<i64: 1>}, {pipeline_mode = #tpu.pipeline_mode<synchronous>, transform_indices = @transform_1, window_bounds = array<i64: 128, 32>}, {pipeline_mode = #tpu.pipeline_mode<synchronous>, transform_indices = @transform_2, window_bounds = array<i64: 128, 128>}, {pipeline_mode = #tpu.pipeline_mode<synchronous>, transform_indices = @transform_3, window_bounds = array<i64: 128, 1>}, {pipeline_mode = #tpu.pipeline_mode<synchronous>, transform_indices = @transform_4, window_bounds = array<i64: 32, 256>}, {pipeline_mode = #tpu.pipeline_mode<synchronous>, transform_indices = @transform_5, window_bounds = array<i64: 1, 256>}, {pipeline_mode = #tpu.pipeline_mode<synchronous>, transform_indices = @transform_6, window_bounds = array<i64: 1, 256>}, {pipeline_mode = #tpu.pipeline_mode<synchronous>, transform_indices = @transform_7, window_bounds = array<i64: 32, 32>}, {pipeline_mode = #tpu.pipeline_mode<synchronous>, transform_indices = @transform_8, window_bounds = array<i64: 1, 32>}, {pipeline_mode = #tpu.pipeline_mode<synchronous>, transform_indices = @transform_9, window_bounds = array<i64: 1, 32>}, {pipeline_mode = #tpu.pipeline_mode<synchronous>, transform_indices = @transform_10, window_bounds = array<i64: 1, 32>}, {pipeline_mode = #tpu.pipeline_mode<synchronous>, transform_indices = @transform_11, window_bounds = array<i64: 128, 256>}, {pipeline_mode = #tpu.pipeline_mode<synchronous>, transform_indices = @transform_12, window_bounds = array<i64: 128, 8>}]} {
    %c0 = arith.constant 0 : index
    %c0_0 = arith.constant 0 : index
    %0 = vector.load %arg2[%c0, %c0_0] : memref<128x32xf32, #tpu.memory_space<vmem>>, vector<128x32xf32>
    %c0_1 = arith.constant 0 : index
    %c0_2 = arith.constant 0 : index
    %1 = vector.load %arg3[%c0_1, %c0_2] : memref<128x128xf32, #tpu.memory_space<vmem>>, vector<128x128xf32>
    %c0_3 = arith.constant 0 : index
    %c0_4 = arith.constant 0 : index
    %2 = vector.load %arg4[%c0_3, %c0_4] : memref<128x1xf32, #tpu.memory_space<vmem>>, vector<128x1xf32>
    %c0_5 = arith.constant 0 : index
    %c0_6 = arith.constant 0 : index
    %3 = vector.load %arg5[%c0_5, %c0_6] : memref<32x256xf32, #tpu.memory_space<vmem>>, vector<32x256xf32>
    %cst = arith.constant dense<0.000000e+00> : vector<128x256xf32>
    %4 = tpu.matmul %0, %3, %cst {dimension_numbers = #tpu.dot_dimension_numbers<[1], [0], [0], [1], [0, 0, 1, 1], [], []>} : vector<128x32xf32>, vector<32x256xf32>, vector<128x256xf32> -> vector<128x256xf32>
    %cst_7 = arith.constant dense<0.000000e+00> : vector<128x256xf32>
    %5 = tpu.matmul %1, %4, %cst_7 {dimension_numbers = #tpu.dot_dimension_numbers<[1], [0], [0], [1], [0, 0, 1, 1], [], []>} : vector<128x128xf32>, vector<128x256xf32>, vector<128x256xf32> -> vector<128x256xf32>
    %c0_8 = arith.constant 0 : index
    %c0_9 = arith.constant 0 : index
    %6 = vector.load %arg6[%c0_8, %c0_9] : memref<1x256xf32, #tpu.memory_space<vmem>>, vector<1x256xf32>
    %7 = vector.broadcast %2 : vector<128x1xf32> to vector<128x256xf32>
    %8 = vector.broadcast %6 : vector<1x256xf32> to vector<128x256xf32>
    %9 = arith.mulf %7, %8 : vector<128x256xf32>
    %10 = arith.addf %5, %9 : vector<128x256xf32>
    %c0_10 = arith.constant 0 : index
    %c0_11 = arith.constant 0 : index
    %11 = vector.load %arg7[%c0_10, %c0_11] : memref<1x256xf32, #tpu.memory_space<vmem>>, vector<1x256xf32>
    %12 = vector.broadcast %11 : vector<1x256xf32> to vector<128x256xf32>
    %13 = arith.addf %10, %12 : vector<128x256xf32>
    %cst_12 = arith.constant 0.000000e+00 : f32
    %14 = vector.broadcast %cst_12 : f32 to vector<128x256xf32>
    %15 = arith.cmpf ogt, %13, %14 : vector<128x256xf32>
    %16 = math.exp %13 : vector<128x256xf32>
    %cst_13 = arith.constant 1.000000e+00 : f32
    %17 = vector.broadcast %cst_13 : f32 to vector<128x256xf32>
    %18 = arith.subf %16, %17 : vector<128x256xf32>
    %19 = arith.select %15, %13, %18 : vector<128x256xi1>, vector<128x256xf32>
    %cst_14 = arith.constant dense<0.000000e+00> : vector<128x256xf32>
    %20 = tpu.matmul %1, %19, %cst_14 {dimension_numbers = #tpu.dot_dimension_numbers<[1], [0], [0], [1], [0, 0, 1, 1], [], []>} : vector<128x128xf32>, vector<128x256xf32>, vector<128x256xf32> -> vector<128x256xf32>
    %c0_15 = arith.constant 0 : index
    %c0_16 = arith.constant 0 : index
    %21 = vector.load %arg8[%c0_15, %c0_16] : memref<32x32xf32, #tpu.memory_space<vmem>>, vector<32x32xf32>
    %c0_17 = arith.constant 0 : index
    %c0_18 = arith.constant 0 : index
    %22 = vector.load %arg9[%c0_17, %c0_18] : memref<1x32xf32, #tpu.memory_space<vmem>>, vector<1x32xf32>
    %23 = vector.broadcast %2 : vector<128x1xf32> to vector<128x32xf32>
    %24 = vector.broadcast %22 : vector<1x32xf32> to vector<128x32xf32>
    %25 = arith.mulf %23, %24 : vector<128x32xf32>
    %c0_19 = arith.constant 0 : index
    %c0_20 = arith.constant 0 : index
    %26 = vector.load %arg10[%c0_19, %c0_20] : memref<1x32xf32, #tpu.memory_space<vmem>>, vector<1x32xf32>
    %27 = vector.broadcast %26 : vector<1x32xf32> to vector<128x32xf32>
    %28 = arith.addf %25, %27 : vector<128x32xf32>
    %c0_21 = arith.constant 0 : index
    %c0_22 = arith.constant 0 : index
    %29 = vector.load %arg11[%c0_21, %c0_22] : memref<1x32xf32, #tpu.memory_space<vmem>>, vector<1x32xf32>
    %c0_23 = arith.constant 0 : index
    %30 = memref.load %arg1[%c0_23] : memref<1xf32, #tpu.memory_space<smem>>
    %cst_24 = arith.constant 0.000000e+00 : f32
    %31 = vector.broadcast %cst_24 : f32 to vector<128x32xf32>
    %32 = vector.extract_strided_slice %20 {offsets = [0, 0], sizes = [128, 32], strides = [1, 1]} : vector<128x256xf32> to vector<128x32xf32>
    %cst_25 = arith.constant dense<0.000000e+00> : vector<128x32xf32>
    %33 = tpu.matmul %32, %21, %cst_25 {dimension_numbers = #tpu.dot_dimension_numbers<[1], [0], [0], [1], [0, 0, 1, 1], [], []>} : vector<128x32xf32>, vector<32x32xf32>, vector<128x32xf32> -> vector<128x32xf32>
    %34 = arith.addf %33, %28 : vector<128x32xf32>
    %35 = arith.subf %34, %31 : vector<128x32xf32>
    %36 = vector.broadcast %30 : f32 to vector<128x32xf32>
    %37 = arith.mulf %35, %36 : vector<128x32xf32>
    %38 = arith.addf %31, %37 : vector<128x32xf32>
    %cst_26 = arith.constant 5.000000e-03 : f32
    %39 = vector.broadcast %cst_26 : f32 to vector<128x32xf32>
    %40 = arith.cmpf oge, %38, %39 : vector<128x32xf32>
    %41 = arith.extui %40 : vector<128x32xi1> to vector<128x32xi32>
    %42 = arith.sitofp %41 : vector<128x32xi32> to vector<128x32xf32>
    %cst_27 = arith.constant 1.000000e+00 : f32
    %43 = vector.broadcast %cst_27 : f32 to vector<128x32xf32>
    %44 = arith.subf %43, %42 : vector<128x32xf32>
    %45 = arith.mulf %38, %44 : vector<128x32xf32>
    %46 = vector.broadcast %29 : vector<1x32xf32> to vector<128x32xf32>
    %47 = arith.mulf %42, %46 : vector<128x32xf32>
    %cst_28 = arith.constant dense<0.000000e+00> : vector<128xf32>
    %48 = vector.multi_reduction <add>, %47, %cst_28 [1] : vector<128x32xf32> to vector<128xf32>
    %49 = vector.shape_cast %48 : vector<128xf32> to vector<128x1xf32>
    %50 = vector.extract_strided_slice %20 {offsets = [0, 32], sizes = [128, 32], strides = [1, 1]} : vector<128x256xf32> to vector<128x32xf32>
    %cst_29 = arith.constant dense<0.000000e+00> : vector<128x32xf32>
    %51 = tpu.matmul %50, %21, %cst_29 {dimension_numbers = #tpu.dot_dimension_numbers<[1], [0], [0], [1], [0, 0, 1, 1], [], []>} : vector<128x32xf32>, vector<32x32xf32>, vector<128x32xf32> -> vector<128x32xf32>
    %52 = arith.addf %51, %28 : vector<128x32xf32>
    %53 = arith.subf %52, %45 : vector<128x32xf32>
    %54 = vector.broadcast %30 : f32 to vector<128x32xf32>
    %55 = arith.mulf %53, %54 : vector<128x32xf32>
    %56 = arith.addf %45, %55 : vector<128x32xf32>
    %cst_30 = arith.constant 5.000000e-03 : f32
    %57 = vector.broadcast %cst_30 : f32 to vector<128x32xf32>
    %58 = arith.cmpf oge, %56, %57 : vector<128x32xf32>
    %59 = arith.extui %58 : vector<128x32xi1> to vector<128x32xi32>
    %60 = arith.sitofp %59 : vector<128x32xi32> to vector<128x32xf32>
    %cst_31 = arith.constant 1.000000e+00 : f32
    %61 = vector.broadcast %cst_31 : f32 to vector<128x32xf32>
    %62 = arith.subf %61, %60 : vector<128x32xf32>
    %63 = arith.mulf %56, %62 : vector<128x32xf32>
    %64 = vector.broadcast %29 : vector<1x32xf32> to vector<128x32xf32>
    %65 = arith.mulf %60, %64 : vector<128x32xf32>
    %cst_32 = arith.constant dense<0.000000e+00> : vector<128xf32>
    %66 = vector.multi_reduction <add>, %65, %cst_32 [1] : vector<128x32xf32> to vector<128xf32>
    %67 = vector.shape_cast %66 : vector<128xf32> to vector<128x1xf32>
    %68 = vector.extract_strided_slice %20 {offsets = [0, 64], sizes = [128, 32], strides = [1, 1]} : vector<128x256xf32> to vector<128x32xf32>
    %cst_33 = arith.constant dense<0.000000e+00> : vector<128x32xf32>
    %69 = tpu.matmul %68, %21, %cst_33 {dimension_numbers = #tpu.dot_dimension_numbers<[1], [0], [0], [1], [0, 0, 1, 1], [], []>} : vector<128x32xf32>, vector<32x32xf32>, vector<128x32xf32> -> vector<128x32xf32>
    %70 = arith.addf %69, %28 : vector<128x32xf32>
    %71 = arith.subf %70, %63 : vector<128x32xf32>
    %72 = vector.broadcast %30 : f32 to vector<128x32xf32>
    %73 = arith.mulf %71, %72 : vector<128x32xf32>
    %74 = arith.addf %63, %73 : vector<128x32xf32>
    %cst_34 = arith.constant 5.000000e-03 : f32
    %75 = vector.broadcast %cst_34 : f32 to vector<128x32xf32>
    %76 = arith.cmpf oge, %74, %75 : vector<128x32xf32>
    %77 = arith.extui %76 : vector<128x32xi1> to vector<128x32xi32>
    %78 = arith.sitofp %77 : vector<128x32xi32> to vector<128x32xf32>
    %cst_35 = arith.constant 1.000000e+00 : f32
    %79 = vector.broadcast %cst_35 : f32 to vector<128x32xf32>
    %80 = arith.subf %79, %78 : vector<128x32xf32>
    %81 = arith.mulf %74, %80 : vector<128x32xf32>
    %82 = vector.broadcast %29 : vector<1x32xf32> to vector<128x32xf32>
    %83 = arith.mulf %78, %82 : vector<128x32xf32>
    %cst_36 = arith.constant dense<0.000000e+00> : vector<128xf32>
    %84 = vector.multi_reduction <add>, %83, %cst_36 [1] : vector<128x32xf32> to vector<128xf32>
    %85 = vector.shape_cast %84 : vector<128xf32> to vector<128x1xf32>
    %86 = vector.extract_strided_slice %20 {offsets = [0, 96], sizes = [128, 32], strides = [1, 1]} : vector<128x256xf32> to vector<128x32xf32>
    %cst_37 = arith.constant dense<0.000000e+00> : vector<128x32xf32>
    %87 = tpu.matmul %86, %21, %cst_37 {dimension_numbers = #tpu.dot_dimension_numbers<[1], [0], [0], [1], [0, 0, 1, 1], [], []>} : vector<128x32xf32>, vector<32x32xf32>, vector<128x32xf32> -> vector<128x32xf32>
    %88 = arith.addf %87, %28 : vector<128x32xf32>
    %89 = arith.subf %88, %81 : vector<128x32xf32>
    %90 = vector.broadcast %30 : f32 to vector<128x32xf32>
    %91 = arith.mulf %89, %90 : vector<128x32xf32>
    %92 = arith.addf %81, %91 : vector<128x32xf32>
    %cst_38 = arith.constant 5.000000e-03 : f32
    %93 = vector.broadcast %cst_38 : f32 to vector<128x32xf32>
    %94 = arith.cmpf oge, %92, %93 : vector<128x32xf32>
    %95 = arith.extui %94 : vector<128x32xi1> to vector<128x32xi32>
    %96 = arith.sitofp %95 : vector<128x32xi32> to vector<128x32xf32>
    %cst_39 = arith.constant 1.000000e+00 : f32
    %97 = vector.broadcast %cst_39 : f32 to vector<128x32xf32>
    %98 = arith.subf %97, %96 : vector<128x32xf32>
    %99 = arith.mulf %92, %98 : vector<128x32xf32>
    %100 = vector.broadcast %29 : vector<1x32xf32> to vector<128x32xf32>
    %101 = arith.mulf %96, %100 : vector<128x32xf32>
    %cst_40 = arith.constant dense<0.000000e+00> : vector<128xf32>
    %102 = vector.multi_reduction <add>, %101, %cst_40 [1] : vector<128x32xf32> to vector<128xf32>
    %103 = vector.shape_cast %102 : vector<128xf32> to vector<128x1xf32>
    %104 = vector.extract_strided_slice %20 {offsets = [0, 128], sizes = [128, 32], strides = [1, 1]} : vector<128x256xf32> to vector<128x32xf32>
    %cst_41 = arith.constant dense<0.000000e+00> : vector<128x32xf32>
    %105 = tpu.matmul %104, %21, %cst_41 {dimension_numbers = #tpu.dot_dimension_numbers<[1], [0], [0], [1], [0, 0, 1, 1], [], []>} : vector<128x32xf32>, vector<32x32xf32>, vector<128x32xf32> -> vector<128x32xf32>
    %106 = arith.addf %105, %28 : vector<128x32xf32>
    %107 = arith.subf %106, %99 : vector<128x32xf32>
    %108 = vector.broadcast %30 : f32 to vector<128x32xf32>
    %109 = arith.mulf %107, %108 : vector<128x32xf32>
    %110 = arith.addf %99, %109 : vector<128x32xf32>
    %cst_42 = arith.constant 5.000000e-03 : f32
    %111 = vector.broadcast %cst_42 : f32 to vector<128x32xf32>
    %112 = arith.cmpf oge, %110, %111 : vector<128x32xf32>
    %113 = arith.extui %112 : vector<128x32xi1> to vector<128x32xi32>
    %114 = arith.sitofp %113 : vector<128x32xi32> to vector<128x32xf32>
    %cst_43 = arith.constant 1.000000e+00 : f32
    %115 = vector.broadcast %cst_43 : f32 to vector<128x32xf32>
    %116 = arith.subf %115, %114 : vector<128x32xf32>
    %117 = arith.mulf %110, %116 : vector<128x32xf32>
    %118 = vector.broadcast %29 : vector<1x32xf32> to vector<128x32xf32>
    %119 = arith.mulf %114, %118 : vector<128x32xf32>
    %cst_44 = arith.constant dense<0.000000e+00> : vector<128xf32>
    %120 = vector.multi_reduction <add>, %119, %cst_44 [1] : vector<128x32xf32> to vector<128xf32>
    %121 = vector.shape_cast %120 : vector<128xf32> to vector<128x1xf32>
    %122 = vector.extract_strided_slice %20 {offsets = [0, 160], sizes = [128, 32], strides = [1, 1]} : vector<128x256xf32> to vector<128x32xf32>
    %cst_45 = arith.constant dense<0.000000e+00> : vector<128x32xf32>
    %123 = tpu.matmul %122, %21, %cst_45 {dimension_numbers = #tpu.dot_dimension_numbers<[1], [0], [0], [1], [0, 0, 1, 1], [], []>} : vector<128x32xf32>, vector<32x32xf32>, vector<128x32xf32> -> vector<128x32xf32>
    %124 = arith.addf %123, %28 : vector<128x32xf32>
    %125 = arith.subf %124, %117 : vector<128x32xf32>
    %126 = vector.broadcast %30 : f32 to vector<128x32xf32>
    %127 = arith.mulf %125, %126 : vector<128x32xf32>
    %128 = arith.addf %117, %127 : vector<128x32xf32>
    %cst_46 = arith.constant 5.000000e-03 : f32
    %129 = vector.broadcast %cst_46 : f32 to vector<128x32xf32>
    %130 = arith.cmpf oge, %128, %129 : vector<128x32xf32>
    %131 = arith.extui %130 : vector<128x32xi1> to vector<128x32xi32>
    %132 = arith.sitofp %131 : vector<128x32xi32> to vector<128x32xf32>
    %cst_47 = arith.constant 1.000000e+00 : f32
    %133 = vector.broadcast %cst_47 : f32 to vector<128x32xf32>
    %134 = arith.subf %133, %132 : vector<128x32xf32>
    %135 = arith.mulf %128, %134 : vector<128x32xf32>
    %136 = vector.broadcast %29 : vector<1x32xf32> to vector<128x32xf32>
    %137 = arith.mulf %132, %136 : vector<128x32xf32>
    %cst_48 = arith.constant dense<0.000000e+00> : vector<128xf32>
    %138 = vector.multi_reduction <add>, %137, %cst_48 [1] : vector<128x32xf32> to vector<128xf32>
    %139 = vector.shape_cast %138 : vector<128xf32> to vector<128x1xf32>
    %140 = vector.extract_strided_slice %20 {offsets = [0, 192], sizes = [128, 32], strides = [1, 1]} : vector<128x256xf32> to vector<128x32xf32>
    %cst_49 = arith.constant dense<0.000000e+00> : vector<128x32xf32>
    %141 = tpu.matmul %140, %21, %cst_49 {dimension_numbers = #tpu.dot_dimension_numbers<[1], [0], [0], [1], [0, 0, 1, 1], [], []>} : vector<128x32xf32>, vector<32x32xf32>, vector<128x32xf32> -> vector<128x32xf32>
    %142 = arith.addf %141, %28 : vector<128x32xf32>
    %143 = arith.subf %142, %135 : vector<128x32xf32>
    %144 = vector.broadcast %30 : f32 to vector<128x32xf32>
    %145 = arith.mulf %143, %144 : vector<128x32xf32>
    %146 = arith.addf %135, %145 : vector<128x32xf32>
    %cst_50 = arith.constant 5.000000e-03 : f32
    %147 = vector.broadcast %cst_50 : f32 to vector<128x32xf32>
    %148 = arith.cmpf oge, %146, %147 : vector<128x32xf32>
    %149 = arith.extui %148 : vector<128x32xi1> to vector<128x32xi32>
    %150 = arith.sitofp %149 : vector<128x32xi32> to vector<128x32xf32>
    %cst_51 = arith.constant 1.000000e+00 : f32
    %151 = vector.broadcast %cst_51 : f32 to vector<128x32xf32>
    %152 = arith.subf %151, %150 : vector<128x32xf32>
    %153 = arith.mulf %146, %152 : vector<128x32xf32>
    %154 = vector.broadcast %29 : vector<1x32xf32> to vector<128x32xf32>
    %155 = arith.mulf %150, %154 : vector<128x32xf32>
    %cst_52 = arith.constant dense<0.000000e+00> : vector<128xf32>
    %156 = vector.multi_reduction <add>, %155, %cst_52 [1] : vector<128x32xf32> to vector<128xf32>
    %157 = vector.shape_cast %156 : vector<128xf32> to vector<128x1xf32>
    %158 = vector.extract_strided_slice %20 {offsets = [0, 224], sizes = [128, 32], strides = [1, 1]} : vector<128x256xf32> to vector<128x32xf32>
    %cst_53 = arith.constant dense<0.000000e+00> : vector<128x32xf32>
    %159 = tpu.matmul %158, %21, %cst_53 {dimension_numbers = #tpu.dot_dimension_numbers<[1], [0], [0], [1], [0, 0, 1, 1], [], []>} : vector<128x32xf32>, vector<32x32xf32>, vector<128x32xf32> -> vector<128x32xf32>
    %160 = arith.addf %159, %28 : vector<128x32xf32>
    %161 = arith.subf %160, %153 : vector<128x32xf32>
    %162 = vector.broadcast %30 : f32 to vector<128x32xf32>
    %163 = arith.mulf %161, %162 : vector<128x32xf32>
    %164 = arith.addf %153, %163 : vector<128x32xf32>
    %cst_54 = arith.constant 5.000000e-03 : f32
    %165 = vector.broadcast %cst_54 : f32 to vector<128x32xf32>
    %166 = arith.cmpf oge, %164, %165 : vector<128x32xf32>
    %167 = arith.extui %166 : vector<128x32xi1> to vector<128x32xi32>
    %168 = arith.sitofp %167 : vector<128x32xi32> to vector<128x32xf32>
    %169 = vector.broadcast %29 : vector<1x32xf32> to vector<128x32xf32>
    %170 = arith.mulf %168, %169 : vector<128x32xf32>
    %cst_55 = arith.constant dense<0.000000e+00> : vector<128xf32>
    %171 = vector.multi_reduction <add>, %170, %cst_55 [1] : vector<128x32xf32> to vector<128xf32>
    %172 = vector.shape_cast %171 : vector<128xf32> to vector<128x1xf32>
    %173 = tpu.concatenate %42, %60, %78, %96, %114, %132, %150, %168 in 1 : vector<128x32xf32>, vector<128x32xf32>, vector<128x32xf32>, vector<128x32xf32>, vector<128x32xf32>, vector<128x32xf32>, vector<128x32xf32>, vector<128x32xf32> -> vector<128x256xf32>
    %174 = arith.truncf %173 : vector<128x256xf32> to vector<128x256xbf16>
    %c0_56 = arith.constant 0 : index
    %c0_57 = arith.constant 0 : index
    %175 = vector.load %arg12[%c0_56, %c0_57] : memref<128x256xbf16, #tpu.memory_space<vmem>>, vector<128x256xbf16>
    tpu.vector_store %arg12[%c0_56, %c0_57], %174 {strides = array<i32>} : memref<128x256xbf16, #tpu.memory_space<vmem>>, vector<128x256xbf16>,
    %176 = tpu.concatenate %49, %67, %85, %103, %121, %139, %157, %172 in 1 : vector<128x1xf32>, vector<128x1xf32>, vector<128x1xf32>, vector<128x1xf32>, vector<128x1xf32>, vector<128x1xf32>, vector<128x1xf32>, vector<128x1xf32> -> vector<128x8xf32>
    %c0_58 = arith.constant 0 : index
    %c0_59 = arith.constant 0 : index
    %177 = vector.load %arg13[%c0_58, %c0_59] : memref<128x8xf32, #tpu.memory_space<vmem>>, vector<128x8xf32>
    tpu.vector_store %arg13[%c0_58, %c0_59], %176 {strides = array<i32>} : memref<128x8xf32, #tpu.memory_space<vmem>>, vector<128x8xf32>,
    return
  }
  func.func @transform_0(%arg0: i32) -> i32 {
    %c0_i32 = arith.constant 0 : i32
    %c0_i32_0 = arith.constant 0 : i32
    return %c0_i32 : i32
  }
  func.func @transform_1(%arg0: i32) -> (i32, i32) {
    %c0_i32 = arith.constant 0 : i32
    %c0_i32_0 = arith.constant 0 : i32
    %c0_i32_1 = arith.constant 0 : i32
    return %c0_i32, %c0_i32_0 : i32, i32
  }
  func.func @transform_2(%arg0: i32) -> (i32, i32) {
    %c0_i32 = arith.constant 0 : i32
    %c0_i32_0 = arith.constant 0 : i32
    %c0_i32_1 = arith.constant 0 : i32
    return %c0_i32, %c0_i32_0 : i32, i32
  }
  func.func @transform_3(%arg0: i32) -> (i32, i32) {
    %c0_i32 = arith.constant 0 : i32
    %c0_i32_0 = arith.constant 0 : i32
    %c0_i32_1 = arith.constant 0 : i32
    return %c0_i32, %c0_i32_0 : i32, i32
  }
  func.func @transform_4(%arg0: i32) -> (i32, i32) {
    %c0_i32 = arith.constant 0 : i32
    %c0_i32_0 = arith.constant 0 : i32
    %c0_i32_1 = arith.constant 0 : i32
    return %c0_i32, %c0_i32_0 : i32, i32
  }
  func.func @transform_5(%arg0: i32) -> (i32, i32) {
    %c0_i32 = arith.constant 0 : i32
    %c0_i32_0 = arith.constant 0 : i32
    %c0_i32_1 = arith.constant 0 : i32
    return %c0_i32, %c0_i32_0 : i32, i32
  }
  func.func @transform_6(%arg0: i32) -> (i32, i32) {
    %c0_i32 = arith.constant 0 : i32
    %c0_i32_0 = arith.constant 0 : i32
    %c0_i32_1 = arith.constant 0 : i32
    return %c0_i32, %c0_i32_0 : i32, i32
  }
  func.func @transform_7(%arg0: i32) -> (i32, i32) {
    %c0_i32 = arith.constant 0 : i32
    %c0_i32_0 = arith.constant 0 : i32
    %c0_i32_1 = arith.constant 0 : i32
    return %c0_i32, %c0_i32_0 : i32, i32
  }
  func.func @transform_8(%arg0: i32) -> (i32, i32) {
    %c0_i32 = arith.constant 0 : i32
    %c0_i32_0 = arith.constant 0 : i32
    %c0_i32_1 = arith.constant 0 : i32
    return %c0_i32, %c0_i32_0 : i32, i32
  }
  func.func @transform_9(%arg0: i32) -> (i32, i32) {
    %c0_i32 = arith.constant 0 : i32
    %c0_i32_0 = arith.constant 0 : i32
    %c0_i32_1 = arith.constant 0 : i32
    return %c0_i32, %c0_i32_0 : i32, i32
  }
  func.func @transform_10(%arg0: i32) -> (i32, i32) {
    %c0_i32 = arith.constant 0 : i32
    %c0_i32_0 = arith.constant 0 : i32
    %c0_i32_1 = arith.constant 0 : i32
    return %c0_i32, %c0_i32_0 : i32, i32
  }
  func.func @transform_11(%arg0: i32) -> (i32, i32) {
    %c0_i32 = arith.constant 0 : i32
    %c0_i32_0 = arith.constant 0 : i32
    %c0_i32_1 = arith.constant 0 : i32
    return %c0_i32, %c0_i32_0 : i32, i32
  }
  func.func @transform_12(%arg0: i32) -> (i32, i32) {
    %c0_i32 = arith.constant 0 : i32
    %c0_i32_0 = arith.constant 0 : i32
    %c0_i32_1 = arith.constant 0 : i32
    return %c0_i32, %c0_i32_0 : i32, i32
  }
}

</mosaic_0001>

<bundles_post_ra>
// kernel: tpu_custom_call.1
= control target key start
LH: loop header
LB: loop body
LE: loop exit
PB: predicated region body
PF: predicated region fallthrough
CT: control target
= control target key end

     0   :  { %v10376_v4 = vmov 0.0   ;;  %vm98_vm0 = vcmask 261120   ;;  %s10363_s0 = inlined_call_operand.<no memory space> [shape: f32[1], index: 0, kind: input, shape index: {}]   ;;  %s10364_s1 = inlined_call_operand.vmem [shape: f32[128,32], index: 1, kind: input, shape index: {}]   ;;  %s10365_s2 = inlined_call_operand.vmem [shape: f32[128,128], index: 2, kind: input, shape index: {}]   ;;  %s10366_s3 = inlined_call_operand.vmem [shape: f32[128,1], index: 3, kind: input, shape index: {}]   ;;  %s10367_s4 = inlined_call_operand.vmem [shape: f32[32,256], index: 4, kind: input, shape index: {}]   ;;  %s10368_s5 = inlined_call_operand.vmem [shape: f32[1,256], index: 5, kind: input, shape index: {}]   ;;  %s10369_s6 = inlined_call_operand.vmem [shape: f32[1,256], index: 6, kind: input, shape index: {}]   ;;  %s10370_s7 = inlined_call_operand.vmem [shape: f32[32,32], index: 7, kind: input, shape index: {}]   ;;  %s10371_s8 = inlined_call_operand.vmem [shape: f32[1,32], index: 8, kind: input, shape index: {}]   ;;  %s10372_s9 = inlined_call_operand.vmem [shape: f32[1,32], index: 9, kind: input, shape index: {}]   ;;  %s10373_s10 = inlined_call_operand.vmem [shape: f32[1,32], index: 10, kind: input, shape index: {}]   ;;  %s10374_s11 = inlined_call_operand.hbm [shape: bf16[128,256], index: 11, kind: output, shape index: {0}]   ;;  %s10375_s12 = inlined_call_operand.vmem [shape: f32[128,8], index: 12, kind: output, shape index: {1}]  }
   0x1   :  { %v97_v0 = vld [vmem:[%s10367_s4 + $0x38] sm:$0xff]  ;;  %v96_v1 = vld [vmem:[%s10367_s4 + $0x30] sm:$0xff]  ;;  %v95_v2 = vld [vmem:[%s10367_s4 + $0x28] sm:$0xff]  ;;  %211 = vmatprep.mubr.f32.mxu0 %v10376_v4  ;;  %496 = vmatprep.mubr.f32.mxu1 %v10376_v4 }
   0x2   :  { %171 = vmatprep.subr.mxu0 %v97_v0  ;;  %v94_v3 = vld [vmem:[%s10367_s4 + $0x20] sm:$0xff]  ;;  %v93_v5 = vld [vmem:[%s10367_s4 + $0x18] sm:$0xff]  ;;  %v92_v6 = vld [vmem:[%s10367_s4 + $0x10] sm:$0xff] }
   0x3   :  { %172 = vmatpush1.msra.mxu0 %v96_v1  ;;  %v91_v7 = vld [vmem:[%s10367_s4 + $0x8] sm:$0xff]  ;;  %v90_v8 = vld [vmem:[%s10367_s4] sm:$0xff] }
   0x4   :  { %173 = vmatprep.subr.mxu0 %v95_v2  ;;  %v42_v9 = vld [vmem:[%s10364_s1] sm:$0xff] }
   0x5   :  { %174 = vmatpush1.msra.mxu0 %v94_v3 }
   0x6   :  { %175 = vmatprep.subr.mxu0 %v93_v5 }
   0x7   :  { %176 = vmatpush1.msra.mxu0 %v92_v6 }
   0x8   :  { %177 = vmatprep.subr.mxu0 %v91_v7 }
   0x9   :  { %178 = vmatpush1.msra.mxu0 %v90_v8 }
   0xa   :  { %19 = vsyncpa [#allocation4], 0  ;;  %4895 = vmatmul.mubr.msk.f32.vlgmr.msra.gmra.mxu0 %vm98_vm0, %v42_v9  ;;  %v43_v10 = vld [vmem:[%s10364_s1 + $0x8] sm:$0xff]  ;;  %v44_v11 = vld [vmem:[%s10364_s1 + $0x10] sm:$0xff]  ;;  %v6002_v42 = vmov 0   ;;  %s6003_s4 = smov 96  }
   0xb   :  { %217 = vmatprep.mubr.f32.mxu0 %v10376_v4  ;;  %v45_v12 = vld [vmem:[%s10364_s1 + $0x18] sm:$0xff]  ;;  %v46_v13 = vld [vmem:[%s10364_s1 + $0x20] sm:$0xff]  ;;  %v47_v14 = vld [vmem:[%s10364_s1 + $0x28] sm:$0xff]  ;;  %5666 = vset.pattern.permute.xlu0 %v6002_v42  ;;  %s6005_s23 = smov 32  }
   0xc   :  { %v48_v15 = vld [vmem:[%s10364_s1 + $0x30] sm:$0xff]  ;;  %v49_v16 = vld [vmem:[%s10364_s1 + $0x38] sm:$0xff]  ;;  %v50_v17 = vld [vmem:[%s10364_s1 + $0x40] sm:$0xff]  ;;  %5667 = vset.pattern.permute.xlu1 %v6002_v42 }
   0xd   :  { %v51_v18 = vld [vmem:[%s10364_s1 + $0x48] sm:$0xff]  ;;  %v52_v19 = vld [vmem:[%s10364_s1 + $0x50] sm:$0xff]  ;;  %v53_v20 = vld [vmem:[%s10364_s1 + $0x58] sm:$0xff] }
   0xe   :  { %4896 = vmatmul.mubr.msk.f32.gmra.mxu0 %vm98_vm0, %v43_v10  ;;  %v54_v21 = vld [vmem:[%s10364_s1 + $0x60] sm:$0xff]  ;;  %v55_v22 = vld [vmem:[%s10364_s1 + $0x68] sm:$0xff]  ;;  %v56_v23 = vld [vmem:[%s10364_s1 + $0x70] sm:$0xff] }
   0xf   :  { %223 = vmatprep.mubr.f32.mxu0 %v10376_v4  ;;  %v57_v24 = vld [vmem:[%s10364_s1 + $0x78] sm:$0xff]  ;;  %v74_v39 = vld [vmem:[%s10366_s3] sm:$0xff]  ;;  %v76_v40 = vld [vmem:[%s10366_s3 + $0x10] sm:$0xff] }
  0x10   :  { %311 = vperm.xlu0 %5666, %v74_v39   ;;  %321 = vperm.xlu1 %5667, %v76_v40   ;;  %v75_v44 = vld [vmem:[%s10366_s3 + $0x8] sm:$0xff]  ;;  %v77_v45 = vld [vmem:[%s10366_s3 + $0x18] sm:$0xff]  ;;  %v78_v49 = vld [vmem:[%s10366_s3 + $0x20] sm:$0xff] }
  0x11   :  { %v79_v48 = vld [vmem:[%s10366_s3 + $0x28] sm:$0xff]  ;;  %v81_v52 = vld [vmem:[%s10366_s3 + $0x38] sm:$0xff]  ;;  %v80_v53 = vld [vmem:[%s10366_s3 + $0x30] sm:$0xff] }
  0x12   :  { %4897 = vmatmul.mubr.msk.f32.gmra.mxu0 %vm98_vm0, %v44_v11  ;;  %v83_v56 = vld [vmem:[%s10366_s3 + $0x48] sm:$0xff]  ;;  %v82_v57 = vld [vmem:[%s10366_s3 + $0x40] sm:$0xff]  ;;  %v85_v60 = vld [vmem:[%s10366_s3 + $0x58] sm:$0xff] }
  0x13   :  { %229 = vmatprep.mubr.f32.mxu0 %v10376_v4  ;;  %v84_v61 = vld [vmem:[%s10366_s3 + $0x50] sm:$0xff]  ;;  %v87_v0 = vld [vmem:[%s10366_s3 + $0x68] sm:$0xff]  ;;  %v86_v1 = vld [vmem:[%s10366_s3 + $0x60] sm:$0xff] }
  0x14   :  { %316 = vperm.xlu0 %5666, %v75_v44   ;;  %326 = vperm.xlu1 %5667, %v77_v45   ;;  %v89_v5 = vld [vmem:[%s10366_s3 + $0x78] sm:$0xff]  ;;  %v88_v6 = vld [vmem:[%s10366_s3 + $0x70] sm:$0xff]  ;;  %v6274_v11 = vld [vmem:[%s10365_s2] sm:$0xff]  ;;  %s6004_s3 = smov 64  }
  0x15   :  { %10702 = vst [vmem:[#allocation6_spill] sm:$0xff] %v6274_v11 }
  0x16   :  { %4898 = vmatmul.mubr.msk.f32.gmra.mxu0 %vm98_vm0, %v45_v12  ;;  %v6283_v12 = vld [vmem:[%s10365_s2 + $0x8] sm:$0xff] }
  0x17   :  { %235 = vmatprep.mubr.f32.mxu0 %v10376_v4  ;;  %10703 = vst [vmem:[#allocation7_spill] sm:$0xff] %v6283_v12 }
  0x18   :  { %336 = vperm.xlu1 %5667, %v79_v48   ;;  %331 = vperm.xlu0 %5666, %v78_v49   ;;  %v390_v49 = vlaneseq }
  0x1a   :  { %4899 = vmatmul.mubr.msk.f32.gmra.mxu0 %vm98_vm0, %v46_v13  ;;  %v6290_v13 = vld [vmem:[%s10365_s2 + $0x10] sm:$0xff] }
  0x1b   :  { %241 = vmatprep.mubr.f32.mxu0 %v10376_v4  ;;  %10704 = vst [vmem:[#allocation8_spill] sm:$0xff] %v6290_v13 }
  0x1c   :  { %346 = vperm.xlu1 %5667, %v81_v52   ;;  %341 = vperm.xlu0 %5666, %v80_v53   ;;  %v391_v53 = vshrl.u32 %v390_v49, 7 }
  0x1e   :  { %4900 = vmatmul.mubr.msk.f32.gmra.mxu0 %vm98_vm0, %v47_v14  ;;  %v6297_v14 = vld [vmem:[%s10365_s2 + $0x18] sm:$0xff] }
  0x1f   :  { %247 = vmatprep.mubr.f32.mxu0 %v10376_v4  ;;  %10705 = vst [vmem:[#allocation9_spill] sm:$0xff] %v6297_v14 }
  0x20   :  { %356 = vperm.xlu1 %5667, %v83_v56   ;;  %351 = vperm.xlu0 %5666, %v82_v57  }
  0x22   :  { %4901 = vmatmul.mubr.msk.f32.gmra.mxu0 %vm98_vm0, %v48_v15  ;;  %v6304_v15 = vld [vmem:[%s10365_s2 + $0x20] sm:$0xff] }
  0x23   :  { %253 = vmatprep.mubr.f32.mxu0 %v10376_v4  ;;  %10706 = vst [vmem:[#allocation10_spill] sm:$0xff] %v6304_v15 }
  0x24   :  { %366 = vperm.xlu1 %5667, %v85_v60   ;;  %361 = vperm.xlu0 %5666, %v84_v61   ;;  %v396_v60 = vsub.s32 1, %v391_v53 }
  0x26   :  { %4902 = vmatmul.mubr.msk.f32.gmra.mxu0 %vm98_vm0, %v49_v16  ;;  %v6311_v16 = vld [vmem:[%s10365_s2 + $0x28] sm:$0xff] }
  0x27   :  { %259 = vmatprep.mubr.f32.mxu0 %v10376_v4  ;;  %10707 = vst [vmem:[#allocation11_spill] sm:$0xff] %v6311_v16 }
  0x28   :  { %376 = vperm.xlu1 %5667, %v87_v0   ;;  %371 = vperm.xlu0 %5666, %v86_v1  }
  0x2a   :  { %4903 = vmatmul.mubr.msk.f32.gmra.mxu0 %vm98_vm0, %v50_v17  ;;  %v6318_v17 = vld [vmem:[%s10365_s2 + $0x30] sm:$0xff] }
  0x2b   :  { %265 = vmatprep.mubr.f32.mxu0 %v10376_v4  ;;  %10708 = vst [vmem:[#allocation12_spill] sm:$0xff] %v6318_v17 }
  0x2c   :  { %386 = vperm.xlu1 %5667, %v89_v5   ;;  %381 = vperm.xlu0 %5666, %v88_v6   ;;  %v593_v5 = vld [vmem:[%s10369_s6] sm:$0x3] }
  0x2e   :  { %4904 = vmatmul.mubr.msk.f32.gmra.mxu0 %vm98_vm0, %v51_v18  ;;  %v6325_v18 = vld [vmem:[%s10365_s2 + $0x38] sm:$0xff] }
  0x2f   :  { %271 = vmatprep.mubr.f32.mxu0 %v10376_v4  ;;  %10709 = vst [vmem:[#allocation13_spill] sm:$0xff] %v6325_v18 }
  0x32   :  { %4905 = vmatmul.mubr.msk.f32.gmra.mxu0 %vm98_vm0, %v52_v19  ;;  %v6332_v19 = vld [vmem:[%s10365_s2 + $0x40] sm:$0xff] }
  0x33   :  { %277 = vmatprep.mubr.f32.mxu0 %v10376_v4  ;;  %10710 = vst [vmem:[#allocation14_spill] sm:$0xff] %v6332_v19 }
  0x36   :  { %4906 = vmatmul.mubr.msk.f32.gmra.mxu0 %vm98_vm0, %v53_v20  ;;  %v6339_v20 = vld [vmem:[%s10365_s2 + $0x48] sm:$0xff] }
  0x37   :  { %283 = vmatprep.mubr.f32.mxu0 %v10376_v4  ;;  %10711 = vst [vmem:[#allocation15_spill] sm:$0xff] %v6339_v20 }
  0x3a   :  { %4907 = vmatmul.mubr.msk.f32.gmra.mxu0 %vm98_vm0, %v54_v21  ;;  %v6346_v21 = vld [vmem:[%s10365_s2 + $0x50] sm:$0xff] }
  0x3b   :  { %289 = vmatprep.mubr.f32.mxu0 %v10376_v4  ;;  %10712 = vst [vmem:[#allocation16_spill] sm:$0xff] %v6346_v21 }
  0x3e   :  { %4908 = vmatmul.mubr.msk.f32.gmra.mxu0 %vm98_vm0, %v55_v22  ;;  %v6353_v22 = vld [vmem:[%s10365_s2 + $0x58] sm:$0xff] }
  0x3f   :  { %295 = vmatprep.mubr.f32.mxu0 %v10376_v4  ;;  %10713 = vst [vmem:[#allocation17_spill] sm:$0xff] %v6353_v22 }
  0x42   :  { %4909 = vmatmul.mubr.msk.f32.gmra.mxu0 %vm98_vm0, %v56_v23  ;;  %v6360_v23 = vld [vmem:[%s10365_s2 + $0x60] sm:$0xff] }
  0x43   :  { %301 = vmatprep.mubr.f32.mxu0 %v10376_v4  ;;  %10714 = vst [vmem:[#allocation18_spill] sm:$0xff] %v6360_v23 }
  0x46   :  { %4910 = vmatmul.mubr.msk.f32.gmra.mxu0 %vm98_vm0, %v57_v24  ;;  %v6367_v24 = vld [vmem:[%s10365_s2 + $0x68] sm:$0xff] }
  0x47   :  { %861 = vmatprep.mubr.f32.mxu0 %v10376_v4  ;;  %10715 = vst [vmem:[#allocation19_spill] sm:$0xff] %v6367_v24 }
  0xca   :  { %v6180_v25 = vpop.f32.mrf.mxu0 }
  0xcc   :  { %v6182_v26 = vpop.f32.mrf.mxu0 }
  0xce   :  { %v6184_v27 = vpop.f32.mrf.mxu0 }
  0xd0   :  { %v6186_v28 = vpop.f32.mrf.mxu0 }
  0xd2   :  { %v6188_v29 = vpop.f32.mrf.mxu0 }
  0xd4   :  { %v6190_v30 = vpop.f32.mrf.mxu0 }
  0xd6   :  { %v6192_v31 = vpop.f32.mrf.mxu0 }
  0xd8   :  { %v6194_v32 = vpop.f32.mrf.mxu0 }
  0xda   :  { %v6196_v33 = vpop.f32.mrf.mxu0 }
  0xdc   :  { %v6198_v34 = vpop.f32.mrf.mxu0 }
  0xde   :  { %v6200_v35 = vpop.f32.mrf.mxu0 }
  0xe0   :  { %v6202_v36 = vpop.f32.mrf.mxu0 }
  0xe2   :  { %v6204_v37 = vpop.f32.mrf.mxu0 }
  0xe4   :  { %v6206_v38 = vpop.f32.mrf.mxu0 }
  0xe6   :  { %v6214_v41 = vpop.f32.mrf.mxu0 }
  0xe8   :  { %v257_v43 = vpop.f32.mrf.mxu0 }
  0xea   :  { %v261_v46 = vpop.f32.mrf.mxu0 }
  0xec   :  { %v263_v47 = vpop.f32.mrf.mxu0 }
  0xee   :  { %v267_v50 = vpop.f32.mrf.mxu0 }
  0xf0   :  { %v269_v51 = vpop.f32.mrf.mxu0 }
  0xf2   :  { %v273_v54 = vpop.f32.mrf.mxu0 }
  0xf4   :  { %v275_v55 = vpop.f32.mrf.mxu0 }
  0xf6   :  { %v279_v58 = vpop.f32.mrf.mxu0 }
  0xf8   :  { %v281_v59 = vpop.f32.mrf.mxu0 }
  0xfa   :  { %v285_v62 = vpop.f32.mrf.mxu0 }
  0xfc   :  { %v287_v63 = vpop.f32.mrf.mxu0 }
  0xfe   :  { %v291_v2 = vpop.f32.mrf.mxu0 }
 0x100   :  { %v293_v3 = vpop.f32.mrf.mxu0 }
 0x102   :  { %v297_v7 = vpop.f32.mrf.mxu0 }
 0x104   :  { %v299_v8 = vpop.f32.mrf.mxu0 }
 0x106   :  { %v303_v9 = vpop.f32.mrf.mxu0 }
 0x108   :  { %v305_v10 = vpop.f32.mrf.mxu0 }
 0x109   :  { %432 = vmatprep.subr.mxu1 %v305_v10 }
 0x10a   :  { %433 = vmatpush1.msra.mxu1 %v303_v9 }
 0x10b   :  { %434 = vmatprep.subr.mxu1 %v299_v8 }
 0x10c   :  { %435 = vmatpush1.msra.mxu1 %v297_v7 }
 0x10d   :  { %436 = vmatprep.subr.mxu1 %v293_v3 }
 0x10e   :  { %437 = vmatpush1.msra.mxu1 %v291_v2 }
 0x10f   :  { %438 = vmatprep.subr.mxu1 %v287_v63 }
 0x110   :  { %439 = vmatpush1.msra.mxu1 %v285_v62 }
 0x111   :  { %440 = vmatprep.subr.mxu1 %v281_v59  ;;  %v308_v59 = vld [vmem:[%s10368_s5] sm:$0x3] }
 0x112   :  { %441 = vmatpush1.msra.mxu1 %v279_v58  ;;  %v392_v58 = vsub.s32 0, %v391_v53  ;;  %v6449_v2 = vrot.slane %v308_v59, %v396_v60 }
 0x113   :  { %442 = vmatprep.subr.mxu1 %v275_v55 }
 0x114   :  { %443 = vmatpush1.msra.mxu1 %v273_v54  ;;  %v6445_v0 = vrot.slane %v308_v59, %v392_v58  ;;  %v6468_v53 = vrot.slane %v593_v5, %v392_v58  ;;  %v6470_v59 = vrot.slane %v593_v5, %v396_v60 }
 0x115   :  { %444 = vmatprep.subr.mxu1 %v269_v51 }
 0x116   :  { %445 = vmatpush1.msra.mxu1 %v267_v50 }
 0x117   :  { %446 = vmatprep.subr.mxu1 %v263_v47 }
 0x118   :  { %447 = vmatpush1.msra.mxu1 %v261_v46 }
 0x119   :  { %448 = vmatprep.subr.mxu1 %v257_v43 }
 0x11a   :  { %449 = vmatpush1.msra.mxu1 %v6214_v41 }
 0x11b   :  { %450 = vmatprep.subr.mxu1 %v6206_v38 }
 0x11c   :  { %451 = vmatpush1.msra.mxu1 %v6204_v37 }
 0x11d   :  { %452 = vmatprep.subr.mxu1 %v6202_v36 }
 0x11e   :  { %453 = vmatpush1.msra.mxu1 %v6200_v35 }
 0x11f   :  { %454 = vmatprep.subr.mxu1 %v6198_v34  ;;  %v6392_v34 = vpop.permute.xlu0 %311 }
 0x120   :  { %455 = vmatpush1.msra.mxu1 %v6196_v33  ;;  %v6390_v33 = vpop.permute.xlu1 %321  ;;  %10719 = vst [vmem:[#allocation23_spill] sm:$0xff] %v6392_v34  ;;  %v400_v7 = vmul.f32 %v6445_v0, %v6392_v34  ;;  %v401_v8 = vmul.f32 %v6449_v2, %v6392_v34 }
 0x121   :  { %456 = vmatprep.subr.mxu1 %v6194_v32  ;;  %10718 = vst [vmem:[#allocation22_spill] sm:$0xff] %v6390_v33  ;;  %v405_v34 = vmul.f32 %v6449_v2, %v6390_v33 }
 0x122   :  { %457 = vmatpush1.msra.mxu1 %v6192_v31 }
 0x123   :  { %458 = vmatprep.subr.mxu1 %v6190_v30  ;;  %v6402_v39 = vpop.permute.xlu0 %316 }
 0x124   :  { %459 = vmatpush1.msra.mxu1 %v6188_v29  ;;  %v6400_v38 = vpop.permute.xlu1 %326  ;;  %10722 = vst [vmem:[#allocation26_spill] sm:$0xff] %v6402_v39  ;;  %v402_v9 = vmul.f32 %v6445_v0, %v6402_v39 }
 0x125   :  { %460 = vmatprep.subr.mxu1 %v6186_v28  ;;  %10721 = vst [vmem:[#allocation25_spill] sm:$0xff] %v6400_v38  ;;  %v407_v58 = vmul.f32 %v6449_v2, %v6400_v38 }
 0x126   :  { %461 = vmatpush1.msra.mxu1 %v6184_v27 }
 0x127   :  { %462 = vmatprep.subr.mxu1 %v6182_v26  ;;  %v6381_v26 = vld [vmem:[%s10365_s2 + $0x78] sm:$0xff]  ;;  %v6408_v42 = vpop.permute.xlu0 %331 }
 0x128   :  { %463 = vmatpush1.msra.mxu1 %v6180_v25  ;;  %v6374_v25 = vld [vmem:[%s10365_s2 + $0x70] sm:$0xff]  ;;  %10717 = vst [vmem:[#allocation21_spill] sm:$0xff] %v6381_v26  ;;  %10724 = vst [vmem:[#allocation28_spill] sm:$0xff] %v6408_v42  ;;  %v6412_v44 = vpop.permute.xlu1 %336  ;;  %v6486_v60 = vmul.f32 %v6445_v0, %v6408_v42 }
 0x129   :  { %497 = vmatmul.mubr.f32.vlgmr.msra.gmra.mxu1 %v6274_v11  ;;  %10716 = vst [vmem:[#allocation20_spill] sm:$0xff] %v6374_v25  ;;  %10725 = vst [vmem:[#allocation29_spill] sm:$0xff] %v6412_v44 }
 0x12a   :  { %502 = vmatprep.mubr.f32.mxu1 %v10376_v4  ;;  %10734 = vst [vmem:[#allocation38_spill] sm:$0xff] %v6486_v60 }
 0x12b   :  { %v6418_v47 = vpop.permute.xlu0 %341 }
 0x12c   :  { %10726 = vst [vmem:[#allocation30_spill] sm:$0xff] %v6418_v47  ;;  %v6422_v50 = vpop.permute.xlu1 %346 }
 0x12d   :  { %503 = vmatmul.mubr.f32.gmra.mxu1 %v6283_v12  ;;  %10727 = vst [vmem:[#allocation31_spill] sm:$0xff] %v6422_v50 }
 0x12e   :  { %508 = vmatprep.mubr.f32.mxu1 %v10376_v4 }
 0x12f   :  { %v6428_v54 = vpop.permute.xlu0 %351 }
 0x130   :  { %10728 = vst [vmem:[#allocation32_spill] sm:$0xff] %v6428_v54  ;;  %v6432_v56 = vpop.permute.xlu1 %356 }
 0x131   :  { %509 = vmatmul.mubr.f32.gmra.mxu1 %v6290_v13  ;;  %10729 = vst [vmem:[#allocation33_spill] sm:$0xff] %v6432_v56 }
 0x132   :  { %514 = vmatprep.mubr.f32.mxu1 %v10376_v4 }
 0x133   :  { %v6441_v62 = vpop.permute.xlu0 %361 }
 0x134   :  { %10730 = vst [vmem:[#allocation34_spill] sm:$0xff] %v6441_v62  ;;  %v6447_v1 = vpop.permute.xlu1 %366 }
 0x135   :  { %515 = vmatmul.mubr.f32.gmra.mxu1 %v6297_v14  ;;  %10731 = vst [vmem:[#allocation35_spill] sm:$0xff] %v6447_v1  ;;  %v421_v14 = vmul.f32 %v6449_v2, %v6441_v62 }
 0x136   :  { %520 = vmatprep.mubr.f32.mxu1 %v10376_v4 }
 0x137   :  { %v6464_v10 = vpop.permute.xlu0 %371 }
 0x138   :  { %10732 = vst [vmem:[#allocation36_spill] sm:$0xff] %v6464_v10 }
 0x139   :  { %521 = vmatmul.mubr.f32.gmra.mxu1 %v6304_v15 }
 0x13a   :  { %526 = vmatprep.mubr.f32.mxu1 %v10376_v4 }
 0x13d   :  { %527 = vmatmul.mubr.f32.gmra.mxu1 %v6311_v16 }
 0x13e   :  { %532 = vmatprep.mubr.f32.mxu1 %v10376_v4 }
 0x141   :  { %533 = vmatmul.mubr.f32.gmra.mxu1 %v6318_v17 }
 0x142   :  { %538 = vmatprep.mubr.f32.mxu1 %v10376_v4 }
 0x145   :  { %539 = vmatmul.mubr.f32.gmra.mxu1 %v6325_v18  ;;  %v423_v18 = vmul.f32 %v6449_v2, %v6447_v1 }
 0x146   :  { %544 = vmatprep.mubr.f32.mxu1 %v10376_v4 }
 0x149   :  { %545 = vmatmul.mubr.f32.gmra.mxu1 %v6332_v19  ;;  %v419_v19 = vmul.f32 %v6449_v2, %v6432_v56 }
 0x14a   :  { %550 = vmatprep.mubr.f32.mxu1 %v10376_v4 }
 0x14d   :  { %551 = vmatmul.mubr.f32.gmra.mxu1 %v6339_v20  ;;  %v6502_v20 = vmul.f32 %v6445_v0, %v6418_v47 }
 0x14e   :  { %556 = vmatprep.mubr.f32.mxu1 %v10376_v4 }
 0x151   :  { %557 = vmatmul.mubr.f32.gmra.mxu1 %v6346_v21 }
 0x152   :  { %562 = vmatprep.mubr.f32.mxu1 %v10376_v4 }
 0x155   :  { %563 = vmatmul.mubr.f32.gmra.mxu1 %v6353_v22  ;;  %v6494_v22 = vmul.f32 %v6445_v0, %v6412_v44 }
 0x156   :  { %568 = vmatprep.mubr.f32.mxu1 %v10376_v4 }
 0x159   :  { %569 = vmatmul.mubr.f32.gmra.mxu1 %v6360_v23  ;;  %v6490_v23 = vmul.f32 %v6449_v2, %v6408_v42  ;;  %v6511_v42 = vld [vmem:[%s10370_s7 + $0x18] sm:$0xff] }
 0x15a   :  { %574 = vmatprep.mubr.f32.mxu1 %v10376_v4  ;;  %10735 = vst [vmem:[#allocation39_spill] sm:$0xff] %v6511_v42  ;;  %5650 = vmatprep.subr.mxu1 %v6511_v42 }
 0x15b   :  { %5654 = vmatpush3.msra.mxu1 %v6511_v42  ;;  %v424_v42 = vmul.f32 %v6445_v0, %v6464_v10 }
 0x15d   :  { %575 = vmatmul.mubr.f32.gmra.mxu1 %v6367_v24  ;;  %v406_v24 = vmul.f32 %v6445_v0, %v6400_v38 }
 0x15e   :  { %580 = vmatprep.mubr.f32.mxu1 %v10376_v4 }
 0x161   :  { %581 = vmatmul.mubr.f32.gmra.mxu1 %v6374_v25  ;;  %v6476_v25 = vpop.permute.xlu1 %376 }
 0x162   :  { %586 = vmatprep.mubr.f32.mxu1 %v10376_v4  ;;  %v403_v4 = vmul.f32 %v6449_v2, %v6402_v39  ;;  %10733 = vst [vmem:[#allocation37_spill] sm:$0xff] %v6476_v25 }
 0x165   :  { %587 = vmatmul.mubr.f32.gmra.mxu1 %v6381_v26  ;;  %v404_v26 = vmul.f32 %v6445_v0, %v6390_v33  ;;  %v6498_v33 = vmul.f32 %v6449_v2, %v6412_v44  ;;  %v6515_v44 = vmul.f32 %v6445_v0, %v6422_v50  ;;  %v6549_v15 = vpop.permute.xlu1 %386 }
 0x166   :  { %10739 = vst [vmem:[#allocation43_spill] sm:$0xff] %v6549_v15 }
 0x1e9   :  { %v498_v27 = vpop.f32.mrf.mxu1 }
 0x1ea   :  { %v499_v39 = vadd.f32 %v498_v27, %v400_v7  ;;  %v6506_v27 = vmul.f32 %v6449_v2, %v6418_v47  ;;  %v6532_v47 = vmul.f32 %v6445_v0, %v6432_v56  ;;  %v420_v56 = vmul.f32 %v6445_v0, %v6441_v62 }
 0x1eb   :  { %v500_v28 = vpop.f32.mrf.mxu1 }
 0x1ec   :  { %v501_v21 = vadd.f32 %v500_v28, %v401_v8  ;;  %v6519_v28 = vmul.f32 %v6449_v2, %v6422_v50  ;;  %v417_v8 = vmul.f32 %v6449_v2, %v6428_v54  ;;  %v422_v50 = vmul.f32 %v6445_v0, %v6447_v1 }
 0x1ed   :  { %v504_v29 = vpop.f32.mrf.mxu1  ;;  %v6547_v16 = vadd.f32 %v6468_v53, %v499_v39  ;;  %v427_v1 = vmul.f32 %v6449_v2, %v6476_v25 }
 0x1ee   :  { %v505_v38 = vadd.f32 %v504_v29, %v402_v9  ;;  %v6523_v29 = vmul.f32 %v6445_v0, %v6428_v54  ;;  %v6528_v9 = vpop.permute.xlu0 %381  ;;  %v6543_v54 = vld [vmem:[%s10370_s7 + $0x10] sm:$0xff]  ;;  %v6559_v13 = vadd.f32 %v6470_v59, %v501_v21 }
 0x1ef   :  { %v6384_v30 = vpop.f32.mrf.mxu1  ;;  %10736 = vst [vmem:[#allocation40_spill] sm:$0xff] %v6528_v9  ;;  %10737 = vst [vmem:[#allocation41_spill] sm:$0xff] %v6543_v54  ;;  %5651 = vmatprep.subr.mxu1 %v6543_v54  ;;  %v428_v21 = vmul.f32 %v6445_v0, %v6528_v9 }
 0x1f0   :  { %10738 = vst [vmem:[#allocation42_spill] sm:$0xff] %v6547_v16  ;;  %v6562_v12 = vadd.f32 %v6468_v53, %v505_v38  ;;  %v507_v39 = vadd.f32 %v6384_v30, %v403_v4  ;;  %5655 = vmatpush3.msra.mxu1 %v6543_v54  ;;  %v425_v38 = vmul.f32 %v6449_v2, %v6464_v10 }
 0x1f1   :  { %v6386_v31 = vpop.f32.mrf.mxu1  ;;  %v426_v4 = vmul.f32 %v6445_v0, %v6476_v25  ;;  %v430_v54 = vmul.f32 %v6445_v0, %v6549_v15 }
 0x1f2   :  { %v511_v62 = vadd.f32 %v6386_v31, %v404_v26  ;;  %v6581_v26 = vmul.f32 1.442695, %v6547_v16 }
 0x1f3   :  { %v6388_v32 = vpop.f32.mrf.mxu1 }
 0x1f4   :  { %v6598_v25 = vadd.f32 %v6468_v53, %v511_v62 }
 0x1f5   :  { %v6394_v35 = vpop.f32.mrf.mxu1 }
 0x1f7   :  { %v6396_v36 = vpop.f32.mrf.mxu1 }
 0x1f9   :  { %v6398_v37 = vpop.f32.mrf.mxu1 }
 0x1fa   :  { %10720 = vst [vmem:[#allocation24_spill] sm:$0xff] %v6398_v37  ;;  %v513_v37 = vadd.f32 %v6388_v32, %v405_v34  ;;  %v431_v32 = vmul.f32 %v6449_v2, %v6549_v15  ;;  %v6589_v34 = vmul.f32 1.442695, %v6559_v13  ;;  %v6607_v15 = vadd.f32 %v6396_v36, %v407_v58 }
 0x1fb   :  { %v6404_v40 = vpop.f32.mrf.mxu1 }
 0x1fc   :  { %10723 = vst [vmem:[#allocation27_spill] sm:$0xff] %v6404_v40  ;;  %v429_v40 = vmul.f32 %v6449_v2, %v6528_v9  ;;  %v6595_v9 = vadd.f32 %v6470_v59, %v507_v39  ;;  %v6604_v2 = vadd.f32 %v6394_v35, %v406_v24 }
 0x1fd   :  { %v6406_v41 = vpop.f32.mrf.mxu1 }
 0x1ff   :  { %v6410_v43 = vpop.f32.mrf.mxu1 }
 0x201   :  { %v6414_v45 = vpop.f32.mrf.mxu1 }
 0x203   :  { %v6416_v46 = vpop.f32.mrf.mxu1 }
 0x205   :  { %v6420_v48 = vpop.f32.mrf.mxu1 }
 0x207   :  { %v6424_v51 = vpop.f32.mrf.mxu1 }
 0x209   :  { %v6426_v52 = vpop.f32.mrf.mxu1 }
 0x20b   :  { %v6430_v55 = vpop.f32.mrf.mxu1 }
 0x20d   :  { %v6434_v57 = vpop.f32.mrf.mxu1 }
 0x20f   :  { %v6439_v61 = vpop.f32.mrf.mxu1 }
 0x211   :  { %v6443_v63 = vpop.f32.mrf.mxu1 }
 0x213   :  { %v6451_v3 = vpop.f32.mrf.mxu1 }
 0x214   :  { %v561_v24 = vadd.f32 %v6451_v3, %v421_v14 }
 0x215   :  { %v6456_v6 = vpop.f32.mrf.mxu1 }
 0x216   :  { %v565_v35 = vadd.f32 %v6456_v6, %v422_v50 }
 0x217   :  { %v6466_v49 = vpop.f32.mrf.mxu1 }
 0x219   :  { %v570_v5 = vpop.f32.mrf.mxu1 }
 0x21a   :  { %v571_v16 = vadd.f32 %v570_v5, %v424_v42 }
 0x21b   :  { %v572_v7 = vpop.f32.mrf.mxu1 }
 0x21c   :  { %v6633_v14 = vadd.f32 %v6468_v53, %v571_v16 }
 0x21d   :  { %v576_v17 = vpop.f32.mrf.mxu1 }
 0x21e   :  { %v577_v0 = vadd.f32 %v576_v17, %v426_v4  ;;  %v567_v4 = vadd.f32 %v6466_v49, %v423_v18  ;;  %vm661_vm8 = vcmp.gt.f32.partialorder %v6633_v14, 0.0 }
 0x21f   :  { %v578_v11 = vpop.f32.mrf.mxu1 }
 0x220   :  { %v579_v60 = vadd.f32 %v578_v11, %v427_v1  ;;  %v6592_v1 = vmul.f32 1.442695, %v6562_v12  ;;  %v6621_v36 = vadd.f32 %v6468_v53, %v577_v0  ;;  %v6637_v3 = vadd.f32 %v6470_v59, %v567_v4 }
 0x221   :  { %v582_v30 = vpop.f32.mrf.mxu1  ;;  %v531_v4 = vadd.f32 %v6410_v43, %v6498_v33 }
 0x222   :  { %v6584_v11 = vadd.f32 %v6470_v59, %v579_v60  ;;  %v583_v31 = vadd.f32 %v582_v30, %v428_v21  ;;  %v6601_v60 = vadd.f32 %v6470_v59, %v513_v37  ;;  %v573_v21 = vadd.f32 %v572_v7, %v425_v38 }
 0x223   :  { %v584_v10 = vpop.f32.mrf.mxu1  ;;  %v721_v16 = vmul.f32 1.442695, %v6621_v36  ;;  %v547_v38 = vadd.f32 %v6426_v52, %v6523_v29  ;;  %v715_v0 = vmul.f32 1.442695, %v6637_v3  ;;  %vm663_vm6 = vcmp.gt.f32.partialorder %v6621_v36, 0.0 }
 0x224   :  { %v585_v30 = vadd.f32 %v584_v10, %v429_v40  ;;  %v6610_v39 = vadd.f32 %v6468_v53, %v583_v31  ;;  %v723_v62 = vmul.f32 1.442695, %v6584_v11  ;;  %v549_v40 = vadd.f32 %v6430_v55, %v417_v8 }
 0x225   :  { %v588_v17 = vpop.f32.mrf.mxu1  ;;  %v6624_v10 = vadd.f32 %v6470_v59, %v573_v21  ;;  %v559_v55 = vadd.f32 %v6443_v63, %v420_v56  ;;  %v553_v8 = vadd.f32 %v6434_v57, %v6532_v47  ;;  %v6650_v56 = vadd.f32 %v6470_v59, %v561_v24  ;;  %v10741_v24 = vld [vmem:[#allocation38_spill] sm:$0xff] }
 0x226   :  { %v6615_v37 = vadd.f32 %v6470_v59, %v585_v30  ;;  %v589_v7 = vadd.f32 %v588_v17, %v430_v54  ;;  %v555_v54 = vadd.f32 %v6439_v61, %v419_v19  ;;  %v725_v50 = vmul.f32 1.442695, %v6610_v39 }
 0x227   :  { %v590_v42 = vpop.f32.mrf.mxu1  ;;  %5908 = vpow2.f32 %v723_v62  ;;  %v6646_v19 = vadd.f32 %v6468_v53, %v565_v35  ;;  %v719_v61 = vmul.f32 1.442695, %v6624_v10  ;;  %v6657_v31 = vadd.f32 %v6468_v53, %v559_v55  ;;  %v10742_v35 = vld [vmem:[#allocation24_spill] sm:$0xff] }
 0x228   :  { %v727_v18 = vmul.f32 1.442695, %v6615_v37  ;;  %v6628_v49 = vadd.f32 %v6468_v53, %v589_v7  ;;  %v591_v58 = vadd.f32 %v590_v42, %v431_v32  ;;  %v717_v47 = vmul.f32 1.442695, %v6633_v14  ;;  %v10740_v7 = vld [vmem:[#allocation27_spill] sm:$0xff] }
 0x229   :  { %v543_v57 = vadd.f32 %v6424_v51, %v6519_v28  ;;  %v6663_v32 = vadd.f32 %v6470_v59, %v555_v54  ;;  %v541_v21 = vadd.f32 %v6420_v48, %v6515_v44  ;;  %v6669_v52 = vadd.f32 %v6468_v53, %v553_v8 }
 0x22a   :  { %v729_v6 = vmul.f32 1.442695, %v6628_v49  ;;  %v6641_v5 = vadd.f32 %v6470_v59, %v591_v58  ;;  %5910 = vpow2.f32 %v727_v18  ;;  %v713_v29 = vmul.f32 1.442695, %v6646_v19 }
 0x22b   :  { %v537_v30 = vadd.f32 %v6416_v46, %v6506_v27  ;;  %v6675_v51 = vadd.f32 %v6470_v59, %v549_v40  ;;  %v711_v28 = vmul.f32 1.442695, %v6650_v56  ;;  %v535_v17 = vadd.f32 %v6414_v45, %v6502_v20 }
 0x22c   :  { %5912 = vpow2.f32 %v729_v6  ;;  %v731_v63 = vmul.f32 1.442695, %v6641_v5  ;;  %v6681_v44 = vadd.f32 %v6468_v53, %v547_v38  ;;  %v709_v48 = vmul.f32 1.442695, %v6657_v31 }
 0x22d   :  { %5914 = vpow2.f32 %v725_v50  ;;  %v6687_v46 = vadd.f32 %v6470_v59, %v543_v57  ;;  %v707_v27 = vmul.f32 1.442695, %v6663_v32  ;;  %v529_v62 = vadd.f32 %v6406_v41, %v6494_v22 }
 0x22e   :  { %5916 = vpow2.f32 %v731_v63  ;;  %v6693_v20 = vadd.f32 %v6468_v53, %v541_v21  ;;  %v705_v45 = vmul.f32 1.442695, %v6669_v52  ;;  %v525_v40 = vadd.f32 %v10740_v7, %v6490_v23 }
 0x22f   :  { %5918 = vpow2.f32 %v721_v16  ;;  %v6699_v33 = vadd.f32 %v6470_v59, %v537_v30  ;;  %v703_v43 = vmul.f32 1.442695, %v6675_v51  ;;  %v523_v42 = vadd.f32 %v10742_v35, %v10741_v24 }
 0x230   :  { %5920 = vpow2.f32 %v719_v61  ;;  %v6705_v22 = vadd.f32 %v6468_v53, %v535_v17  ;;  %v701_v41 = vmul.f32 1.442695, %v6681_v44  ;;  %v6710_v18 = vadd.f32 %v6468_v53, %v6604_v2 }
 0x231   :  { %5922 = vpow2.f32 %v717_v47  ;;  %v6713_v23 = vadd.f32 %v6470_v59, %v531_v4  ;;  %v699_v58 = vmul.f32 1.442695, %v6687_v46  ;;  %v6718_v55 = vadd.f32 %v6470_v59, %v6607_v15 }
 0x232   :  { %5924 = vpow2.f32 %v715_v0  ;;  %v6721_v50 = vadd.f32 %v6468_v53, %v529_v62  ;;  %v697_v6 = vmul.f32 1.442695, %v6693_v20  ;;  %v6725_v2 = vmul.f32 1.442695, %v6595_v9 }
 0x233   :  { %5926 = vpow2.f32 %v713_v29  ;;  %v6728_v16 = vadd.f32 %v6470_v59, %v525_v40  ;;  %v695_v61 = vmul.f32 1.442695, %v6699_v33  ;;  %v6732_v15 = vmul.f32 1.442695, %v6598_v25 }
 0x234   :  { %5928 = vpow2.f32 %v711_v28  ;;  %v5909_v54 = vpop.eup %5908  ;;  %v6735_v38 = vadd.f32 %v6468_v53, %v523_v42  ;;  %v693_v47 = vmul.f32 1.442695, %v6705_v22  ;;  %v679_v0 = vmul.f32 1.442695, %v6601_v60 }
 0x235   :  { %5930 = vpow2.f32 %v709_v48  ;;  %v681_v21 = vmul.f32 1.442695, %v6710_v18  ;;  %v691_v59 = vmul.f32 1.442695, %v6713_v23  ;;  %v683_v30 = vmul.f32 1.442695, %v6718_v55 }
 0x236   :  { %5932 = vpow2.f32 %v707_v27  ;;  %v689_v28 = vmul.f32 1.442695, %v6721_v50  ;;  %v687_v48 = vmul.f32 1.442695, %v6728_v16  ;;  %vm668_vm1 = vcmp.gt.f32.partialorder %v6641_v5, 0.0 }
 0x237   :  { %5934 = vpow2.f32 %v705_v45  ;;  %v5911_v8 = vpop.eup %5910  ;;  %v685_v45 = vmul.f32 1.442695, %v6735_v38  ;;  %vm667_vm2 = vcmp.gt.f32.partialorder %v6628_v49, 0.0  ;;  %v4938_v24 = vadd.f32 -1.0, %v5909_v54 }
 0x238   :  { %5936 = vpow2.f32 %v703_v43  ;;  %v4940_v27 = vadd.f32 -1.0, %v5911_v8  ;;  %vm666_vm3 = vcmp.gt.f32.partialorder %v6615_v37, 0.0  ;;  %vm665_vm4 = vcmp.gt.f32.partialorder %v6610_v39, 0.0 }
 0x239   :  { %v5913_v63 = vpop.eup %5912  ;;  %5938 = vpow2.f32 %v701_v41  ;;  %vm664_vm5 = vcmp.gt.f32.partialorder %v6584_v11, 0.0  ;;  %vm662_vm7 = vcmp.gt.f32.partialorder %v6624_v10, 0.0  ;;  %vm660_vm9 = vcmp.gt.f32.partialorder %v6637_v3, 0.0 }
 0x23a   :  { %v5915_v57 = vpop.eup %5914  ;;  %5940 = vpow2.f32 %v699_v58  ;;  %v4941_v17 = vadd.f32 -1.0, %v5913_v63  ;;  %v792_v63 = vsel %vm664_vm5, %v6584_v11, %v4938_v24  ;;  %vm659_vm10 = vcmp.gt.f32.partialorder %v6646_v19, 0.0 }
 0x23b   :  { %v5917_v29 = vpop.eup %5916  ;;  %5942 = vpow2.f32 %v697_v6  ;;  %v4939_v7 = vadd.f32 -1.0, %v5915_v57  ;;  %v794_v6 = vsel %vm666_vm3, %v6615_v37, %v4940_v27  ;;  %vm658_vm11 = vcmp.gt.f32.partialorder %v6650_v56, 0.0 }
 0x23c   :  { %v5919_v53 = vpop.eup %5918  ;;  %5944 = vpow2.f32 %v695_v61  ;;  %v4942_v4 = vadd.f32 -1.0, %v5917_v29  ;;  %v795_v42 = vsel %vm667_vm2, %v6628_v49, %v4941_v17  ;;  %vm657_vm12 = vcmp.gt.f32.partialorder %v6657_v31, 0.0 }
 0x23d   :  { %v5921_v62 = vpop.eup %5920  ;;  %5946 = vpow2.f32 %v693_v47  ;;  %v4937_v41 = vadd.f32 -1.0, %v5919_v53  ;;  %v793_v54 = vsel %vm665_vm4, %v6610_v39, %v4939_v7  ;;  %vm656_vm13 = vcmp.gt.f32.partialorder %v6663_v32, 0.0 }
 0x23e   :  { %v5923_v40 = vpop.eup %5922  ;;  %5948 = vpow2.f32 %v691_v59  ;;  %v796_v43 = vsel %vm668_vm1, %v6641_v5, %v4942_v4  ;;  %v4936_v8 = vadd.f32 -1.0, %v5921_v62  ;;  %vm655_vm14 = vcmp.gt.f32.partialorder %v6669_v52, 0.0 }
 0x23f   :  { %v5925_v35 = vpop.eup %5924  ;;  %5950 = vpow2.f32 %v689_v28  ;;  %797 = vmatprep.subr.mxu0 %v796_v43  ;;  %v4935_v61 = vadd.f32 -1.0, %v5923_v40  ;;  %v791_v57 = vsel %vm663_vm6, %v6621_v36, %v4937_v41  ;;  %vm654_vm15 = vcmp.gt.f32.partialorder %v6675_v51, 0.0 }
 0x240   :  { %v5927_v58 = vpop.eup %5926  ;;  %5952 = vpow2.f32 %v687_v48  ;;  %798 = vmatpush1.msra.mxu0 %v795_v42  ;;  %v4934_v47 = vadd.f32 -1.0, %v5925_v35  ;;  %v790_v29 = vsel %vm662_vm7, %v6624_v10, %v4936_v8  ;;  %vm653_vm1 = vcmp.gt.f32.partialorder %v6681_v44, 0.0 }
 0x241   :  { %v5929_v5 = vpop.eup %5928  ;;  %5954 = vpow2.f32 %v685_v45  ;;  %799 = vmatprep.subr.mxu0 %v794_v6  ;;  %v4933_v59 = vadd.f32 -1.0, %v5927_v58  ;;  %vm652_vm2 = vcmp.gt.f32.partialorder %v6687_v46, 0.0  ;;  %vm651_vm3 = vcmp.gt.f32.partialorder %v6693_v20, 0.0 }
 0x242   :  { %v5931_v49 = vpop.eup %5930  ;;  %5956 = vpow2.f32 %v683_v30  ;;  %800 = vmatpush1.msra.mxu0 %v793_v54  ;;  %v4932_v30 = vadd.f32 -1.0, %v5929_v5  ;;  %vm650_vm4 = vcmp.gt.f32.partialorder %v6699_v33, 0.0  ;;  %vm649_vm5 = vcmp.gt.f32.partialorder %v6705_v22, 0.0 }
 0x243   :  { %v5933_v37 = vpop.eup %5932  ;;  %5958 = vpow2.f32 %v681_v21  ;;  %801 = vmatprep.subr.mxu0 %v792_v63  ;;  %v789_v21 = vsel %vm661_vm8, %v6633_v14, %v4935_v61  ;;  %v4931_v36 = vadd.f32 -1.0, %v5931_v49  ;;  %vm648_vm6 = vcmp.gt.f32.partialorder %v6713_v23, 0.0 }
 0x244   :  { %v5935_v39 = vpop.eup %5934  ;;  %5960 = vpow2.f32 %v679_v0  ;;  %802 = vmatpush1.msra.mxu0 %v791_v57  ;;  %v788_v0 = vsel %vm660_vm9, %v6637_v3, %v4934_v47  ;;  %v4930_v10 = vadd.f32 -1.0, %v5933_v37  ;;  %vm647_vm7 = vcmp.gt.f32.partialorder %v6721_v50, 0.0 }
 0x245   :  { %v5937_v11 = vpop.eup %5936  ;;  %5962 = vpow2.f32 %v6732_v15  ;;  %803 = vmatprep.subr.mxu0 %v790_v29  ;;  %v787_v15 = vsel %vm659_vm10, %v6646_v19, %v4933_v59  ;;  %v4929_v14 = vadd.f32 -1.0, %v5935_v39  ;;  %vm646_vm8 = vcmp.gt.f32.partialorder %v6728_v16, 0.0 }
 0x246   :  { %v5939_v28 = vpop.eup %5938  ;;  %5964 = vpow2.f32 %v6725_v2  ;;  %804 = vmatpush1.msra.mxu0 %v789_v21  ;;  %v786_v2 = vsel %vm658_vm11, %v6650_v56, %v4932_v30  ;;  %v4928_v3 = vadd.f32 -1.0, %v5937_v11  ;;  %v784_v27 = vsel %vm656_vm13, %v6663_v32, %v4930_v10  ;;  %v10745_v10 = vld [vmem:[#allocation39_spill] sm:$0xff] }
 0x247   :  { %v5941_v17 = vpop.eup %5940  ;;  %5966 = vpow2.f32 %v6592_v1  ;;  %805 = vmatprep.subr.mxu0 %v788_v0  ;;  %v785_v1 = vsel %vm657_vm12, %v6657_v31, %v4931_v36  ;;  %v4927_v19 = vadd.f32 -1.0, %v5939_v28  ;;  %v783_v62 = vsel %vm655_vm14, %v6669_v52, %v4929_v14  ;;  %v10743_v28 = vld [vmem:[#allocation42_spill] sm:$0xff] }
 0x248   :  { %v5943_v53 = vpop.eup %5942  ;;  %5968 = vpow2.f32 %v6589_v34  ;;  %806 = vmatpush1.msra.mxu0 %v787_v15  ;;  %v4926_v34 = vadd.f32 -1.0, %v5941_v17  ;;  %v782_v31 = vsel %vm654_vm15, %v6675_v51, %v4928_v3  ;;  %vm645_vm9 = vcmp.gt.f32.partialorder %v6735_v38, 0.0  ;;  %v10744_v0 = vld [vmem:[#allocation6_spill] sm:$0xff]  ;;  %v10748_v17 = vld [vmem:[#allocation7_spill] sm:$0xff]  ;;  %v10750_v15 = vld [vmem:[#allocation9_spill] sm:$0xff] }
 0x249   :  { %v5945_v48 = vpop.eup %5944  ;;  %5970 = vpow2.f32 %v6581_v26  ;;  %807 = vmatprep.subr.mxu0 %v786_v2  ;;  %v4925_v26 = vadd.f32 -1.0, %v5943_v53  ;;  %v781_v32 = vsel %vm653_vm1, %v6681_v44, %v4927_v19  ;;  %vm644_vm10 = vcmp.gt.f32.partialorder %v6718_v55, 0.0  ;;  %v10751_v14 = vld [vmem:[#allocation10_spill] sm:$0xff]  ;;  %v10752_v53 = vld [vmem:[#allocation11_spill] sm:$0xff]  ;;  %v10753_v2 = vld [vmem:[#allocation12_spill] sm:$0xff] }
 0x24a   :  { %v5947_v4 = vpop.eup %5946  ;;  %808 = vmatpush1.msra.mxu0 %v785_v1  ;;  %v4924_v7 = vadd.f32 -1.0, %v5945_v48  ;;  %v780_v52 = vsel %vm652_vm2, %v6687_v46, %v4926_v34  ;;  %vm643_vm11 = vcmp.gt.f32.partialorder %v6710_v18, 0.0  ;;  %vm642_vm12 = vcmp.gt.f32.partialorder %v6601_v60, 0.0  ;;  %v10754_v3 = vld [vmem:[#allocation13_spill] sm:$0xff]  ;;  %v10755_v48 = vld [vmem:[#allocation14_spill] sm:$0xff]  ;;  %v10756_v1 = vld [vmem:[#allocation15_spill] sm:$0xff] }
 0x24b   :  { %v5949_v56 = vpop.eup %5948  ;;  %809 = vmatprep.subr.mxu0 %v784_v27  ;;  %v4923_v43 = vadd.f32 -1.0, %v5947_v4  ;;  %v779_v51 = vsel %vm651_vm3, %v6693_v20, %v4925_v26  ;;  %vm641_vm13 = vcmp.gt.f32.partialorder %v6598_v25, 0.0  ;;  %vm640_vm14 = vcmp.gt.f32.partialorder %v6595_v9, 0.0  ;;  %v10757_v19 = vld [vmem:[#allocation16_spill] sm:$0xff]  ;;  %v10758_v4 = vld [vmem:[#allocation17_spill] sm:$0xff]  ;;  %v10759_v27 = vld [vmem:[#allocation18_spill] sm:$0xff] }
 0x24c   :  { %v5951_v45 = vpop.eup %5950  ;;  %810 = vmatpush1.msra.mxu0 %v783_v62  ;;  %v4922_v35 = vadd.f32 -1.0, %v5949_v56  ;;  %v778_v44 = vsel %vm650_vm4, %v6699_v33, %v4924_v7  ;;  %vm639_vm15 = vcmp.gt.f32.partialorder %v6562_v12, 0.0  ;;  %vm638_vm1 = vcmp.gt.f32.partialorder %v6559_v13, 0.0  ;;  %v10760_v34 = vld [vmem:[#allocation19_spill] sm:$0xff]  ;;  %v10761_v56 = vld [vmem:[#allocation20_spill] sm:$0xff]  ;;  %v10762_v62 = vld [vmem:[#allocation21_spill] sm:$0xff] }
 0x24d   :  { %v5953_v40 = vpop.eup %5952  ;;  %811 = vmatprep.subr.mxu0 %v782_v31  ;;  %v4921_v41 = vadd.f32 -1.0, %v5951_v45  ;;  %v777_v46 = vsel %vm649_vm5, %v6705_v22, %v4923_v43  ;;  %vm637_vm2 = vcmp.gt.f32.partialorder %v10743_v28, 0.0  ;;  %v6852_v26 = vld [vmem:[%s10370_s7 + $0x8] sm:$0xff]  ;;  %v6860_v45 = vld [vmem:[%s10370_s7] sm:$0xff] }
 0x24e   :  { %v5955_v24 = vpop.eup %5954  ;;  %812 = vmatpush1.msra.mxu0 %v781_v32  ;;  %v4920_v6 = vadd.f32 -1.0, %v5953_v40  ;;  %v776_v20 = vsel %vm648_vm6, %v6713_v23, %v4922_v35  ;;  %5652 = vmatprep.subr.mxu1 %v6852_v26 }
 0x24f   :  { %v5957_v42 = vpop.eup %5956  ;;  %813 = vmatprep.subr.mxu0 %v780_v52  ;;  %v4919_v5 = vadd.f32 -1.0, %v5955_v24  ;;  %v775_v33 = vsel %vm647_vm7, %v6721_v50, %v4921_v41  ;;  %5656 = vmatpush3.msra.mxu1 %v6852_v26 }
 0x250   :  { %v5959_v58 = vpop.eup %5958  ;;  %814 = vmatpush1.msra.mxu0 %v779_v51  ;;  %v4918_v61 = vadd.f32 -1.0, %v5957_v42  ;;  %v774_v22 = vsel %vm646_vm8, %v6728_v16, %v4920_v6  ;;  %5653 = vmatprep.subr.mxu1 %v6860_v45 }
 0x251   :  { %v5961_v8 = vpop.eup %5960  ;;  %815 = vmatprep.subr.mxu0 %v778_v44  ;;  %v4917_v63 = vadd.f32 -1.0, %v5959_v58  ;;  %v773_v23 = vsel %vm645_vm9, %v6735_v38, %v4919_v5  ;;  %5657 = vmatpush3.msra.mxu1 %v6860_v45 }
 0x252   :  { %v5963_v54 = vpop.eup %5962  ;;  %816 = vmatpush1.msra.mxu0 %v777_v46  ;;  %v4916_v37 = vadd.f32 -1.0, %v5961_v8  ;;  %v772_v50 = vsel %vm644_vm10, %v6718_v55, %v4918_v61  ;;  %5426 = vmatprep.subr.mxu1 %v10745_v10 }
 0x253   :  { %v5965_v49 = vpop.eup %5964  ;;  %817 = vmatprep.subr.mxu0 %v776_v20  ;;  %v4915_v59 = vadd.f32 -1.0, %v5963_v54  ;;  %v771_v16 = vsel %vm643_vm11, %v6710_v18, %v4917_v63 }
 0x254   :  { %v5967_v47 = vpop.eup %5966  ;;  %818 = vmatpush1.msra.mxu0 %v775_v33  ;;  %v4914_v29 = vadd.f32 -1.0, %v5965_v49  ;;  %v770_v11 = vsel %vm642_vm12, %v6601_v60, %v4916_v37 }
 0x255   :  { %v5969_v57 = vpop.eup %5968  ;;  %819 = vmatprep.subr.mxu0 %v774_v22  ;;  %v4913_v30 = vadd.f32 -1.0, %v5967_v47  ;;  %v769_v21 = vsel %vm641_vm13, %v6598_v25, %v4915_v59 }
 0x256   :  { %v5971_v39 = vpop.eup %5970  ;;  %820 = vmatpush1.msra.mxu0 %v773_v23  ;;  %v4912_v38 = vadd.f32 -1.0, %v5969_v57  ;;  %v768_v36 = vsel %vm640_vm14, %v6595_v9, %v4914_v29  ;;  %v10746_v9 = vmov 0.0  }
 0x257   :  { %821 = vmatprep.subr.mxu0 %v772_v50  ;;  %v4911_v55 = vadd.f32 -1.0, %v5971_v39  ;;  %v767_v18 = vsel %vm639_vm15, %v6562_v12, %v4913_v30  ;;  %v10747_v12 = vld [vmem:[#allocation41_spill] sm:$0xff] }
 0x258   :  { %822 = vmatpush1.msra.mxu0 %v771_v16  ;;  %v766_v60 = vsel %vm638_vm1, %v6559_v13, %v4912_v38  ;;  %v10749_v13 = vld [vmem:[#allocation8_spill] sm:$0xff] }
 0x259   :  { %823 = vmatprep.subr.mxu0 %v770_v11  ;;  %v765_v25 = vsel %vm637_vm2, %v10743_v28, %v4911_v55 }
 0x25a   :  { %824 = vmatpush1.msra.mxu0 %v769_v21 }
 0x25b   :  { %825 = vmatprep.subr.mxu0 %v768_v36 }
 0x25c   :  { %826 = vmatpush1.msra.mxu0 %v767_v18 }
 0x25d   :  { %827 = vmatprep.subr.mxu0 %v766_v60  ;;  %v7097_v60 = vld [vmem:[%s10370_s7 + $0x18] sm:$0xff] }
 0x25e   :  { %828 = vmatpush1.msra.mxu0 %v765_v25 }
 0x25f   :  { %862 = vmatmul.mubr.f32.vlgmr.msra.gmra.mxu0 %v10744_v0  ;;  %5394 = vmatprep.subr.mxu0 %v10745_v10 }
 0x260   :  { %867 = vmatprep.mubr.f32.mxu0 %v10746_v9  ;;  %5395 = vmatpush3.msra.mxu0 %v10745_v10 }
 0x261   :  { %5396 = vmatprep.subr.mxu0 %v10747_v12 }
 0x262   :  { %5397 = vmatpush3.msra.mxu0 %v10747_v12 }
 0x263   :  { %868 = vmatmul.mubr.f32.gmra.mxu0 %v10748_v17  ;;  %5398 = vmatprep.subr.mxu0 %v6852_v26 }
 0x264   :  { %873 = vmatprep.mubr.f32.mxu0 %v10746_v9  ;;  %5399 = vmatpush3.msra.mxu0 %v6852_v26 }
 0x265   :  { %5400 = vmatprep.subr.mxu0 %v6860_v45 }
 0x266   :  { %5401 = vmatpush3.msra.mxu0 %v6860_v45 }
 0x267   :  { %874 = vmatmul.mubr.f32.gmra.mxu0 %v10749_v13  ;;  %5458 = vmatprep.subr.mxu0 %v10745_v10 }
 0x268   :  { %879 = vmatprep.mubr.f32.mxu0 %v10746_v9 }
 0x26b   :  { %880 = vmatmul.mubr.f32.gmra.mxu0 %v10750_v15 }
 0x26c   :  { %885 = vmatprep.mubr.f32.mxu0 %v10746_v9 }
 0x26f   :  { %886 = vmatmul.mubr.f32.gmra.mxu0 %v10751_v14 }
 0x270   :  { %891 = vmatprep.mubr.f32.mxu0 %v10746_v9 }
 0x273   :  { %892 = vmatmul.mubr.f32.gmra.mxu0 %v10752_v53 }
 0x274   :  { %897 = vmatprep.mubr.f32.mxu0 %v10746_v9 }
 0x277   :  { %898 = vmatmul.mubr.f32.gmra.mxu0 %v10753_v2 }
 0x278   :  { %903 = vmatprep.mubr.f32.mxu0 %v10746_v9 }
 0x27b   :  { %904 = vmatmul.mubr.f32.gmra.mxu0 %v10754_v3 }
 0x27c   :  { %909 = vmatprep.mubr.f32.mxu0 %v10746_v9 }
 0x27f   :  { %910 = vmatmul.mubr.f32.gmra.mxu0 %v10755_v48 }
 0x280   :  { %915 = vmatprep.mubr.f32.mxu0 %v10746_v9 }
 0x283   :  { %916 = vmatmul.mubr.f32.gmra.mxu0 %v10756_v1 }
 0x284   :  { %921 = vmatprep.mubr.f32.mxu0 %v10746_v9 }
 0x287   :  { %922 = vmatmul.mubr.f32.gmra.mxu0 %v10757_v19 }
 0x288   :  { %927 = vmatprep.mubr.f32.mxu0 %v10746_v9 }
 0x28b   :  { %928 = vmatmul.mubr.f32.gmra.mxu0 %v10758_v4 }
 0x28c   :  { %933 = vmatprep.mubr.f32.mxu0 %v10746_v9 }
 0x28f   :  { %934 = vmatmul.mubr.f32.gmra.mxu0 %v10759_v27 }
 0x290   :  { %939 = vmatprep.mubr.f32.mxu0 %v10746_v9 }
 0x293   :  { %940 = vmatmul.mubr.f32.gmra.mxu0 %v10760_v34 }
 0x294   :  { %945 = vmatprep.mubr.f32.mxu0 %v10746_v9 }
 0x297   :  { %946 = vmatmul.mubr.f32.gmra.mxu0 %v10761_v56 }
 0x298   :  { %951 = vmatprep.mubr.f32.mxu0 %v10746_v9 }
 0x29b   :  { %952 = vmatmul.mubr.f32.gmra.mxu0 %v10762_v62 }
 0x31f   :  { %v863_v31 = vpop.f32.mrf.mxu0 }
 0x320   :  { %1386 = vrot.lane.b32.xlu1 %v863_v31, %s6003_s4  ;;  %5402 = vmatprep.mubr.msk.f32.mxu0 %vm98_vm0, %v863_v31 }
 0x321   :  { %v6871_v7 = vpop.f32.mrf.mxu0 }
 0x322   :  { %3375 = vrot.lane.b32.xlu0 %v6871_v7, %s6004_s3 }
 0x323   :  { %v869_v40 = vpop.f32.mrf.mxu0 }
 0x324   :  { %1787 = vrot.lane.b32.xlu1 %v863_v31, %s6004_s3  ;;  %5403 = vmatmul.mubr.msk.f32.vlgmr.msra.gmra.mxu0 %vm98_vm0, %v869_v40 }
 0x325   :  { %v6877_v32 = vpop.f32.mrf.mxu0  ;;  %5459 = vmatpush3.msra.mxu0 %v10745_v10 }
 0x326   :  { %3776 = vrot.lane.b32.xlu0 %v6871_v7, %s6005_s23  ;;  %5460 = vmatprep.subr.mxu0 %v10747_v12 }
 0x327   :  { %v875_v43 = vpop.f32.mrf.mxu0  ;;  %5461 = vmatpush3.msra.mxu0 %v10747_v12 }
 0x328   :  { %2188 = vrot.lane.b32.xlu1 %v863_v31, %s6005_s23  ;;  %5405 = vmatprep.mubr.msk.f32.mxu0 %vm98_vm0, %v875_v43 }
 0x329   :  { %v6886_v24 = vpop.f32.mrf.mxu0  ;;  %5462 = vmatprep.subr.mxu0 %v6852_v26 }
 0x32a   :  { %1388 = vrot.lane.b32.xlu0 %v869_v40, %s6003_s4  ;;  %5463 = vmatpush3.msra.mxu0 %v6852_v26 }
 0x32b   :  { %v881_v52 = vpop.f32.mrf.mxu0  ;;  %5464 = vmatprep.subr.mxu0 %v6860_v45 }
 0x32c   :  { %2974 = vrot.lane.b32.xlu1 %v6871_v7, %s6003_s4  ;;  %5406 = vmatmul.mubr.msk.f32.gmra.mxu0 %vm98_vm0, %v881_v52 }
 0x32d   :  { %v6895_v35 = vpop.f32.mrf.mxu0  ;;  %5465 = vmatpush3.msra.mxu0 %v6860_v45 }
 0x32e   :  { %1789 = vrot.lane.b32.xlu0 %v869_v40, %s6004_s3  ;;  %5522 = vmatprep.subr.mxu0 %v10745_v10 }
 0x32f   :  { %v887_v42 = vpop.f32.mrf.mxu0 }
 0x330   :  { %3377 = vrot.lane.b32.xlu1 %v6877_v32, %s6004_s3  ;;  %5408 = vmatprep.mubr.msk.f32.mxu0 %vm98_vm0, %v887_v42 }
 0x331   :  { %v6903_v51 = vpop.f32.mrf.mxu0 }
 0x332   :  { %2190 = vrot.lane.b32.xlu0 %v869_v40, %s6005_s23 }
 0x333   :  { %v6906_v41 = vpop.f32.mrf.mxu0 }
 0x334   :  { %1390 = vrot.lane.b32.xlu1 %v875_v43, %s6003_s4  ;;  %5409 = vmatmul.mubr.msk.f32.gmra.mxu0 %vm98_vm0, %v6906_v41 }
 0x335   :  { %v6911_v58 = vpop.f32.mrf.mxu0 }
 0x336   :  { %2976 = vrot.lane.b32.xlu0 %v6877_v32, %s6003_s4 }
 0x337   :  { %v6915_v44 = vpop.f32.mrf.mxu0 }
 0x338   :  { %1791 = vrot.lane.b32.xlu1 %v875_v43, %s6004_s3  ;;  %5411 = vmatprep.mubr.msk.f32.mxu1 %vm98_vm0, %v6915_v44 }
 0x339   :  { %v6920_v6 = vpop.f32.mrf.mxu0 }
 0x33a   :  { %3778 = vrot.lane.b32.xlu0 %v6877_v32, %s6005_s23 }
 0x33b   :  { %v6924_v8 = vpop.f32.mrf.mxu0 }
 0x33c   :  { %2192 = vrot.lane.b32.xlu1 %v875_v43, %s6005_s23  ;;  %5412 = vmatmul.mubr.msk.f32.vlgmr.msra.gmra.mxu1 %vm98_vm0, %v6924_v8 }
 0x33d   :  { %v6929_v46 = vpop.f32.mrf.mxu0  ;;  %5427 = vmatpush3.msra.mxu1 %v10745_v10 }
 0x33e   :  { %3780 = vrot.lane.b32.xlu0 %v6886_v24, %s6005_s23  ;;  %5428 = vmatprep.subr.mxu1 %v10747_v12 }
 0x33f   :  { %v6935_v5 = vpop.f32.mrf.mxu0  ;;  %5429 = vmatpush3.msra.mxu1 %v10747_v12 }
 0x340   :  { %2978 = vrot.lane.b32.xlu1 %v6886_v24, %s6003_s4  ;;  %5414 = vmatprep.mubr.msk.f32.mxu1 %vm98_vm0, %v6935_v5 }
 0x341   :  { %v6942_v54 = vpop.f32.mrf.mxu0  ;;  %5430 = vmatprep.subr.mxu1 %v6852_v26 }
 0x342   :  { %3381 = vrot.lane.b32.xlu0 %v6895_v35, %s6004_s3  ;;  %5431 = vmatpush3.msra.mxu1 %v6852_v26 }
 0x343   :  { %v917_v20 = vpop.f32.mrf.mxu0  ;;  %5432 = vmatprep.subr.mxu1 %v6860_v45 }
 0x344   :  { %3379 = vrot.lane.b32.xlu1 %v6886_v24, %s6004_s3  ;;  %5415 = vmatmul.mubr.msk.f32.gmra.mxu1 %vm98_vm0, %v917_v20 }
 0x345   :  { %v6952_v61 = vpop.f32.mrf.mxu0  ;;  %5433 = vmatpush3.msra.mxu1 %v6860_v45 }
 0x346   :  { %3782 = vrot.lane.b32.xlu0 %v6895_v35, %s6005_s23  ;;  %5490 = vmatprep.subr.mxu1 %v10745_v10 }
 0x347   :  { %v6958_v49 = vpop.f32.mrf.mxu0 }
 0x348   :  { %1392 = vrot.lane.b32.xlu1 %v881_v52, %s6003_s4  ;;  %5417 = vmatprep.mubr.msk.f32.mxu1 %vm98_vm0, %v6958_v49 }
 0x349   :  { %v6963_v33 = vpop.f32.mrf.mxu0 }
 0x34a   :  { %1394 = vrot.lane.b32.xlu0 %v887_v42, %s6003_s4 }
 0x34b   :  { %v6966_v63 = vpop.f32.mrf.mxu0 }
 0x34c   :  { %1793 = vrot.lane.b32.xlu1 %v881_v52, %s6004_s3  ;;  %5418 = vmatmul.mubr.msk.f32.gmra.mxu1 %vm98_vm0, %v6966_v63 }
 0x34d   :  { %v6971_v47 = vpop.f32.mrf.mxu0 }
 0x34e   :  { %1795 = vrot.lane.b32.xlu0 %v887_v42, %s6004_s3 }
 0x34f   :  { %v6974_v22 = vpop.f32.mrf.mxu0 }
 0x350   :  { %2194 = vrot.lane.b32.xlu1 %v881_v52, %s6005_s23  ;;  %5420 = vmatprep.mubr.msk.f32.mxu1 %vm98_vm0, %v6974_v22 }
 0x351   :  { %v6979_v37 = vpop.f32.mrf.mxu0 }
 0x352   :  { %2196 = vrot.lane.b32.xlu0 %v887_v42, %s6005_s23 }
 0x353   :  { %v6982_v57 = vpop.f32.mrf.mxu0 }
 0x354   :  { %2980 = vrot.lane.b32.xlu1 %v6895_v35, %s6003_s4  ;;  %5421 = vmatmul.mubr.msk.f32.gmra.mxu1 %vm98_vm0, %v6982_v57 }
 0x355   :  { %v6988_v23 = vpop.f32.mrf.mxu0 }
 0x356   :  { %2982 = vrot.lane.b32.xlu0 %v6903_v51, %s6003_s4 }
 0x357   :  { %v6992_v59 = vpop.f32.mrf.mxu0 }
 0x358   :  { %3383 = vrot.lane.b32.xlu1 %v6903_v51, %s6004_s3  ;;  %5423 = vmatprep.mubr.msk.f32.mxu1 %vm98_vm0, %v6992_v59 }
 0x359   :  { %v6998_v39 = vpop.f32.mrf.mxu0 }
 0x35a   :  { %3784 = vrot.lane.b32.xlu0 %v6903_v51, %s6005_s23 }
 0x35b   :  { %v7002_v50 = vpop.f32.mrf.mxu0 }
 0x35c   :  { %1396 = vrot.lane.b32.xlu1 %v6906_v41, %s6003_s4  ;;  %5424 = vmatmul.mubr.msk.f32.gmra.mxu1 %vm98_vm0, %v7002_v50 }
 0x35d   :  { %v7188_v40 = vpop.f32.mrf.mxu0 }
 0x35e   :  { %3385 = vrot.lane.b32.xlu0 %v6911_v58, %s6004_s3 }
 0x360   :  { %1797 = vrot.lane.b32.xlu1 %v6906_v41, %s6004_s3 }
 0x362   :  { %3786 = vrot.lane.b32.xlu0 %v6911_v58, %s6005_s23 }
 0x364   :  { %2198 = vrot.lane.b32.xlu1 %v6906_v41, %s6005_s23 }
 0x366   :  { %1398 = vrot.lane.b32.xlu0 %v6915_v44, %s6003_s4 }
 0x368   :  { %2984 = vrot.lane.b32.xlu1 %v6911_v58, %s6003_s4 }
 0x36a   :  { %1799 = vrot.lane.b32.xlu0 %v6915_v44, %s6004_s3 }
 0x36c   :  { %3387 = vrot.lane.b32.xlu1 %v6920_v6, %s6004_s3 }
 0x36e   :  { %2200 = vrot.lane.b32.xlu0 %v6915_v44, %s6005_s23 }
 0x370   :  { %1400 = vrot.lane.b32.xlu1 %v6924_v8, %s6003_s4 }
 0x372   :  { %2986 = vrot.lane.b32.xlu0 %v6920_v6, %s6003_s4 }
 0x374   :  { %1801 = vrot.lane.b32.xlu1 %v6924_v8, %s6004_s3 }
 0x376   :  { %3788 = vrot.lane.b32.xlu0 %v6920_v6, %s6005_s23 }
 0x378   :  { %2202 = vrot.lane.b32.xlu1 %v6924_v8, %s6005_s23 }
 0x37a   :  { %3790 = vrot.lane.b32.xlu0 %v6929_v46, %s6005_s23 }
 0x37c   :  { %2988 = vrot.lane.b32.xlu1 %v6929_v46, %s6003_s4 }
 0x37e   :  { %1402 = vrot.lane.b32.xlu0 %v6935_v5, %s6003_s4 }
 0x380   :  { %3389 = vrot.lane.b32.xlu1 %v6929_v46, %s6004_s3 }
 0x382   :  { %1803 = vrot.lane.b32.xlu0 %v6935_v5, %s6004_s3 }
 0x384   :  { %3391 = vrot.lane.b32.xlu1 %v6942_v54, %s6004_s3 }
 0x386   :  { %2204 = vrot.lane.b32.xlu0 %v6935_v5, %s6005_s23 }
 0x388   :  { %1404 = vrot.lane.b32.xlu1 %v917_v20, %s6003_s4 }
 0x38a   :  { %2990 = vrot.lane.b32.xlu0 %v6942_v54, %s6003_s4 }
 0x38c   :  { %1805 = vrot.lane.b32.xlu1 %v917_v20, %s6004_s3 }
 0x38e   :  { %3792 = vrot.lane.b32.xlu0 %v6942_v54, %s6005_s23 }
 0x390   :  { %2206 = vrot.lane.b32.xlu1 %v917_v20, %s6005_s23 }
 0x392   :  { %v1387_v29 = vpop.permute.xlu1 %1386  ;;  %3794 = vrot.lane.b32.xlu0 %v6952_v61, %s6005_s23 }
 0x393   :  { %5434 = vmatprep.mubr.msk.f32.mxu1 %vm98_vm0, %v1387_v29 }
 0x394   :  { %v7060_v16 = vpop.permute.xlu0 %3375  ;;  %2992 = vrot.lane.b32.xlu1 %v6952_v61, %s6003_s4 }
 0x396   :  { %v1788_v30 = vpop.permute.xlu1 %1787  ;;  %1406 = vrot.lane.b32.xlu0 %v6958_v49, %s6003_s4 }
 0x397   :  { %5466 = vmatprep.mubr.msk.f32.mxu0 %vm98_vm0, %v1788_v30  ;;  %v7229_v30 = vld [vmem:[%s10372_s9] ss:$0 sm:$0xff] }
 0x398   :  { %v7067_v11 = vpop.permute.xlu0 %3776  ;;  %3393 = vrot.lane.b32.xlu1 %v6952_v61, %s6004_s3 }
 0x399   :  { %10763 = vst [vmem:[#allocation27_spill] sm:$0xff] %v7067_v11 }
 0x39a   :  { %v7071_v38 = vpop.permute.xlu1 %2188  ;;  %1807 = vrot.lane.b32.xlu0 %v6958_v49, %s6004_s3 }
 0x39c   :  { %v1389_v21 = vpop.permute.xlu0 %1388  ;;  %3395 = vrot.lane.b32.xlu1 %v6963_v33, %s6004_s3 }
 0x39d   :  { %5435 = vmatmul.mubr.msk.f32.vlgmr.msra.gmra.mxu1 %vm98_vm0, %v1389_v21 }
 0x39e   :  { %v7078_v55 = vpop.permute.xlu1 %2974  ;;  %2208 = vrot.lane.b32.xlu0 %v6958_v49, %s6005_s23  ;;  %5491 = vmatpush3.msra.mxu1 %v10745_v10 }
 0x39f   :  { %5492 = vmatprep.subr.mxu1 %v10747_v12 }
 0x3a0   :  { %v1790_v36 = vpop.permute.xlu0 %1789  ;;  %3796 = vrot.lane.b32.xlu1 %v6963_v33, %s6005_s23  ;;  %5493 = vmatpush3.msra.mxu1 %v10747_v12 }
 0x3a1   :  { %5467 = vmatmul.mubr.msk.f32.vlgmr.msra.gmra.mxu0 %vm98_vm0, %v1790_v36  ;;  %5494 = vmatprep.subr.mxu1 %v6852_v26 }
 0x3a2   :  { %v7089_v18 = vpop.permute.xlu1 %3377  ;;  %2994 = vrot.lane.b32.xlu0 %v6963_v33, %s6003_s4  ;;  %5495 = vmatpush3.msra.mxu1 %v6852_v26 }
 0x3a3   :  { %5523 = vmatpush3.msra.mxu0 %v7097_v60  ;;  %5496 = vmatprep.subr.mxu1 %v6860_v45 }
 0x3a4   :  { %v7101_v28 = vpop.permute.xlu0 %2190  ;;  %1408 = vrot.lane.b32.xlu1 %v6966_v63, %s6003_s4  ;;  %5524 = vmatprep.subr.mxu0 %v10747_v12 }
 0x3a5   :  { %5525 = vmatpush3.msra.mxu0 %v10747_v12  ;;  %5497 = vmatpush3.msra.mxu1 %v6860_v45 }
 0x3a6   :  { %v1391_v25 = vpop.permute.xlu1 %1390  ;;  %3798 = vrot.lane.b32.xlu0 %v6971_v47, %s6005_s23  ;;  %5526 = vmatprep.subr.mxu0 %v6852_v26 }
 0x3a7   :  { %5437 = vmatprep.mubr.msk.f32.mxu1 %vm98_vm0, %v1391_v25  ;;  %5527 = vmatpush3.msra.mxu0 %v6852_v26 }
 0x3a8   :  { %v7113_v0 = vpop.permute.xlu0 %2976  ;;  %1809 = vrot.lane.b32.xlu1 %v6966_v63, %s6004_s3  ;;  %5528 = vmatprep.subr.mxu0 %v6860_v45 }
 0x3a9   :  { %5529 = vmatpush3.msra.mxu0 %v6860_v45  ;;  %5554 = vmatprep.subr.mxu1 %v7097_v60 }
 0x3aa   :  { %v1792_v10 = vpop.permute.xlu1 %1791  ;;  %1410 = vrot.lane.b32.xlu0 %v6974_v22, %s6003_s4  ;;  %5586 = vmatprep.subr.mxu0 %v7097_v60 }
 0x3ab   :  { %5469 = vmatprep.mubr.msk.f32.mxu0 %vm98_vm0, %v1792_v10 }
 0x3ac   :  { %v7124_v12 = vpop.permute.xlu0 %3778  ;;  %2210 = vrot.lane.b32.xlu1 %v6966_v63, %s6005_s23  ;;  %v7217_v63 = vld [vmem:[%s10371_s8] ss:$0 sm:$0xff] }
 0x3ad   :  { %10764 = vst [vmem:[#allocation38_spill] sm:$0xff] %v7124_v12 }
 0x3ae   :  { %v7128_v17 = vpop.permute.xlu1 %2192  ;;  %1811 = vrot.lane.b32.xlu0 %v6974_v22, %s6004_s3 }
 0x3b0   :  { %v7132_v13 = vpop.permute.xlu0 %3780  ;;  %2996 = vrot.lane.b32.xlu1 %v6971_v47, %s6003_s4 }
 0x3b1   :  { %10765 = vst [vmem:[#allocation24_spill] sm:$0xff] %v7132_v13 }
 0x3b2   :  { %v7136_v15 = vpop.permute.xlu1 %2978  ;;  %2212 = vrot.lane.b32.xlu0 %v6974_v22, %s6005_s23 }
 0x3b4   :  { %v7140_v14 = vpop.permute.xlu0 %3381  ;;  %3397 = vrot.lane.b32.xlu1 %v6971_v47, %s6004_s3 }
 0x3b5   :  { %10766 = vst [vmem:[#allocation42_spill] sm:$0xff] %v7140_v14  ;;  %v10805_v14 = vld [vmem:[#allocation30_spill] sm:$0xff] }
 0x3b6   :  { %v7144_v53 = vpop.permute.xlu1 %3379  ;;  %2998 = vrot.lane.b32.xlu0 %v6979_v37, %s6003_s4 }
 0x3b7   :  { %10767 = vst [vmem:[#allocation6_spill] sm:$0xff] %v7144_v53 }
 0x3b8   :  { %v7148_v2 = vpop.permute.xlu0 %3782  ;;  %3399 = vrot.lane.b32.xlu1 %v6979_v37, %s6004_s3 }
 0x3b9   :  { %10768 = vst [vmem:[#allocation39_spill] sm:$0xff] %v7148_v2 }
 0x3ba   :  { %v1393_v3 = vpop.permute.xlu1 %1392  ;;  %3802 = vrot.lane.b32.xlu0 %v6988_v23, %s6005_s23 }
 0x3bb   :  { %5438 = vmatmul.mubr.msk.f32.gmra.mxu1 %vm98_vm0, %v1393_v3 }
 0x3bc   :  { %v1395_v48 = vpop.permute.xlu0 %1394  ;;  %3800 = vrot.lane.b32.xlu1 %v6979_v37, %s6005_s23 }
 0x3bd   :  { %5440 = vmatprep.mubr.msk.f32.mxu1 %vm98_vm0, %v1395_v48  ;;  %v10779_v48 = vld [vmem:[#allocation25_spill] sm:$0xff] }
 0x3be   :  { %v1794_v1 = vpop.permute.xlu1 %1793  ;;  %1414 = vrot.lane.b32.xlu0 %v6992_v59, %s6003_s4 }
 0x3bf   :  { %5470 = vmatmul.mubr.msk.f32.gmra.mxu0 %vm98_vm0, %v1794_v1  ;;  %v972_v1 = vmul.f32 %v7217_v63, %v10779_v48  ;;  %v7272_v48 = vld [vmem:[%s10373_s10] ss:$0 sm:$0xff] }
 0x3c0   :  { %v1796_v19 = vpop.permute.xlu0 %1795  ;;  %1412 = vrot.lane.b32.xlu1 %v6982_v57, %s6003_s4 }
 0x3c1   :  { %5472 = vmatprep.mubr.msk.f32.mxu0 %vm98_vm0, %v1796_v19 }
 0x3c2   :  { %v7164_v4 = vpop.permute.xlu1 %2194  ;;  %1815 = vrot.lane.b32.xlu0 %v6992_v59, %s6004_s3 }
 0x3c4   :  { %v7168_v27 = vpop.permute.xlu0 %2196  ;;  %1813 = vrot.lane.b32.xlu1 %v6982_v57, %s6004_s3 }
 0x3c6   :  { %v7172_v34 = vpop.permute.xlu1 %2980  ;;  %2216 = vrot.lane.b32.xlu0 %v6992_v59, %s6005_s23 }
 0x3c8   :  { %v7176_v56 = vpop.permute.xlu0 %2982  ;;  %2214 = vrot.lane.b32.xlu1 %v6982_v57, %s6005_s23  ;;  %v10776_v57 = vld [vmem:[#allocation23_spill] sm:$0xff] }
 0x3c9   :  { %10769 = vst [vmem:[#allocation41_spill] sm:$0xff] %v7176_v56  ;;  %v969_v59 = vmul.f32 %v7217_v63, %v10776_v57 }
 0x3ca   :  { %v7180_v62 = vpop.permute.xlu1 %3383  ;;  %3002 = vrot.lane.b32.xlu0 %v6998_v39, %s6003_s4 }
 0x3cb   :  { %10770 = vst [vmem:[#allocation7_spill] sm:$0xff] %v7180_v62  ;;  %v7236_v25 = vadd.f32 %v7229_v30, %v969_v59  ;;  %v7259_v59 = vadd.f32 %v7229_v30, %v972_v1 }
 0x3cc   :  { %v7184_v31 = vpop.permute.xlu0 %3784  ;;  %3000 = vrot.lane.b32.xlu1 %v6988_v23, %s6003_s4 }
 0x3cd   :  { %10771 = vst [vmem:[#allocation8_spill] sm:$0xff] %v7184_v31  ;;  %10778 = vst [vmem:[#allocation14_spill] sm:$0xff] %v7236_v25 }
 0x3ce   :  { %v1397_v43 = vpop.permute.xlu1 %1396  ;;  %3806 = vrot.lane.b32.xlu0 %v7188_v40, %s6005_s23  ;;  %10782 = vst [vmem:[#allocation16_spill] sm:$0xff] %v7259_v59 }
 0x3cf   :  { %5441 = vmatmul.mubr.msk.f32.gmra.mxu1 %vm98_vm0, %v1397_v43  ;;  %v7245_v43 = vstv %s10363_s0 }
 0x3d0   :  { %v7193_v52 = vpop.permute.xlu0 %3385  ;;  %3401 = vrot.lane.b32.xlu1 %v6988_v23, %s6004_s3 }
 0x3d1   :  { %10772 = vst [vmem:[#allocation9_spill] sm:$0xff] %v7193_v52 }
 0x3d2   :  { %v1798_v42 = vpop.permute.xlu1 %1797 }
 0x3d3   :  { %5473 = vmatmul.mubr.msk.f32.gmra.mxu0 %vm98_vm0, %v1798_v42 }
 0x3d4   :  { %v7198_v41 = vpop.permute.xlu0 %3786  ;;  %3403 = vrot.lane.b32.xlu1 %v6998_v39, %s6004_s3 }
 0x3d5   :  { %10773 = vst [vmem:[#allocation10_spill] sm:$0xff] %v7198_v41  ;;  %v10787_v41 = vld [vmem:[#allocation29_spill] sm:$0xff] }
 0x3d6   :  { %v7202_v44 = vpop.permute.xlu1 %2198  ;;  %v974_v31 = vmul.f32 %v7217_v63, %v10787_v41 }
 0x3d8   :  { %v1399_v8 = vpop.permute.xlu0 %1398  ;;  %3804 = vrot.lane.b32.xlu1 %v6998_v39, %s6005_s23 }
 0x3d9   :  { %5443 = vmatprep.mubr.msk.f32.mxu1 %vm98_vm0, %v1399_v8 }
 0x3da   :  { %v7207_v5 = vpop.permute.xlu1 %2984 }
 0x3db   :  { %10774 = vst [vmem:[#allocation11_spill] sm:$0xff] %v7207_v5 }
 0x3dc   :  { %v1800_v20 = vpop.permute.xlu0 %1799  ;;  %1416 = vrot.lane.b32.xlu1 %v7002_v50, %s6003_s4 }
 0x3dd   :  { %5475 = vmatprep.mubr.msk.f32.mxu0 %vm98_vm0, %v1800_v20 }
 0x3de   :  { %v7212_v49 = vpop.permute.xlu1 %3387 }
 0x3df   :  { %10775 = vst [vmem:[#allocation12_spill] sm:$0xff] %v7212_v49 }
 0x3e0   :  { %v7219_v22 = vpop.permute.xlu0 %2200  ;;  %1817 = vrot.lane.b32.xlu1 %v7002_v50, %s6004_s3 }
 0x3e2   :  { %v1401_v29 = vpop.permute.xlu1 %1400 }
 0x3e3   :  { %5444 = vmatmul.mubr.msk.f32.gmra.mxu1 %vm98_vm0, %v1401_v29 }
 0x3e4   :  { %v7231_v21 = vpop.permute.xlu0 %2986  ;;  %2218 = vrot.lane.b32.xlu1 %v7002_v50, %s6005_s23  ;;  %v5404_v36 = vpop.f32.mrf.mxu0  ;;  %v10781_v50 = vld [vmem:[#allocation22_spill] sm:$0xff] }
 0x3e5   :  { %10777 = vst [vmem:[#allocation13_spill] sm:$0xff] %v7231_v21  ;;  %v971_v8 = vmul.f32 %v7217_v63, %v10781_v50 }
 0x3e6   :  { %v1802_v10 = vpop.permute.xlu1 %1801  ;;  %v1124_v3 = vpop.f32.mrf.mxu0 }
 0x3e7   :  { %v1125_v19 = vadd.f32 %v1124_v3, %v7236_v25  ;;  %5476 = vmatmul.mubr.msk.f32.gmra.mxu0 %vm98_vm0, %v1802_v10 }
 0x3e8   :  { %v7247_v42 = vpop.permute.xlu0 %3788  ;;  %3004 = vrot.lane.b32.xlu1 %v7188_v40, %s6003_s4 }
 0x3e9   :  { %10780 = vst [vmem:[#allocation15_spill] sm:$0xff] %v7247_v42  ;;  %v7254_v20 = vmul.f32 %v7245_v43, %v1125_v19  ;;  %v7275_v19 = vadd.f32 %v7229_v30, %v971_v8 }
 0x3ea   :  { %v7256_v57 = vpop.permute.xlu1 %2202 }
 0x3eb   :  { %vm1236_vm3 = vcmp.ge.f32.partialorder %v7254_v20, 0.005  ;;  %10785 = vst [vmem:[#allocation19_spill] sm:$0xff] %v7275_v19 }
 0x3ec   :  { %v7263_v29 = vsel %vm1236_vm3, 1.0, %v10746_v9  ;;  %v7265_v10 = vpop.permute.xlu0 %3790  ;;  %3405 = vrot.lane.b32.xlu1 %v7188_v40, %s6004_s3  ;;  %v5407_v3 = vpop.f32.mrf.mxu0 }
 0x3ed   :  { %10783 = vst [vmem:[#allocation17_spill] sm:$0xff] %v7263_v29  ;;  %10784 = vst [vmem:[#allocation18_spill] sm:$0xff] %v7265_v10  ;;  %v1140_v1 = vadd.f32 %v5407_v3, %v7259_v59  ;;  %v1322_v50 = vmul.f32 %v7272_v48, %v7263_v29 }
 0x3ee   :  { %v7280_v42 = vpop.permute.xlu1 %2988  ;;  %v1134_v10 = vpop.f32.mrf.mxu0 }
 0x3ef   :  { %10786 = vst [vmem:[#allocation20_spill] sm:$0xff] %v7280_v42  ;;  %v7285_v2 = vmul.f32 %v7245_v43, %v1140_v1  ;;  %v1135_v13 = vadd.f32 %v1134_v10, %v7275_v19  ;;  %v1338_v12 = vsel %vm98_vm0, %v1322_v50, 0.0  ;;  %v7300_v1 = vadd.f32 %v7229_v30, %v974_v31  ;;  %v10794_v31 = vld [vmem:[#allocation26_spill] sm:$0xff]  ;;  %v10796_v19 = vld [vmem:[#allocation31_spill] sm:$0xff] }
 0x3f0   :  { %v1403_v8 = vpop.permute.xlu0 %1402  ;;  %1339 = vadd.xlane.f32.xlu0 %v1338_v12  ;;  %v970_v52 = vmul.f32 %v7217_v63, %v10794_v31 }
 0x3f1   :  { %10788 = vst [vmem:[#allocation21_spill] sm:$0xff] %v7285_v2  ;;  %vm1239_vm4 = vcmp.ge.f32.partialorder %v7285_v2, 0.005  ;;  %v7291_v3 = vmul.f32 %v7245_v43, %v1135_v13  ;;  %5446 = vmatprep.mubr.msk.f32.mxu1 %vm98_vm0, %v1403_v8  ;;  %10792 = vst [vmem:[#allocation29_spill] sm:$0xff] %v7300_v1 }
 0x3f2   :  { %v7295_v11 = vsel %vm1239_vm4, 1.0, %v10746_v9  ;;  %v7297_v41 = vpop.permute.xlu1 %3389 }
 0x3f3   :  { %10789 = vst [vmem:[#allocation23_spill] sm:$0xff] %v7291_v3  ;;  %10790 = vst [vmem:[#allocation25_spill] sm:$0xff] %v7295_v11  ;;  %vm1238_vm5 = vcmp.ge.f32.partialorder %v7291_v3, 0.005  ;;  %v1325_v12 = vmul.f32 %v7272_v48, %v7295_v11  ;;  %v976_v3 = vmul.f32 %v7217_v63, %v10796_v19 }
 0x3f4   :  { %10791 = vst [vmem:[#allocation22_spill] sm:$0xff] %v7297_v41  ;;  %v7306_v10 = vsel %vm1238_vm5, 1.0, %v10746_v9  ;;  %v1804_v13 = vpop.permute.xlu0 %1803  ;;  %v5410_v50 = vpop.f32.mrf.mxu0 }
 0x3f5   :  { %10793 = vst [vmem:[#allocation44_spill] sm:$0xff] %v7306_v10  ;;  %v1150_v8 = vadd.f32 %v5410_v50, %v7300_v1  ;;  %v1347_v49 = vsel %vm98_vm0, %v1325_v12, 0.0  ;;  %v1324_v41 = vmul.f32 %v7272_v48, %v7306_v10  ;;  %5478 = vmatprep.mubr.msk.f32.mxu0 %vm98_vm0, %v1804_v13  ;;  %v7327_v13 = vadd.f32 %v7229_v30, %v970_v52 }
 0x3f6   :  { %v7315_v42 = vpop.permute.xlu1 %3391  ;;  %1348 = vadd.xlane.f32.xlu0 %v1347_v49  ;;  %v10800_v49 = vld [vmem:[#allocation28_spill] sm:$0xff]  ;;  %v1144_v59 = vpop.f32.mrf.mxu0 }
 0x3f7   :  { %10795 = vst [vmem:[#allocation26_spill] sm:$0xff] %v7315_v42  ;;  %v7320_v62 = vmul.f32 %v7245_v43, %v1150_v8  ;;  %v1344_v12 = vsel %vm98_vm0, %v1324_v41, 0.0  ;;  %10798 = vst [vmem:[#allocation45_spill] sm:$0xff] %v7327_v13  ;;  %v973_v19 = vmul.f32 %v7217_v63, %v10800_v49  ;;  %v7335_v8 = vadd.f32 %v7229_v30, %v976_v3  ;;  %v10804_v49 = vld [vmem:[#allocation33_spill] sm:$0xff] }
 0x3f8   :  { %v7322_v50 = vpop.permute.xlu0 %2204  ;;  %v1130_v41 = vadd.f32 %v5404_v36, %v7327_v13 }
 0x3f9   :  { %10797 = vst [vmem:[#allocation31_spill] sm:$0xff] %v7320_v62  ;;  %vm1241_vm6 = vcmp.ge.f32.partialorder %v7320_v62, 0.005  ;;  %10801 = vst [vmem:[#allocation28_spill] sm:$0xff] %v7335_v8  ;;  %v7346_v3 = vadd.f32 %v7229_v30, %v973_v19 }
 0x3fa   :  { %v7330_v31 = vsel %vm1241_vm6, 1.0, %v10746_v9  ;;  %v1405_v1 = vpop.permute.xlu1 %1404  ;;  %1345 = vadd.xlane.f32.xlu0 %v1344_v12 }
 0x3fb   :  { %10799 = vst [vmem:[#allocation46_spill] sm:$0xff] %v7330_v31  ;;  %5447 = vmatmul.mubr.msk.f32.gmra.mxu1 %vm98_vm0, %v1405_v1  ;;  %v1327_v62 = vmul.f32 %v7272_v48, %v7330_v31  ;;  %10803 = vst [vmem:[#allocation48_spill] sm:$0xff] %v7346_v3  ;;  %v978_v1 = vmul.f32 %v7217_v63, %v10804_v49  ;;  %v975_v31 = vmul.f32 %v7217_v63, %v10805_v14 }
 0x3fc   :  { %v5413_v52 = vpop.f32.mrf.mxu1  ;;  %v7341_v42 = vpop.permute.xlu0 %2990 }
 0x3fd   :  { %10802 = vst [vmem:[#allocation47_spill] sm:$0xff] %v7341_v42  ;;  %v1160_v21 = vadd.f32 %v5413_v52, %v7335_v8  ;;  %v1353_v12 = vsel %vm98_vm0, %v1327_v62, 0.0  ;;  %v7357_v52 = vmul.f32 %v7245_v43, %v1130_v41  ;;  %v7369_v14 = vadd.f32 %v7229_v30, %v978_v1 }
 0x3fe   :  { %v1806_v2 = vpop.permute.xlu1 %1805  ;;  %1354 = vadd.xlane.f32.xlu0 %v1353_v12  ;;  %v1145_v12 = vadd.f32 %v1144_v59, %v7346_v3  ;;  %v1154_v49 = vpop.f32.mrf.mxu1 }
 0x3ff   :  { %v7353_v36 = vmul.f32 %v7245_v43, %v1160_v21  ;;  %5479 = vmatmul.mubr.msk.f32.gmra.mxu0 %vm98_vm0, %v1806_v2  ;;  %10809 = vst [vmem:[#allocation50_spill] sm:$0xff] %v7369_v14  ;;  %v7372_v2 = vadd.f32 %v7229_v30, %v975_v31  ;;  %v10811_v21 = vld [vmem:[#allocation32_spill] sm:$0xff]  ;;  %vm1237_vm8 = vcmp.ge.f32.partialorder %v7357_v52, 0.005 }
 0x400   :  { %v7359_v62 = vpop.permute.xlu0 %3792  ;;  %v977_v41 = vmul.f32 %v7217_v63, %v10811_v21  ;;  %v7382_v3 = vmul.f32 %v7245_v43, %v1145_v12  ;;  %v10815_v21 = vld [vmem:[#allocation35_spill] sm:$0xff]  ;;  %v10818_v12 = vld [vmem:[#allocation34_spill] sm:$0xff] }
 0x401   :  { %10806 = vst [vmem:[#allocation33_spill] sm:$0xff] %v7353_v36  ;;  %10807 = vst [vmem:[#allocation30_spill] sm:$0xff] %v7359_v62  ;;  %vm1243_vm7 = vcmp.ge.f32.partialorder %v7353_v36, 0.005  ;;  %v1155_v1 = vadd.f32 %v1154_v49, %v7372_v2  ;;  %v979_v49 = vmul.f32 %v7217_v63, %v10818_v12 }
 0x402   :  { %v7364_v19 = vsel %vm1243_vm7, 1.0, %v10746_v9  ;;  %v7366_v8 = vpop.permute.xlu1 %2206  ;;  %10810 = vst [vmem:[#allocation51_spill] sm:$0xff] %v7372_v2  ;;  %10813 = vst [vmem:[#allocation52_spill] sm:$0xff] %v7382_v3  ;;  %v7392_v11 = vadd.f32 %v7229_v30, %v977_v41  ;;  %vm1240_vm9 = vcmp.ge.f32.partialorder %v7382_v3, 0.005  ;;  %v10827_v3 = vld [vmem:[#allocation37_spill] sm:$0xff] }
 0x403   :  { %10808 = vst [vmem:[#allocation49_spill] sm:$0xff] %v7364_v19  ;;  %v1329_v59 = vmul.f32 %v7272_v48, %v7364_v19  ;;  %v980_v19 = vmul.f32 %v7217_v63, %v10815_v21 }
 0x404   :  { %v5416_v36 = vpop.f32.mrf.mxu1  ;;  %v7379_v62 = vpop.permute.xlu0 %3794  ;;  %10816 = vst [vmem:[#allocation35_spill] sm:$0xff] %v7392_v11 }
 0x405   :  { %10812 = vst [vmem:[#allocation32_spill] sm:$0xff] %v7379_v62  ;;  %v1170_v42 = vadd.f32 %v5416_v36, %v7369_v14  ;;  %v1359_v31 = vsel %vm98_vm0, %v1329_v59, 0.0  ;;  %v7400_v36 = vsel %vm1237_vm8, 1.0, %v10746_v9  ;;  %v7415_v12 = vadd.f32 %v7229_v30, %v980_v19 }
 0x406   :  { %v1164_v5 = vpop.f32.mrf.mxu1  ;;  %v7387_v10 = vpop.permute.xlu1 %2992  ;;  %1360 = vadd.xlane.f32.xlu0 %v1359_v31  ;;  %10819 = vst [vmem:[#allocation34_spill] sm:$0xff] %v7400_v36  ;;  %v7404_v31 = vmul.f32 %v7245_v43, %v1155_v1  ;;  %v1323_v1 = vmul.f32 %v7272_v48, %v7400_v36 }
 0x407   :  { %10814 = vst [vmem:[#allocation53_spill] sm:$0xff] %v7387_v10  ;;  %v7395_v62 = vmul.f32 %v7245_v43, %v1170_v42  ;;  %v1165_v41 = vadd.f32 %v1164_v5, %v7392_v11  ;;  %10823 = vst [vmem:[#allocation58_spill] sm:$0xff] %v7415_v12  ;;  %v7425_v5 = vsel %vm1240_vm9, 1.0, %v10746_v9 }
 0x408   :  { %v1407_v59 = vpop.permute.xlu0 %1406  ;;  %10820 = vst [vmem:[#allocation55_spill] sm:$0xff] %v7404_v31  ;;  %10825 = vst [vmem:[#allocation60_spill] sm:$0xff] %v7425_v5  ;;  %vm1242_vm11 = vcmp.ge.f32.partialorder %v7404_v31, 0.005 }
 0x409   :  { %10817 = vst [vmem:[#allocation54_spill] sm:$0xff] %v7395_v62  ;;  %vm1245_vm10 = vcmp.ge.f32.partialorder %v7395_v62, 0.005  ;;  %5449 = vmatprep.mubr.msk.f32.mxu1 %vm98_vm0, %v1407_v59  ;;  %v7422_v62 = vadd.f32 %v7229_v30, %v979_v49  ;;  %v7429_v2 = vmul.f32 %v7245_v43, %v1165_v41  ;;  %v982_v49 = vmul.f32 %v7217_v63, %v10827_v3  ;;  %v10831_v3 = vld [vmem:[#allocation36_spill] sm:$0xff] }
 0x40a   :  { %v7410_v42 = vsel %vm1245_vm10, 1.0, %v10746_v9  ;;  %v7412_v21 = vpop.permute.xlu1 %3393  ;;  %v1341_v41 = vsel %vm98_vm0, %v1323_v1, 0.0 }
 0x40b   :  { %10821 = vst [vmem:[#allocation56_spill] sm:$0xff] %v7410_v42  ;;  %10822 = vst [vmem:[#allocation57_spill] sm:$0xff] %v7412_v21  ;;  %v1331_v14 = vmul.f32 %v7272_v48, %v7410_v42  ;;  %vm1244_vm12 = vcmp.ge.f32.partialorder %v7429_v2, 0.005 }
 0x40c   :  { %10824 = vst [vmem:[#allocation59_spill] sm:$0xff] %v7422_v62  ;;  %v1808_v59 = vpop.permute.xlu0 %1807  ;;  %v5419_v11 = vpop.f32.mrf.mxu1  ;;  %10826 = vst [vmem:[#allocation61_spill] sm:$0xff] %v7429_v2 }
 0x40d   :  { %v1180_v19 = vadd.f32 %v5419_v11, %v7415_v12  ;;  %v1365_v42 = vsel %vm98_vm0, %v1331_v14, 0.0  ;;  %5481 = vmatprep.mubr.msk.f32.mxu0 %vm98_vm0, %v1808_v59  ;;  %v1326_v11 = vmul.f32 %v7272_v48, %v7425_v5  ;;  %v7446_v14 = vsel %vm1242_vm11, 1.0, %v10746_v9 }
 0x40e   :  { %v7436_v21 = vpop.permute.xlu1 %3395  ;;  %v1174_v10 = vpop.f32.mrf.mxu1  ;;  %1366 = vadd.xlane.f32.xlu0 %v1365_v42  ;;  %10830 = vst [vmem:[#allocation63_spill] sm:$0xff] %v7446_v14  ;;  %v981_v12 = vmul.f32 %v7217_v63, %v10831_v3 }
 0x40f   :  { %10828 = vst [vmem:[#allocation37_spill] sm:$0xff] %v7436_v21  ;;  %v7439_v53 = vmul.f32 %v7245_v43, %v1180_v19  ;;  %v1175_v31 = vadd.f32 %v1174_v10, %v7422_v62  ;;  %v7463_v19 = vadd.f32 %v7229_v30, %v982_v49  ;;  %v1328_v62 = vmul.f32 %v7272_v48, %v7446_v14 }
 0x410   :  { %v7448_v59 = vpop.permute.xlu0 %2208  ;;  %1342 = vadd.xlane.f32.xlu1 %v1341_v41  ;;  %v1350_v41 = vsel %vm98_vm0, %v1326_v11, 0.0 }
 0x411   :  { %10829 = vst [vmem:[#allocation62_spill] sm:$0xff] %v7439_v53  ;;  %vm1247_vm13 = vcmp.ge.f32.partialorder %v7439_v53, 0.005  ;;  %v7455_v10 = vmul.f32 %v7245_v43, %v1175_v31  ;;  %10835 = vst [vmem:[#allocation66_spill] sm:$0xff] %v7463_v19  ;;  %v7471_v53 = vsel %vm1244_vm12, 1.0, %v10746_v9 }
 0x412   :  { %v7458_v42 = vsel %vm1247_vm13, 1.0, %v10746_v9  ;;  %v7460_v1 = vpop.permute.xlu1 %3796  ;;  %10836 = vst [vmem:[#allocation67_spill] sm:$0xff] %v7471_v53 }
 0x413   :  { %10832 = vst [vmem:[#allocation36_spill] sm:$0xff] %v7455_v10  ;;  %10833 = vst [vmem:[#allocation64_spill] sm:$0xff] %v7458_v42  ;;  %v1333_v3 = vmul.f32 %v7272_v48, %v7458_v42  ;;  %vm1246_vm14 = vcmp.ge.f32.partialorder %v7455_v10, 0.005  ;;  %v10838_v42 = vld [vmem:[#allocation43_spill] sm:$0xff] }
 0x414   :  { %10834 = vst [vmem:[#allocation65_spill] sm:$0xff] %v7460_v1  ;;  %v7473_v31 = vpop.permute.xlu0 %2994  ;;  %v5422_v2 = vpop.f32.mrf.mxu1  ;;  %1351 = vadd.xlane.f32.xlu1 %v1350_v41  ;;  %v7476_v1 = vadd.f32 %v7229_v30, %v981_v12  ;;  %v984_v5 = vmul.f32 %v7217_v63, %v10838_v42  ;;  %v1356_v12 = vsel %vm98_vm0, %v1328_v62, 0.0  ;;  %v10841_v42 = vld [vmem:[#allocation40_spill] sm:$0xff] }
 0x415   :  { %v1190_v49 = vadd.f32 %v5422_v2, %v7463_v19  ;;  %v1371_v11 = vsel %vm98_vm0, %v1333_v3, 0.0  ;;  %v1330_v2 = vmul.f32 %v7272_v48, %v7471_v53  ;;  %v7492_v3 = vsel %vm1246_vm14, 1.0, %v10746_v9 }
 0x416   :  { %10837 = vst [vmem:[#allocation68_spill] sm:$0xff] %v7476_v1  ;;  %v1409_v14 = vpop.permute.xlu1 %1408  ;;  %v1184_v21 = vpop.f32.mrf.mxu1  ;;  %1372 = vadd.xlane.f32.xlu0 %v1371_v11  ;;  %10840 = vst [vmem:[#allocation69_spill] sm:$0xff] %v7492_v3  ;;  %v983_v11 = vmul.f32 %v7217_v63, %v10841_v42 }
 0x417   :  { %v7484_v56 = vmul.f32 %v7245_v43, %v1190_v49  ;;  %v1185_v41 = vadd.f32 %v1184_v21, %v7476_v1  ;;  %5450 = vmatmul.mubr.msk.f32.gmra.mxu1 %vm98_vm0, %v1409_v14  ;;  %v7503_v14 = vadd.f32 %v7229_v30, %v984_v5 }
 0x418   :  { %v7494_v19 = vpop.permute.xlu0 %3798  ;;  %1357 = vadd.xlane.f32.xlu1 %v1356_v12  ;;  %v1362_v12 = vsel %vm98_vm0, %v1330_v2, 0.0 }
 0x419   :  { %10839 = vst [vmem:[#allocation43_spill] sm:$0xff] %v7484_v56  ;;  %vm1249_vm15 = vcmp.ge.f32.partialorder %v7484_v56, 0.005  ;;  %v7500_v21 = vmul.f32 %v7245_v43, %v1185_v41  ;;  %10843 = vst [vmem:[#allocation70_spill] sm:$0xff] %v7503_v14  ;;  %v1332_v41 = vmul.f32 %v7272_v48, %v7492_v3  ;;  %v7519_v56 = vadd.f32 %v7229_v30, %v983_v11 }
 0x41a   :  { %v7506_v62 = vsel %vm1249_vm15, 1.0, %v10746_v9  ;;  %v1810_v49 = vpop.permute.xlu1 %1809 }
 0x41b   :  { %10842 = vst [vmem:[#allocation40_spill] sm:$0xff] %v7500_v21  ;;  %10844 = vst [vmem:[#allocation71_spill] sm:$0xff] %v7506_v62  ;;  %vm1248_vm1 = vcmp.ge.f32.partialorder %v7500_v21, 0.005  ;;  %5482 = vmatmul.mubr.msk.f32.gmra.mxu0 %vm98_vm0, %v1810_v49  ;;  %v1335_v63 = vmul.f32 %v7272_v48, %v7506_v62 }
 0x41c   :  { %v7516_v42 = vsel %vm1248_vm1, 1.0, %v10746_v9  ;;  %v1411_v5 = vpop.permute.xlu0 %1410  ;;  %v5425_v1 = vpop.f32.mrf.mxu1  ;;  %1363 = vadd.xlane.f32.xlu1 %v1362_v12  ;;  %10846 = vst [vmem:[#allocation73_spill] sm:$0xff] %v7519_v56  ;;  %v1368_v12 = vsel %vm98_vm0, %v1332_v41, 0.0 }
 0x41d   :  { %10845 = vst [vmem:[#allocation72_spill] sm:$0xff] %v7516_v42  ;;  %v1200_v21 = vadd.f32 %v5425_v1, %v7503_v14  ;;  %5452 = vmatprep.mubr.msk.f32.mxu1 %vm98_vm0, %v1411_v5  ;;  %v1377_v2 = vsel %vm98_vm0, %v1335_v63, 0.0  ;;  %v1334_v30 = vmul.f32 %v7272_v48, %v7516_v42 }
 0x41e   :  { %v7524_v49 = vpop.permute.xlu1 %2210  ;;  %v1194_v62 = vpop.f32.mrf.mxu1  ;;  %1378 = vadd.xlane.f32.xlu0 %v1377_v2 }
 0x41f   :  { %v7527_v10 = vmul.f32 %v7245_v43, %v1200_v21  ;;  %v1195_v3 = vadd.f32 %v1194_v62, %v7519_v56  ;;  %v1374_v62 = vsel %vm98_vm0, %v1334_v30, 0.0 }
 0x420   :  { %v1812_v11 = vpop.permute.xlu0 %1811  ;;  %1369 = vadd.xlane.f32.xlu1 %v1368_v12 }
 0x421   :  { %10847 = vst [vmem:[#allocation74_spill] sm:$0xff] %v7527_v10  ;;  %vm1251_vm2 = vcmp.ge.f32.partialorder %v7527_v10, 0.005  ;;  %v7535_v1 = vmul.f32 %v7245_v43, %v1195_v3  ;;  %5484 = vmatprep.mubr.msk.f32.mxu0 %vm98_vm0, %v1812_v11 }
 0x422   :  { %v7539_v63 = vsel %vm1251_vm2, 1.0, %v10746_v9  ;;  %v7541_v21 = vpop.permute.xlu1 %2996 }
 0x423   :  { %10848 = vst [vmem:[#allocation75_spill] sm:$0xff] %v7535_v1  ;;  %10849 = vst [vmem:[#allocation76_spill] sm:$0xff] %v7539_v63  ;;  %vm1250_vm3 = vcmp.ge.f32.partialorder %v7535_v1, 0.005  ;;  %v1337_v41 = vmul.f32 %v7272_v48, %v7539_v63 }
 0x424   :  { %v7548_v5 = vsel %vm1250_vm3, 1.0, %v10746_v9  ;;  %v7550_v2 = vpop.permute.xlu0 %2212  ;;  %1375 = vadd.xlane.f32.xlu1 %v1374_v62 }
 0x425   :  { %10850 = vst [vmem:[#allocation77_spill] sm:$0xff] %v7548_v5  ;;  %v1383_v3 = vsel %vm98_vm0, %v1337_v41, 0.0  ;;  %v1336_v12 = vmul.f32 %v7272_v48, %v7548_v5 }
 0x426   :  { %v7555_v11 = vpop.permute.xlu1 %3397  ;;  %1384 = vadd.xlane.f32.xlu0 %v1383_v3 }
 0x427   :  { %v1380_v1 = vsel %vm98_vm0, %v1336_v12, 0.0 }
 0x428   :  { %v7558_v30 = vpop.permute.xlu0 %2998  ;;  %1381 = vadd.xlane.f32.xlu1 %v1380_v1 }
 0x42a   :  { %v7560_v56 = vpop.permute.xlu1 %3399 }
 0x42c   :  { %v7562_v10 = vpop.permute.xlu0 %3802 }
 0x42d   :  { %10851 = vst [vmem:[#allocation78_spill] sm:$0xff] %v7562_v10 }
 0x42e   :  { %v7564_v14 = vpop.permute.xlu1 %3800 }
 0x430   :  { %v1415_v62 = vpop.permute.xlu0 %1414 }
 0x432   :  { %v1413_v63 = vpop.permute.xlu1 %1412 }
 0x433   :  { %5453 = vmatmul.mubr.msk.f32.gmra.mxu1 %vm98_vm0, %v1413_v63 }
 0x434   :  { %5455 = vmatprep.mubr.msk.f32.mxu1 %vm98_vm0, %v1415_v62  ;;  %v1816_v5 = vpop.permute.xlu0 %1815 }
 0x436   :  { %v1814_v41 = vpop.permute.xlu1 %1813 }
 0x437   :  { %5485 = vmatmul.mubr.msk.f32.gmra.mxu0 %vm98_vm0, %v1814_v41 }
 0x438   :  { %5487 = vmatprep.mubr.msk.f32.mxu0 %vm98_vm0, %v1816_v5  ;;  %v2217_v5 = vpop.permute.xlu0 %2216 }
 0x43a   :  { %v7570_v3 = vpop.permute.xlu1 %2214 }
 0x43e   :  { %v7572_v1 = vpop.permute.xlu1 %3000 }
 0x442   :  { %v7574_v12 = vpop.permute.xlu1 %3401 }
 0x446   :  { %v7576_v42 = vpop.permute.xlu1 %3403 }
 0x44a   :  { %v7578_v53 = vpop.permute.xlu1 %3804 }
 0x44e   :  { %v1417_v10 = vpop.permute.xlu1 %1416 }
 0x44f   :  { %5456 = vmatmul.mubr.msk.f32.gmra.mxu1 %vm98_vm0, %v1417_v10  ;;  %v7594_v10 = vld [vmem:[%s10370_s7 + $0x10] sm:$0xff] }
 0x450   :  { %5498 = vmatprep.mubr.msk.f32.mxu1 %vm98_vm0, %v7071_v38 }
 0x452   :  { %v1818_v63 = vpop.permute.xlu1 %1817 }
 0x453   :  { %5488 = vmatmul.mubr.msk.f32.gmra.mxu0 %vm98_vm0, %v1818_v63  ;;  %5499 = vmatmul.mubr.msk.f32.vlgmr.msra.gmra.mxu1 %vm98_vm0, %v7101_v28 }
 0x454   :  { %5501 = vmatprep.mubr.msk.f32.mxu1 %vm98_vm0, %v7128_v17  ;;  %5530 = vmatprep.mubr.msk.f32.mxu0 %vm98_vm0, %v6871_v7  ;;  %v1285_v7 = vsub.f32 1.0, %v7400_v36  ;;  %v10934_v36 = vld [vmem:[#allocation74_spill] sm:$0xff] }
 0x455   :  { %5555 = vmatpush3.msra.mxu1 %v7097_v60 }
 0x456   :  { %5556 = vmatprep.subr.mxu1 %v7594_v10  ;;  %v1301_v38 = vmul.f32 %v1285_v7, %v7357_v52  ;;  %v2219_v63 = vpop.permute.xlu1 %2218 }
 0x457   :  { %5502 = vmatmul.mubr.msk.f32.gmra.mxu1 %vm98_vm0, %v7164_v4  ;;  %5531 = vmatmul.mubr.msk.f32.vlgmr.msra.gmra.mxu0 %vm98_vm0, %v6877_v32  ;;  %v1284_v32 = vsub.f32 1.0, %v7263_v29 }
 0x458   :  { %5504 = vmatprep.mubr.msk.f32.mxu1 %vm98_vm0, %v7168_v27  ;;  %5533 = vmatprep.mubr.msk.f32.mxu0 %vm98_vm0, %v6886_v24 }
 0x459   :  { %5557 = vmatpush3.msra.mxu1 %v7594_v10  ;;  %5587 = vmatpush3.msra.mxu0 %v7097_v60  ;;  %v1300_v17 = vmul.f32 %v1284_v32, %v7254_v20 }
 0x45a   :  { %5558 = vmatprep.subr.mxu1 %v6852_v26  ;;  %5588 = vmatprep.subr.mxu0 %v7594_v10 }
 0x45b   :  { %5505 = vmatmul.mubr.msk.f32.gmra.mxu1 %vm98_vm0, %v7202_v44  ;;  %5534 = vmatmul.mubr.msk.f32.gmra.mxu0 %vm98_vm0, %v6895_v35  ;;  %v7646_v44 = vld [vmem:[%s10370_s7] sm:$0xff] }
 0x45c   :  { %5507 = vmatprep.mubr.msk.f32.mxu1 %vm98_vm0, %v7219_v22  ;;  %5536 = vmatprep.mubr.msk.f32.mxu0 %vm98_vm0, %v6903_v51 }
 0x45d   :  { %v5436_v24 = vpop.f32.mrf.mxu1  ;;  %5559 = vmatpush3.msra.mxu1 %v6852_v26  ;;  %5589 = vmatpush3.msra.mxu0 %v7594_v10 }
 0x45e   :  { %v1522_v28 = vadd.f32 %v5436_v24, %v7327_v13  ;;  %5560 = vmatprep.subr.mxu1 %v6860_v45  ;;  %5590 = vmatprep.subr.mxu0 %v6852_v26  ;;  %v7639_v26 = vld [vmem:[%s10370_s7 + $0x8] sm:$0xff] }
 0x45f   :  { %v1516_v35 = vpop.f32.mrf.mxu1  ;;  %5508 = vmatmul.mubr.msk.f32.gmra.mxu1 %vm98_vm0, %v7256_v57  ;;  %5537 = vmatmul.mubr.msk.f32.gmra.mxu0 %vm98_vm0, %v6911_v58 }
 0x460   :  { %v1596_v51 = vsub.f32 %v1522_v28, %v1301_v38  ;;  %v1517_v4 = vadd.f32 %v1516_v35, %v7236_v25  ;;  %5510 = vmatprep.mubr.msk.f32.mxu1 %vm98_vm0, %v7322_v50  ;;  %5539 = vmatprep.mubr.msk.f32.mxu0 %vm98_vm0, %v6920_v6  ;;  %v10855_v35 = vld [vmem:[#allocation44_spill] sm:$0xff] }
 0x461   :  { %5561 = vmatpush3.msra.mxu1 %v6860_v45  ;;  %5591 = vmatpush3.msra.mxu0 %v7639_v26  ;;  %v5468_v22 = vpop.f32.mrf.mxu0 }
 0x462   :  { %v1612_v58 = vmul.f32 %v1596_v51, %v7245_v43  ;;  %v1595_v27 = vsub.f32 %v1517_v4, %v1300_v17  ;;  %5592 = vmatprep.subr.mxu0 %v7646_v44  ;;  %5618 = vmatprep.subr.mxu1 %v7097_v60  ;;  %v1286_v51 = vsub.f32 1.0, %v10855_v35  ;;  %v10858_v4 = vld [vmem:[#allocation21_spill] sm:$0xff] }
 0x463   :  { %5511 = vmatmul.mubr.msk.f32.gmra.mxu1 %vm98_vm0, %v7366_v8  ;;  %5540 = vmatmul.mubr.msk.f32.gmra.mxu0 %vm98_vm0, %v6929_v46  ;;  %v1917_v8 = vpop.f32.mrf.mxu0 }
 0x464   :  { %v1611_v45 = vmul.f32 %v1595_v27, %v7245_v43  ;;  %v1628_v6 = vadd.f32 %v1612_v58, %v1301_v38  ;;  %5513 = vmatprep.mubr.msk.f32.mxu1 %vm98_vm0, %v7448_v59  ;;  %5542 = vmatprep.mubr.msk.f32.mxu0 %vm98_vm0, %v6942_v54  ;;  %v1923_v54 = vadd.f32 %v5468_v22, %v7327_v13  ;;  %v10859_v27 = vld [vmem:[#allocation16_spill] sm:$0xff] }
 0x465   :  { %5593 = vmatpush3.msra.mxu0 %v7646_v44  ;;  %v1918_v62 = vadd.f32 %v1917_v8, %v7236_v25 }
 0x466   :  { %vm1644_vm4 = vcmp.ge.f32.partialorder %v1628_v6, 0.005  ;;  %v1627_v20 = vadd.f32 %v1611_v45, %v1300_v17  ;;  %v10857_v17 = vld [vmem:[#allocation42_spill] sm:$0xff] }
 0x467   :  { %v7661_v57 = vsel %vm1644_vm4, 1.0, %v10746_v9  ;;  %5514 = vmatmul.mubr.msk.f32.gmra.mxu1 %vm98_vm0, %v7524_v49  ;;  %5543 = vmatmul.mubr.msk.f32.gmra.mxu0 %vm98_vm0, %v6952_v61 }
 0x468   :  { %v1692_v46 = vsub.f32 1.0, %v7661_v57  ;;  %vm1643_vm5 = vcmp.ge.f32.partialorder %v1627_v20, 0.005  ;;  %5516 = vmatprep.mubr.msk.f32.mxu1 %vm98_vm0, %v7550_v2  ;;  %5545 = vmatprep.mubr.msk.f32.mxu0 %vm98_vm0, %v6963_v33 }
 0x469   :  { %v4994_v50 = vsel %vm1643_vm5, 1.0, %v10746_v9 }
 0x46a   :  { %v1708_v52 = vmul.f32 %v1692_v46, %v1628_v6  ;;  %v1691_v59 = vsub.f32 1.0, %v4994_v50  ;;  %v5668_v49 = vpack.i.bf16 %v7661_v57, %v4994_v50  ;;  %v1723_v61 = vmul.f32 %v4994_v50, %v7272_v48  ;;  %v10860_v6 = vld [vmem:[#allocation13_spill] sm:$0xff]  ;;  %v10862_v46 = vld [vmem:[#allocation23_spill] sm:$0xff] }
 0x46b   :  { %5517 = vmatmul.mubr.msk.f32.gmra.mxu1 %vm98_vm0, %v7570_v3  ;;  %5546 = vmatmul.mubr.msk.f32.gmra.mxu0 %vm98_vm0, %v6971_v47  ;;  %v10863_v50 = vld [vmem:[#allocation19_spill] sm:$0xff] }
 0x46c   :  { %v1997_v2 = vsub.f32 %v1923_v54, %v1708_v52  ;;  %v1707_v33 = vmul.f32 %v1691_v59, %v1627_v20  ;;  %5519 = vmatprep.mubr.msk.f32.mxu1 %vm98_vm0, %v2217_v5  ;;  %5548 = vmatprep.mubr.msk.f32.mxu0 %vm98_vm0, %v6979_v37  ;;  %v1739_v41 = vsel %vm98_vm0, %v1723_v61, 0.0  ;;  %v1302_v54 = vmul.f32 %v1286_v51, %v10862_v46  ;;  %v10865_v59 = vld [vmem:[#allocation9_spill] sm:$0xff]  ;;  %v10866_v5 = vld [vmem:[#allocation47_spill] sm:$0xff] }
 0x46d   :  { %5669 = vrot.lane.b32.xlu1 %v5668_v49, %s6005_s23  ;;  %1740 = vadd.xlane.f32.xlu0 %v1739_v41  ;;  %v10868_v41 = vld [vmem:[#allocation53_spill] sm:$0xff] }
 0x46e   :  { %v2013_v3 = vmul.f32 %v1997_v2, %v7245_v43  ;;  %v1996_v7 = vsub.f32 %v1918_v62, %v1707_v33 }
 0x46f   :  { %5520 = vmatmul.mubr.msk.f32.gmra.mxu1 %vm98_vm0, %v2219_v63  ;;  %5549 = vmatmul.mubr.msk.f32.gmra.mxu0 %vm98_vm0, %v6988_v23  ;;  %v10869_v63 = vld [vmem:[#allocation22_spill] sm:$0xff] }
 0x470   :  { %v2029_v47 = vadd.f32 %v2013_v3, %v1708_v52  ;;  %v2012_v32 = vmul.f32 %v1996_v7, %v7245_v43  ;;  %5551 = vmatprep.mubr.msk.f32.mxu0 %vm98_vm0, %v6998_v39  ;;  %5562 = vmatprep.mubr.msk.f32.mxu1 %vm98_vm0, %v7078_v55  ;;  %v10864_v52 = vld [vmem:[#allocation20_spill] sm:$0xff]  ;;  %v10870_v7 = vld [vmem:[#allocation26_spill] sm:$0xff] }
 0x472   :  { %v2028_v37 = vadd.f32 %v2012_v32, %v1707_v33  ;;  %vm2045_vm6 = vcmp.ge.f32.partialorder %v2029_v47, 0.005 }
 0x473   :  { %5552 = vmatmul.mubr.msk.f32.gmra.mxu0 %vm98_vm0, %v7188_v40  ;;  %5563 = vmatmul.mubr.msk.f32.vlgmr.msra.gmra.mxu1 %vm98_vm0, %v7113_v0  ;;  %v7700_v24 = vsel %vm2045_vm6, 1.0, %v10746_v9  ;;  %v10853_v40 = vld [vmem:[#allocation6_spill] sm:$0xff] }
 0x474   :  { %vm2044_vm7 = vcmp.ge.f32.partialorder %v2028_v37, 0.005  ;;  %5565 = vmatprep.mubr.msk.f32.mxu1 %vm98_vm0, %v7136_v15  ;;  %5594 = vmatprep.mubr.msk.f32.mxu0 %vm98_vm0, %v7060_v16  ;;  %v2093_v23 = vsub.f32 1.0, %v7700_v24  ;;  %v10852_v15 = vld [vmem:[#allocation41_spill] sm:$0xff] }
 0x475   :  { %v7708_v39 = vsel %vm2044_vm7, 1.0, %v10746_v9  ;;  %5619 = vmatpush3.msra.mxu1 %v7097_v60  ;;  %v10854_v60 = vld [vmem:[#allocation25_spill] sm:$0xff] }
 0x476   :  { %5620 = vmatprep.subr.mxu1 %v7594_v10  ;;  %v5678_v55 = vpack.i.bf16 %v7700_v24, %v7708_v39  ;;  %v7714_v0 = vmul.f32 %v2093_v23, %v2029_v47  ;;  %v2092_v16 = vsub.f32 1.0, %v7708_v39  ;;  %v1287_v38 = vsub.f32 1.0, %v10854_v60  ;;  %v10871_v23 = vld [vmem:[#allocation57_spill] sm:$0xff] }
 0x477   :  { %5566 = vmatmul.mubr.msk.f32.gmra.mxu1 %vm98_vm0, %v7172_v34  ;;  %5595 = vmatmul.mubr.msk.f32.vlgmr.msra.gmra.mxu0 %vm98_vm0, %v7089_v18  ;;  %v10856_v18 = vld [vmem:[#allocation11_spill] sm:$0xff] }
 0x478   :  { %5568 = vmatprep.mubr.msk.f32.mxu1 %vm98_vm0, %v10852_v15  ;;  %5597 = vmatprep.mubr.msk.f32.mxu0 %vm98_vm0, %v10853_v40  ;;  %v7727_v28 = vmul.f32 %v2092_v16, %v2028_v37  ;;  %v1303_v58 = vmul.f32 %v1287_v38, %v10858_v4  ;;  %v10872_v40 = vld [vmem:[#allocation37_spill] sm:$0xff]  ;;  %v1724_v4 = vmul.f32 %v7661_v57, %v7272_v48 }
 0x479   :  { %5621 = vmatpush3.msra.mxu1 %v7594_v10  ;;  %v10861_v10 = vld [vmem:[#allocation7_spill] sm:$0xff] }
 0x47a   :  { %5622 = vmatprep.subr.mxu1 %v7639_v26  ;;  %v1742_v57 = vsel %vm98_vm0, %v1724_v4, 0.0 }
 0x47b   :  { %v5439_v34 = vpop.f32.mrf.mxu1  ;;  %5569 = vmatmul.mubr.msk.f32.gmra.mxu1 %vm98_vm0, %v10856_v18  ;;  %5598 = vmatmul.mubr.msk.f32.gmra.mxu0 %vm98_vm0, %v10857_v17  ;;  %v3003_v18 = vpop.permute.xlu0 %3002 }
 0x47c   :  { %v1532_v45 = vadd.f32 %v5439_v34, %v10859_v27  ;;  %5571 = vmatprep.mubr.msk.f32.mxu1 %vm98_vm0, %v10860_v6  ;;  %5600 = vmatprep.mubr.msk.f32.mxu0 %vm98_vm0, %v10861_v10 }
 0x47d   :  { %v1526_v22 = vpop.f32.mrf.mxu1  ;;  %5623 = vmatpush3.msra.mxu1 %v7639_v26  ;;  %v10867_v26 = vld [vmem:[#allocation12_spill] sm:$0xff] }
 0x47e   :  { %v1598_v20 = vsub.f32 %v1532_v45, %v1303_v58  ;;  %v1527_v8 = vadd.f32 %v1526_v22, %v10863_v50  ;;  %5624 = vmatprep.subr.mxu1 %v7646_v44  ;;  %v10874_v22 = vld [vmem:[#allocation60_spill] sm:$0xff] }
 0x47f   :  { %5572 = vmatmul.mubr.msk.f32.gmra.mxu1 %vm98_vm0, %v10864_v52  ;;  %5601 = vmatmul.mubr.msk.f32.gmra.mxu0 %vm98_vm0, %v10865_v59  ;;  %v5471_v62 = vpop.f32.mrf.mxu0  ;;  %v10876_v52 = vld [vmem:[#allocation29_spill] sm:$0xff] }
 0x480   :  { %v1614_v49 = vmul.f32 %v1598_v20, %v7245_v43  ;;  %v1597_v61 = vsub.f32 %v1527_v8, %v1302_v54  ;;  %5574 = vmatprep.mubr.msk.f32.mxu1 %vm98_vm0, %v10866_v5  ;;  %5603 = vmatprep.mubr.msk.f32.mxu0 %vm98_vm0, %v10867_v26  ;;  %v1933_v16 = vadd.f32 %v5471_v62, %v10859_v27  ;;  %v1288_v20 = vsub.f32 1.0, %v10874_v22  ;;  %v10879_v62 = vld [vmem:[#allocation48_spill] sm:$0xff] }
 0x481   :  { %5625 = vmatpush3.msra.mxu1 %v7646_v44  ;;  %v1927_v37 = vpop.f32.mrf.mxu0 }
 0x482   :  { %v1613_v2 = vmul.f32 %v1597_v61, %v7245_v43  ;;  %v1630_v33 = vadd.f32 %v1614_v49, %v1303_v58  ;;  %v3005_v58 = vpop.permute.xlu1 %3004  ;;  %v2125_v49 = vmul.f32 %v7700_v24, %v7272_v48 }
 0x483   :  { %5575 = vmatmul.mubr.msk.f32.gmra.mxu1 %vm98_vm0, %v10868_v41  ;;  %5604 = vmatmul.mubr.msk.f32.gmra.mxu0 %vm98_vm0, %v10869_v63  ;;  %v10880_v63 = vld [vmem:[#allocation38_spill] sm:$0xff] }
 0x484   :  { %vm1646_vm8 = vcmp.ge.f32.partialorder %v1630_v33, 0.005  ;;  %v1629_v3 = vadd.f32 %v1613_v2, %v1302_v54  ;;  %5577 = vmatprep.mubr.msk.f32.mxu1 %vm98_vm0, %v7473_v31  ;;  %5606 = vmatprep.mubr.msk.f32.mxu0 %vm98_vm0, %v10870_v7  ;;  %v10878_v2 = vld [vmem:[#allocation52_spill] sm:$0xff] }
 0x485   :  { %v7765_v44 = vsel %vm1646_vm8, 1.0, %v10746_v9 }
 0x486   :  { %v1694_v47 = vsub.f32 1.0, %v7765_v44  ;;  %vm1645_vm9 = vcmp.ge.f32.partialorder %v1629_v3, 0.005  ;;  %v3406_v5 = vpop.permute.xlu1 %3405 }
 0x487   :  { %v7769_v32 = vsel %vm1645_vm9, 1.0, %v10746_v9  ;;  %5578 = vmatmul.mubr.msk.f32.gmra.mxu1 %vm98_vm0, %v7541_v21  ;;  %5607 = vmatmul.mubr.msk.f32.gmra.mxu0 %vm98_vm0, %v10871_v23  ;;  %v1928_v21 = vadd.f32 %v1927_v37, %v10863_v50  ;;  %v10881_v37 = vld [vmem:[#allocation24_spill] sm:$0xff]  ;;  %v2143_v23 = vsel %vm98_vm0, %v2125_v49, 0.0  ;;  %v10887_v49 = vld [vmem:[#allocation49_spill] sm:$0xff] }
 0x488   :  { %v1710_v31 = vmul.f32 %v1694_v47, %v1630_v33  ;;  %v1693_v15 = vsub.f32 1.0, %v7769_v32  ;;  %5580 = vmatprep.mubr.msk.f32.mxu1 %vm98_vm0, %v7558_v30  ;;  %5609 = vmatprep.mubr.msk.f32.mxu0 %vm98_vm0, %v10872_v40  ;;  %v5673_v38 = vpack.i.bf16 %v7765_v44, %v7769_v32  ;;  %v10873_v30 = vld [vmem:[#allocation46_spill] sm:$0xff]  ;;  %v1304_v33 = vmul.f32 %v1288_v20, %v10878_v2 }
 0x489   :  { %v1289_v17 = vsub.f32 1.0, %v10873_v30  ;;  %v10888_v2 = vld [vmem:[#allocation30_spill] sm:$0xff] }
 0x48a   :  { %v1999_v51 = vsub.f32 %v1933_v16, %v1710_v31  ;;  %v1709_v34 = vmul.f32 %v1693_v15, %v1629_v3  ;;  %5674 = vrot.lane.b32.xlu0 %v5673_v38, %s6005_s23 }
 0x48b   :  { %5581 = vmatmul.mubr.msk.f32.gmra.mxu1 %vm98_vm0, %v7572_v1  ;;  %5610 = vmatmul.mubr.msk.f32.gmra.mxu0 %vm98_vm0, %v7555_v11  ;;  %v10875_v11 = vld [vmem:[#allocation31_spill] sm:$0xff] }
 0x48c   :  { %v2015_v45 = vmul.f32 %v1999_v51, %v7245_v43  ;;  %v1998_v6 = vsub.f32 %v1928_v21, %v1709_v34  ;;  %5583 = vmatprep.mubr.msk.f32.mxu1 %vm98_vm0, %v3003_v18  ;;  %5612 = vmatprep.mubr.msk.f32.mxu0 %vm98_vm0, %v7560_v56  ;;  %v1305_v46 = vmul.f32 %v1289_v17, %v10875_v11  ;;  %v10877_v56 = vld [vmem:[#allocation27_spill] sm:$0xff]  ;;  %v10883_v17 = vld [vmem:[#allocation8_spill] sm:$0xff] }
 0x48e   :  { %v2031_v10 = vadd.f32 %v2015_v45, %v1710_v31  ;;  %v2014_v1 = vmul.f32 %v1998_v6, %v7245_v43  ;;  %v10914_v31 = vld [vmem:[#allocation36_spill] sm:$0xff] }
 0x48f   :  { %v5442_v54 = vpop.f32.mrf.mxu1  ;;  %5584 = vmatmul.mubr.msk.f32.gmra.mxu1 %vm98_vm0, %v3005_v58  ;;  %5613 = vmatmul.mubr.msk.f32.gmra.mxu0 %vm98_vm0, %v7574_v12 }
 0x490   :  { %vm2047_vm10 = vcmp.ge.f32.partialorder %v2031_v10, 0.005  ;;  %v2030_v8 = vadd.f32 %v2014_v1, %v1709_v34  ;;  %v1542_v59 = vadd.f32 %v5442_v54, %v10876_v52  ;;  %5615 = vmatprep.mubr.msk.f32.mxu0 %vm98_vm0, %v7576_v42  ;;  %5626 = vmatprep.mubr.msk.f32.mxu1 %vm98_vm0, %v10877_v56  ;;  %v10882_v34 = vld [vmem:[#allocation39_spill] sm:$0xff]  ;;  %v10886_v56 = vld [vmem:[#allocation18_spill] sm:$0xff] }
 0x491   :  { %v7811_v61 = vsel %vm2047_vm10, 1.0, %v10746_v9  ;;  %1743 = vadd.xlane.f32.xlu1 %v1742_v57  ;;  %v1536_v12 = vpop.f32.mrf.mxu1 }
 0x492   :  { %vm2046_vm11 = vcmp.ge.f32.partialorder %v2030_v8, 0.005  ;;  %v1600_v26 = vsub.f32 %v1542_v59, %v1305_v46  ;;  %v1537_v41 = vadd.f32 %v1536_v12, %v10879_v62  ;;  %v2095_v3 = vsub.f32 1.0, %v7811_v61 }
 0x493   :  { %v7816_v42 = vsel %vm2046_vm11, 1.0, %v10746_v9  ;;  %5616 = vmatmul.mubr.msk.f32.gmra.mxu0 %vm98_vm0, %v3406_v5  ;;  %5627 = vmatmul.mubr.msk.f32.vlgmr.msra.gmra.mxu1 %vm98_vm0, %v10880_v63  ;;  %v5474_v51 = vpop.f32.mrf.mxu0  ;;  %v1291_v12 = vsub.f32 1.0, %v10887_v49  ;;  %v10925_v49 = vld [vmem:[#allocation68_spill] sm:$0xff] }
 0x494   :  { %v1616_v7 = vmul.f32 %v1600_v26, %v7245_v43  ;;  %v1599_v47 = vsub.f32 %v1537_v41, %v1304_v33  ;;  %5629 = vmatprep.mubr.msk.f32.mxu1 %vm98_vm0, %v10881_v37  ;;  %v7828_v16 = vmul.f32 %v2095_v3, %v2031_v10  ;;  %v2094_v15 = vsub.f32 1.0, %v7816_v42  ;;  %v10884_v10 = vld [vmem:[#allocation10_spill] sm:$0xff] }
 0x495   :  { %2144 = vadd.xlane.f32.xlu1 %v2143_v23  ;;  %v1937_v6 = vpop.f32.mrf.mxu0  ;;  %v1943_v20 = vadd.f32 %v5474_v51, %v10876_v52  ;;  %v10891_v23 = vld [vmem:[#allocation32_spill] sm:$0xff]  ;;  %v10893_v51 = vld [vmem:[#allocation65_spill] sm:$0xff] }
 0x496   :  { %v1615_v40 = vmul.f32 %v1599_v47, %v7245_v43  ;;  %v1632_v38 = vadd.f32 %v1616_v7, %v1305_v46  ;;  %v7834_v21 = vmul.f32 %v2094_v15, %v2030_v8  ;;  %v10885_v46 = vld [vmem:[#allocation15_spill] sm:$0xff]  ;;  %v1938_v59 = vadd.f32 %v1937_v6, %v10879_v62  ;;  %v10890_v7 = vld [vmem:[#allocation33_spill] sm:$0xff] }
 0x497   :  { %5630 = vmatmul.mubr.msk.f32.gmra.mxu1 %vm98_vm0, %v10882_v34  ;;  %v1307_v47 = vmul.f32 %v1291_v12, %v10890_v7  ;;  %v1726_v34 = vmul.f32 %v7765_v44, %v7272_v48  ;;  %v10938_v62 = vld [vmem:[#allocation75_spill] sm:$0xff] }
 0x498   :  { %vm1648_vm12 = vcmp.ge.f32.partialorder %v1632_v38, 0.005  ;;  %v1631_v18 = vadd.f32 %v1615_v40, %v1304_v33  ;;  %5632 = vmatprep.mubr.msk.f32.mxu1 %vm98_vm0, %v10883_v17  ;;  %v10889_v33 = vld [vmem:[#allocation63_spill] sm:$0xff]  ;;  %v10892_v40 = vld [vmem:[#allocation28_spill] sm:$0xff] }
 0x499   :  { %v7839_v4 = vsel %vm1648_vm12, 1.0, %v10746_v9  ;;  %v1290_v41 = vsub.f32 1.0, %v10889_v33  ;;  %v10894_v17 = vld [vmem:[#allocation55_spill] sm:$0xff] }
 0x49a   :  { %v1696_v58 = vsub.f32 1.0, %v7839_v4  ;;  %vm1647_vm13 = vcmp.ge.f32.partialorder %v1631_v18, 0.005 }
 0x49b   :  { %v7843_v45 = vsel %vm1647_vm13, 1.0, %v10746_v9  ;;  %5633 = vmatmul.mubr.msk.f32.gmra.mxu1 %vm98_vm0, %v10884_v10 }
 0x49c   :  { %v1712_v1 = vmul.f32 %v1696_v58, %v1632_v38  ;;  %v1695_v11 = vsub.f32 1.0, %v7843_v45  ;;  %5635 = vmatprep.mubr.msk.f32.mxu1 %vm98_vm0, %v10885_v46  ;;  %v5683_v54 = vpack.i.bf16 %v7839_v4, %v7843_v45  ;;  %v1306_v58 = vmul.f32 %v1290_v41, %v10894_v17 }
 0x49e   :  { %v2001_v57 = vsub.f32 %v1943_v20, %v1712_v1  ;;  %v1711_v8 = vmul.f32 %v1695_v11, %v1631_v18 }
 0x49f   :  { %5636 = vmatmul.mubr.msk.f32.gmra.mxu1 %vm98_vm0, %v10886_v56 }
 0x4a0   :  { %v2017_v5 = vmul.f32 %v2001_v57, %v7245_v43  ;;  %v2000_v26 = vsub.f32 %v1938_v59, %v1711_v8  ;;  %5638 = vmatprep.mubr.msk.f32.mxu1 %vm98_vm0, %v10888_v2  ;;  %v10897_v2 = vld [vmem:[#allocation78_spill] sm:$0xff] }
 0x4a2   :  { %v2033_v63 = vadd.f32 %v2017_v5, %v1712_v1  ;;  %v2016_v3 = vmul.f32 %v2000_v26, %v7245_v43  ;;  %v10895_v1 = vld [vmem:[#allocation51_spill] sm:$0xff] }
 0x4a3   :  { %v5445_v37 = vpop.f32.mrf.mxu1  ;;  %5639 = vmatmul.mubr.msk.f32.gmra.mxu1 %vm98_vm0, %v10891_v23 }
 0x4a4   :  { %vm2049_vm14 = vcmp.ge.f32.partialorder %v2033_v63, 0.005  ;;  %v2032_v15 = vadd.f32 %v2016_v3, %v1711_v8  ;;  %v1552_v38 = vadd.f32 %v5445_v37, %v10892_v40  ;;  %5641 = vmatprep.mubr.msk.f32.mxu1 %vm98_vm0, %v10893_v51  ;;  %v1748_v8 = vsel %vm98_vm0, %v1726_v34, 0.0 }
 0x4a5   :  { %v7871_v18 = vsel %vm2049_vm14, 1.0, %v10746_v9  ;;  %v1546_v6 = vpop.f32.mrf.mxu1 }
 0x4a6   :  { %v1602_v10 = vsub.f32 %v1552_v38, %v1307_v47  ;;  %v1547_v20 = vadd.f32 %v1546_v6, %v10895_v1  ;;  %5684 = vrot.lane.b32.xlu1 %v5683_v54, %s6005_s23  ;;  %vm2048_vm15 = vcmp.ge.f32.partialorder %v2032_v15, 0.005  ;;  %v2097_v11 = vsub.f32 1.0, %v7871_v18 }
 0x4a7   :  { %5642 = vmatmul.mubr.msk.f32.gmra.mxu1 %vm98_vm0, %v7494_v19  ;;  %v7880_v46 = vsel %vm2048_vm15, 1.0, %v10746_v9  ;;  %v1725_v54 = vmul.f32 %v7769_v32, %v7272_v48  ;;  %v5477_v26 = vpop.f32.mrf.mxu0 }
 0x4a8   :  { %v1618_v44 = vmul.f32 %v1602_v10, %v7245_v43  ;;  %v1601_v57 = vsub.f32 %v1547_v20, %v1306_v58  ;;  %5644 = vmatprep.mubr.msk.f32.mxu1 %vm98_vm0, %v7564_v14  ;;  %v7890_v56 = vmul.f32 %v2097_v11, %v2033_v63  ;;  %v2096_v19 = vsub.f32 1.0, %v7880_v46  ;;  %v3807_v63 = vpop.permute.xlu0 %3806  ;;  %v10899_v20 = vld [vmem:[#allocation56_spill] sm:$0xff] }
 0x4a9   :  { %1749 = vadd.xlane.f32.xlu0 %v1748_v8  ;;  %v1745_v48 = vsel %vm98_vm0, %v1725_v54, 0.0  ;;  %v1953_v23 = vadd.f32 %v5477_v26, %v10892_v40  ;;  %v1293_v11 = vsub.f32 1.0, %v10899_v20  ;;  %v10900_v8 = vld [vmem:[#allocation67_spill] sm:$0xff]  ;;  %v10924_v20 = vld [vmem:[#allocation40_spill] sm:$0xff]  ;;  %v10936_v40 = vld [vmem:[#allocation73_spill] sm:$0xff] }
 0x4aa   :  { %10896 = vst [vmem:[#allocation41_spill] sm:$0xff] %v7890_v56  ;;  %v1617_v12 = vmul.f32 %v1601_v57, %v7245_v43  ;;  %v1634_v5 = vadd.f32 %v1618_v44, %v1307_v47  ;;  %v7896_v14 = vmul.f32 %v2096_v19, %v2032_v15  ;;  %v1947_v47 = vpop.f32.mrf.mxu0  ;;  %v1292_v54 = vsub.f32 1.0, %v10900_v8 }
 0x4ab   :  { %5645 = vmatmul.mubr.msk.f32.gmra.mxu1 %vm98_vm0, %v10897_v2  ;;  %v1948_v34 = vadd.f32 %v1947_v47, %v10895_v1  ;;  %v10916_v8 = vpack.i.bf16 %v7811_v61, %v7816_v42 }
 0x4ac   :  { %10898 = vst [vmem:[#allocation6_spill] sm:$0xff] %v7896_v14  ;;  %vm1650_vm1 = vcmp.ge.f32.partialorder %v1634_v5, 0.005  ;;  %v1633_v41 = vadd.f32 %v1617_v12, %v1306_v58  ;;  %5647 = vmatprep.mubr.msk.f32.mxu1 %vm98_vm0, %v7578_v53  ;;  %v10935_v14 = vld [vmem:[#allocation77_spill] sm:$0xff] }
 0x4ad   :  { %v7902_v32 = vsel %vm1650_vm1, 1.0, %v10746_v9  ;;  %1746 = vadd.xlane.f32.xlu0 %v1745_v48 }
 0x4ae   :  { %v1698_v3 = vsub.f32 1.0, %v7902_v32  ;;  %vm1649_vm2 = vcmp.ge.f32.partialorder %v1633_v41, 0.005 }
 0x4af   :  { %v7906_v7 = vsel %vm1649_vm2, 1.0, %v10746_v9  ;;  %5648 = vmatmul.mubr.msk.f32.gmra.mxu1 %vm98_vm0, %v3807_v63 }
 0x4b0   :  { %v1714_v37 = vmul.f32 %v1698_v3, %v1634_v5  ;;  %v1697_v53 = vsub.f32 1.0, %v7906_v7  ;;  %v10901_v5 = vld [vmem:[#allocation54_spill] sm:$0xff] }
 0x4b1   :  { %v1309_v26 = vmul.f32 %v1293_v11, %v10901_v5 }
 0x4b2   :  { %v2003_v38 = vsub.f32 %v1953_v23, %v1714_v37  ;;  %v1713_v51 = vmul.f32 %v1697_v53, %v1633_v41  ;;  %v10902_v41 = vld [vmem:[#allocation50_spill] sm:$0xff]  ;;  %v10904_v53 = vld [vmem:[#allocation61_spill] sm:$0xff] }
 0x4b4   :  { %v2019_v17 = vmul.f32 %v2003_v38, %v7245_v43  ;;  %v2002_v58 = vsub.f32 %v1948_v34, %v1713_v51  ;;  %v1308_v38 = vmul.f32 %v1292_v54, %v10904_v53 }
 0x4b6   :  { %v2035_v6 = vadd.f32 %v2019_v17, %v1714_v37  ;;  %v2018_v10 = vmul.f32 %v2002_v58, %v7245_v43 }
 0x4b8   :  { %vm2051_vm3 = vcmp.ge.f32.partialorder %v2035_v6, 0.005  ;;  %v2034_v44 = vadd.f32 %v2018_v10, %v1713_v51  ;;  %v10905_v51 = vld [vmem:[#allocation35_spill] sm:$0xff] }
 0x4b9   :  { %v7918_v57 = vsel %vm2051_vm3, 1.0, %v10746_v9 }
 0x4ba   :  { %vm2050_vm4 = vcmp.ge.f32.partialorder %v2034_v44, 0.005  ;;  %v2099_v19 = vsub.f32 1.0, %v7918_v57 }
 0x4bb   :  { %v7923_v12 = vsel %vm2050_vm4, 1.0, %v10746_v9  ;;  %v5448_v2 = vpop.f32.mrf.mxu1 }
 0x4bc   :  { %v1562_v48 = vadd.f32 %v5448_v2, %v10902_v41  ;;  %v7929_v3 = vmul.f32 %v2099_v19, %v2035_v6  ;;  %v2098_v47 = vsub.f32 1.0, %v7923_v12 }
 0x4bd   :  { %v1556_v37 = vpop.f32.mrf.mxu1 }
 0x4be   :  { %10903 = vst [vmem:[#allocation11_spill] sm:$0xff] %v7929_v3  ;;  %v1604_v23 = vsub.f32 %v1562_v48, %v1309_v26  ;;  %v1557_v34 = vadd.f32 %v1556_v37, %v10905_v51  ;;  %v7934_v17 = vmul.f32 %v2098_v47, %v2034_v44  ;;  %v7948_v44 = vld [vmem:[%s10373_s10] ss:$0 sm:$0xff] }
 0x4bf   :  { %v5480_v2 = vpop.f32.mrf.mxu0  ;;  %v1727_v19 = vmul.f32 %v7948_v44, %v7843_v45  ;;  %v2129_v29 = vmul.f32 %v7948_v44, %v7871_v18 }
 0x4c0   :  { %v1620_v58 = vmul.f32 %v1604_v23, %v7245_v43  ;;  %v1603_v10 = vsub.f32 %v1557_v34, %v1308_v38  ;;  %v1963_v47 = vadd.f32 %v5480_v2, %v10902_v41 }
 0x4c1   :  { %v1957_v24 = vpop.f32.mrf.mxu0  ;;  %v1751_v53 = vsel %vm98_vm0, %v1727_v19, 0.0 }
 0x4c2   :  { %v1619_v11 = vmul.f32 %v1603_v10, %v7245_v43  ;;  %v1636_v5 = vadd.f32 %v1620_v58, %v1309_v26  ;;  %v1958_v45 = vadd.f32 %v1957_v24, %v10905_v51 }
 0x4c3   :  { %5679 = vrot.lane.b32.xlu0 %v5678_v55, %s6004_s3 }
 0x4c4   :  { %vm1652_vm5 = vcmp.ge.f32.partialorder %v1636_v5, 0.005  ;;  %v1635_v6 = vadd.f32 %v1619_v11, %v1308_v38 }
 0x4c5   :  { %v7943_v54 = vsel %vm1652_vm5, 1.0, %v10746_v9 }
 0x4c6   :  { %v1700_v26 = vsub.f32 1.0, %v7943_v54  ;;  %vm1651_vm6 = vcmp.ge.f32.partialorder %v1635_v6, 0.005 }
 0x4c7   :  { %v7954_v48 = vsel %vm1651_vm6, 1.0, %v10746_v9 }
 0x4c8   :  { %v1716_v55 = vmul.f32 %v1700_v26, %v1636_v5  ;;  %v1699_v37 = vsub.f32 1.0, %v7954_v48 }
 0x4ca   :  { %v2005_v38 = vsub.f32 %v1963_v47, %v1716_v55  ;;  %v1715_v34 = vmul.f32 %v1699_v37, %v1635_v6  ;;  %1752 = vadd.xlane.f32.xlu1 %v1751_v53  ;;  %v10908_v6 = vld [vmem:[#allocation64_spill] sm:$0xff]  ;;  %v10910_v53 = vld [vmem:[#allocation69_spill] sm:$0xff] }
 0x4cb   :  { %v1295_v24 = vsub.f32 1.0, %v10908_v6 }
 0x4cc   :  { %v2021_v58 = vmul.f32 %v2005_v38, %v7245_v43  ;;  %v2004_v10 = vsub.f32 %v1958_v45, %v1715_v34  ;;  %v1294_v38 = vsub.f32 1.0, %v10910_v53 }
 0x4ce   :  { %v2020_v11 = vmul.f32 %v2004_v10, %v7245_v43  ;;  %v2037_v5 = vadd.f32 %v2021_v58, %v1716_v55  ;;  %v10912_v58 = vld [vmem:[#allocation62_spill] sm:$0xff]  ;;  %v1310_v6 = vmul.f32 %v1294_v38, %v10914_v31  ;;  %v10917_v31 = vpack.i.bf16 %v7902_v32, %v7906_v7 }
 0x4cf   :  { %v1311_v10 = vmul.f32 %v1295_v24, %v10912_v58 }
 0x4d0   :  { %vm2053_vm7 = vcmp.ge.f32.partialorder %v2037_v5, 0.005  ;;  %v2036_v2 = vadd.f32 %v2020_v11, %v1715_v34  ;;  %v10913_v11 = vld [vmem:[#allocation58_spill] sm:$0xff] }
 0x4d1   :  { %v7965_v26 = vsel %vm2053_vm7, 1.0, %v10746_v9 }
 0x4d2   :  { %10906 = vst [vmem:[#allocation42_spill] sm:$0xff] %v7965_v26  ;;  %v2101_v23 = vsub.f32 1.0, %v7965_v26  ;;  %vm2052_vm8 = vcmp.ge.f32.partialorder %v2036_v2, 0.005 }
 0x4d3   :  { %v7969_v19 = vsel %vm2052_vm8, 1.0, %v10746_v9 }
 0x4d4   :  { %10907 = vst [vmem:[#allocation21_spill] sm:$0xff] %v7969_v19  ;;  %v7972_v47 = vmul.f32 %v2101_v23, %v2037_v5  ;;  %v2100_v37 = vsub.f32 1.0, %v7969_v19  ;;  %v10915_v23 = vld [vmem:[#allocation59_spill] sm:$0xff] }
 0x4d6   :  { %10909 = vst [vmem:[#allocation13_spill] sm:$0xff] %v7972_v47  ;;  %v7978_v34 = vmul.f32 %v2100_v37, %v2036_v2  ;;  %v2124_v37 = vmul.f32 %v7948_v44, %v7708_v39 }
 0x4d7   :  { %v5451_v45 = vpop.f32.mrf.mxu1 }
 0x4d8   :  { %10911 = vst [vmem:[#allocation7_spill] sm:$0xff] %v7978_v34  ;;  %v1572_v63 = vadd.f32 %v5451_v45, %v10913_v11 }
 0x4d9   :  { %v1566_v59 = vpop.f32.mrf.mxu1 }
 0x4da   :  { %v1606_v15 = vsub.f32 %v1572_v63, %v1311_v10  ;;  %v1567_v5 = vadd.f32 %v1566_v59, %v10915_v23 }
 0x4db   :  { %5689 = vrot.lane.b32.xlu1 %v10916_v8, %s6004_s3  ;;  %v7994_v63 = vpop.f32.mrf.mxu0  ;;  %v1728_v8 = vmul.f32 %v7948_v44, %v7839_v4 }
 0x4dc   :  { %v1622_v55 = vmul.f32 %v1606_v15, %v7245_v43  ;;  %v1605_v2 = vsub.f32 %v1567_v5, %v1310_v6  ;;  %v2140_v15 = vsel %vm98_vm0, %v2124_v37, 0.0  ;;  %v2127_v5 = vmul.f32 %v7948_v44, %v7811_v61 }
 0x4dd   :  { %v1967_v38 = vpop.f32.mrf.mxu0 }
 0x4de   :  { %v1621_v24 = vmul.f32 %v1605_v2, %v7245_v43  ;;  %v7992_v45 = vadd.f32 %v1622_v55, %v1311_v10  ;;  %v1968_v2 = vadd.f32 %v1967_v38, %v10915_v23 }
 0x4df   :  { %5694 = vrot.lane.b32.xlu1 %v10917_v31, %s6005_s23  ;;  %v2126_v31 = vmul.f32 %v7948_v44, %v7816_v42 }
 0x4e0   :  { %vm1654_vm9 = vcmp.ge.f32.partialorder %v7992_v45, 0.005  ;;  %v1637_v59 = vadd.f32 %v1621_v24, %v1310_v6  ;;  %v1754_v6 = vsel %vm98_vm0, %v1728_v8, 0.0  ;;  %v2149_v24 = vsel %vm98_vm0, %v2127_v5, 0.0 }
 0x4e1   :  { %v8005_v39 = vsel %vm1654_vm9, 1.0, %v10746_v9  ;;  %v2146_v10 = vsel %vm98_vm0, %v2126_v31, 0.0  ;;  %v1730_v8 = vmul.f32 %v7948_v44, %v7902_v32  ;;  %v10923_v32 = vld [vmem:[#allocation66_spill] sm:$0xff] }
 0x4e2   :  { %vm1653_vm10 = vcmp.ge.f32.partialorder %v1637_v59, 0.005  ;;  %2141 = vadd.xlane.f32.xlu0 %v2140_v15 }
 0x4e3   :  { %v8008_v55 = vsel %vm1653_vm10, 1.0, %v10746_v9  ;;  %v1760_v42 = vsel %vm98_vm0, %v1730_v8, 0.0 }
 0x4e4   :  { %v1701_v58 = vsub.f32 1.0, %v8008_v55 }
 0x4e6   :  { %v1717_v4 = vmul.f32 %v1701_v58, %v1637_v59  ;;  %1755 = vadd.xlane.f32.xlu0 %v1754_v6  ;;  %v10919_v59 = vld [vmem:[#allocation71_spill] sm:$0xff]  ;;  %v10920_v6 = vld [vmem:[#allocation72_spill] sm:$0xff] }
 0x4e7   :  { %v1297_v38 = vsub.f32 1.0, %v10919_v59  ;;  %v1296_v5 = vsub.f32 1.0, %v10920_v6 }
 0x4e8   :  { %v2006_v37 = vsub.f32 %v1968_v2, %v1717_v4 }
 0x4e9   :  { %v1312_v33 = vmul.f32 %v1296_v5, %v10924_v20 }
 0x4ea   :  { %v2022_v15 = vmul.f32 %v2006_v37, %v7245_v43  ;;  %2150 = vadd.xlane.f32.xlu0 %v2149_v24  ;;  %v10922_v37 = vld [vmem:[#allocation43_spill] sm:$0xff] }
 0x4eb   :  { %v1313_v24 = vmul.f32 %v1297_v38, %v10922_v37  ;;  %v1729_v38 = vmul.f32 %v7948_v44, %v7906_v7  ;;  %v1731_v7 = vmul.f32 %v7948_v44, %v7954_v48  ;;  %v10928_v37 = vpack.i.bf16 %v7871_v18, %v7880_v46 }
 0x4ec   :  { %v2038_v53 = vadd.f32 %v2022_v15, %v1717_v4 }
 0x4ee   :  { %2147 = vadd.xlane.f32.xlu0 %v2146_v10  ;;  %vm2054_vm11 = vcmp.ge.f32.partialorder %v2038_v53, 0.005 }
 0x4ef   :  { %v8025_v61 = vsel %vm2054_vm11, 1.0, %v10746_v9 }
 0x4f0   :  { %10918 = vst [vmem:[#allocation23_spill] sm:$0xff] %v8025_v61  ;;  %v2102_v58 = vsub.f32 1.0, %v8025_v61 }
 0x4f2   :  { %1761 = vadd.xlane.f32.xlu0 %v1760_v42  ;;  %v8031_v4 = vmul.f32 %v2102_v58, %v2038_v53 }
 0x4f3   :  { %v5454_v2 = vpop.f32.mrf.mxu1 }
 0x4f4   :  { %10921 = vst [vmem:[#allocation20_spill] sm:$0xff] %v8031_v4  ;;  %v1582_v10 = vadd.f32 %v5454_v2, %v10923_v32  ;;  %v1298_v4 = vsub.f32 1.0, %v10935_v14 }
 0x4f5   :  { %v1576_v31 = vpop.f32.mrf.mxu1 }
 0x4f6   :  { %v1608_v15 = vsub.f32 %v1582_v10, %v1313_v24  ;;  %v1577_v59 = vadd.f32 %v1576_v31, %v10925_v49  ;;  %v1314_v18 = vmul.f32 %v1298_v4, %v10938_v62 }
 0x4f8   :  { %v1624_v22 = vmul.f32 %v1608_v15, %v7245_v43  ;;  %v1607_v30 = vsub.f32 %v1577_v59, %v1312_v33  ;;  %v10932_v59 = vld [vmem:[#allocation70_spill] sm:$0xff] }
 0x4fa   :  { %v1623_v8 = vmul.f32 %v1607_v30, %v7245_v43  ;;  %v1640_v42 = vadd.f32 %v1624_v22, %v1313_v24  ;;  %v1757_v30 = vsel %vm98_vm0, %v1729_v38, 0.0  ;;  %v2128_v22 = vmul.f32 %v7948_v44, %v7880_v46  ;;  %v5486_v38 = vpop.f32.mrf.mxu0 }
 0x4fb   :  { %v1763_v24 = vsel %vm98_vm0, %v1731_v7, 0.0 }
 0x4fc   :  { %vm1656_vm12 = vcmp.ge.f32.partialorder %v1640_v42, 0.005  ;;  %v1639_v53 = vadd.f32 %v1623_v8, %v1312_v33  ;;  %v2152_v33 = vsel %vm98_vm0, %v2128_v22, 0.0  ;;  %v1977_v22 = vpop.f32.mrf.mxu0 }
 0x4fd   :  { %v8042_v58 = vsel %vm1656_vm12, 1.0, %v10746_v9 }
 0x4fe   :  { %vm1655_vm13 = vcmp.ge.f32.partialorder %v1639_v53, 0.005  ;;  %10926 = vst [vmem:[#allocation9_spill] sm:$0xff] %v8042_v58 }
 0x4ff   :  { %v8045_v2 = vsel %vm1655_vm13, 1.0, %v10746_v9 }
 0x500   :  { %10927 = vst [vmem:[#allocation47_spill] sm:$0xff] %v8045_v2  ;;  %v1703_v20 = vsub.f32 1.0, %v8045_v2 }
 0x502   :  { %v8050_v5 = vmul.f32 %v1703_v20, %v1639_v53 }
 0x503   :  { %1758 = vadd.xlane.f32.xlu1 %v1757_v30 }
 0x507   :  { %2153 = vadd.xlane.f32.xlu1 %v2152_v33  ;;  %v10929_v33 = vpack.i.bf16 %v7918_v57, %v7923_v12 }
 0x508   :  { %5699 = vrot.lane.b32.xlu0 %v10928_v37, %s6004_s3  ;;  %v10931_v37 = vld [vmem:[#allocation76_spill] sm:$0xff] }
 0x50b   :  { %1764 = vadd.xlane.f32.xlu1 %v1763_v24  ;;  %v1299_v24 = vsub.f32 1.0, %v10931_v37  ;;  %v1702_v37 = vsub.f32 1.0, %v8005_v39 }
 0x50d   :  { %v1315_v3 = vmul.f32 %v1299_v24, %v10934_v36 }
 0x50f   :  { %v5457_v10 = vpop.f32.mrf.mxu1 }
 0x510   :  { %v1592_v6 = vadd.f32 %v5457_v10, %v10932_v59  ;;  %v2155_v10 = vsel %vm98_vm0, %v2129_v29, 0.0  ;;  %v1973_v29 = vadd.f32 %v7994_v63, %v10913_v11 }
 0x511   :  { %v1586_v31 = vpop.f32.mrf.mxu1 }
 0x512   :  { %v1587_v23 = vadd.f32 %v1586_v31, %v10936_v40  ;;  %v1718_v31 = vmul.f32 %v1702_v37, %v7992_v45 }
 0x513   :  { %v5500_v15 = vpop.f32.mrf.mxu1  ;;  %v8071_v46 = vpop.f32.mrf.mxu0 }
 0x514   :  { %v1609_v24 = vsub.f32 %v1587_v23, %v1314_v18  ;;  %v2324_v62 = vadd.f32 %v5500_v15, %v7327_v13 }
 0x515   :  { %v2318_v8 = vpop.f32.mrf.mxu1  ;;  %v8077_v35 = vpop.f32.mrf.mxu0 }
 0x516   :  { %v2398_v45 = vsub.f32 %v2324_v62, %v7714_v0  ;;  %v2319_v37 = vadd.f32 %v2318_v8, %v7236_v25  ;;  %v2130_v62 = vmul.f32 %v7948_v44, %v7923_v12  ;;  %v2133_v12 = vmul.f32 %v7948_v44, %v7965_v26 }
 0x517   :  { %v5503_v53 = vpop.f32.mrf.mxu1  ;;  %v8086_v34 = vpop.f32.mrf.mxu0 }
 0x518   :  { %10937 = vst [vmem:[#allocation22_spill] sm:$0xff] %v8086_v34  ;;  %v1983_v34 = vadd.f32 %v5486_v38, %v10923_v32  ;;  %v2397_v8 = vsub.f32 %v2319_v37, %v7727_v28 }
 0x519   :  { %v8063_v20 = vpop.f32.mrf.mxu1  ;;  %v8095_v14 = vpop.f32.mrf.mxu0 }
 0x51a   :  { %10939 = vst [vmem:[#allocation26_spill] sm:$0xff] %v8095_v14  ;;  %v1978_v14 = vadd.f32 %v1977_v22, %v10925_v49  ;;  %v2413_v37 = vmul.f32 %v2397_v8, %v7245_v43  ;;  %v2329_v26 = vadd.f32 %v8063_v20, %v10863_v50 }
 0x51b   :  { %v8065_v30 = vpop.f32.mrf.mxu1  ;;  %v8105_v4 = vpop.f32.mrf.mxu0 }
 0x51c   :  { %5709 = vrot.lane.b32.xlu1 %v10929_v33, %s6004_s3  ;;  %v1610_v33 = vsub.f32 %v1592_v6, %v1315_v3 }
 0x51d   :  { %v8073_v7 = vpop.f32.mrf.mxu1 }
 0x51e   :  { %10930 = vst [vmem:[#allocation12_spill] sm:$0xff] %v8073_v7  ;;  %v1626_v36 = vmul.f32 %v1610_v33, %v7245_v43  ;;  %v2007_v33 = vsub.f32 %v1973_v29, %v1718_v31  ;;  %v2131_v29 = vmul.f32 %v7948_v44, %v7918_v57  ;;  %v1732_v57 = vmul.f32 %v7948_v44, %v7943_v54 }
 0x51f   :  { %v8079_v60 = vpop.f32.mrf.mxu1 }
 0x520   :  { %10933 = vst [vmem:[#allocation53_spill] sm:$0xff] %v8079_v60  ;;  %v1704_v60 = vsub.f32 1.0, %v8042_v58  ;;  %v1642_v58 = vadd.f32 %v1626_v36, %v1315_v3  ;;  %v2023_v3 = vmul.f32 %v2007_v33, %v7245_v43 }
 0x521   :  { %v8088_v7 = vpop.f32.mrf.mxu1 }
 0x522   :  { %v1720_v56 = vmul.f32 %v1704_v60, %v1640_v42  ;;  %v2008_v60 = vsub.f32 %v1978_v14, %v8050_v5  ;;  %vm1658_vm14 = vcmp.ge.f32.partialorder %v1642_v58, 0.005  ;;  %v8112_v42 = vpop.f32.mrf.mxu0  ;;  %v2414_v14 = vmul.f32 %v2398_v45, %v7245_v43 }
 0x523   :  { %v8097_v6 = vpop.f32.mrf.mxu1 }
 0x524   :  { %v2009_v47 = vsub.f32 %v1983_v34, %v1720_v56  ;;  %v2024_v36 = vmul.f32 %v2008_v60, %v7245_v43  ;;  %v8121_v34 = vsel %vm1658_vm14, 1.0, %v10746_v9  ;;  %v8124_v22 = vpop.f32.mrf.mxu0  ;;  %v2334_v60 = vadd.f32 %v5503_v53, %v10859_v27 }
 0x525   :  { %v8107_v23 = vpop.f32.mrf.mxu1  ;;  %10940 = vst [vmem:[#allocation57_spill] sm:$0xff] %v8121_v34 }
 0x526   :  { %v2025_v15 = vmul.f32 %v2009_v47, %v7245_v43  ;;  %v1706_v47 = vsub.f32 1.0, %v8121_v34  ;;  %v8141_v45 = vadd.f32 %v2024_v36, %v8050_v5  ;;  %v10944_v36 = vpack.i.bf16 %v7943_v54, %v7954_v48 }
 0x527   :  { %2156 = vadd.xlane.f32.xlu0 %v2155_v10  ;;  %v1625_v10 = vmul.f32 %v1609_v24, %v7245_v43  ;;  %v8114_v38 = vpop.f32.mrf.mxu1  ;;  %v2039_v24 = vadd.f32 %v2023_v3, %v1718_v31  ;;  %v8146_v31 = vadd.f32 %v2414_v14, %v7714_v0  ;;  %v8148_v3 = vpop.f32.mrf.mxu0  ;;  %v2400_v0 = vsub.f32 %v2334_v60, %v7828_v16 }
 0x528   :  { %10942 = vst [vmem:[#allocation31_spill] sm:$0xff] %v8148_v3  ;;  %v1722_v53 = vmul.f32 %v1706_v47, %v1642_v58  ;;  %vm2056_vm3 = vcmp.ge.f32.partialorder %v8141_v45, 0.005  ;;  %v2158_v14 = vsel %vm98_vm0, %v2130_v62, 0.0  ;;  %v1993_v58 = vadd.f32 %v8071_v46, %v10932_v59 }
 0x529   :  { %v1641_v63 = vadd.f32 %v1625_v10, %v1314_v18  ;;  %v8126_v18 = vpop.f32.mrf.mxu1  ;;  %v8132_v10 = vadd.f32 %v2025_v15, %v1720_v56  ;;  %vm2055_vm1 = vcmp.ge.f32.partialorder %v2039_v24, 0.005  ;;  %v8155_v15 = vsel %vm98_vm0, %v2131_v29, 0.0  ;;  %v8173_v47 = vpop.f32.mrf.mxu0 }
 0x52a   :  { %10943 = vst [vmem:[#allocation29_spill] sm:$0xff] %v8155_v15  ;;  %v8168_v29 = vsel %vm98_vm0, %v1732_v57, 0.0  ;;  %vm2446_vm4 = vcmp.ge.f32.partialorder %v8146_v31, 0.005  ;;  %10945 = vst [vmem:[#allocation27_spill] sm:$0xff] %v8173_v47  ;;  %v2132_v60 = vmul.f32 %v7948_v44, %v7969_v19  ;;  %v8180_v54 = vsel %vm98_vm0, %v2133_v12, 0.0 }
 0x52b   :  { %vm1657_vm15 = vcmp.ge.f32.partialorder %v1641_v63, 0.005  ;;  %v8150_v56 = vpop.f32.mrf.mxu1  ;;  %vm2057_vm2 = vcmp.ge.f32.partialorder %v8132_v10, 0.005  ;;  %10946 = vst [vmem:[#allocation52_spill] sm:$0xff] %v8180_v54  ;;  %v8184_v48 = vsel %vm2055_vm1, 1.0, %v10746_v9  ;;  %v1734_v46 = vmul.f32 %v7948_v44, %v8005_v39 }
 0x52c   :  { %v8137_v33 = vsel %vm1657_vm15, 1.0, %v10746_v9  ;;  %10947 = vst [vmem:[#allocation38_spill] sm:$0xff] %v8184_v48  ;;  %v8187_v62 = vsel %vm2057_vm2, 1.0, %v10746_v9  ;;  %v1733_v57 = vmul.f32 %v7948_v44, %v8008_v55  ;;  %v8197_v12 = vsel %vm2056_vm3, 1.0, %v10746_v9 }
 0x52d   :  { %10941 = vst [vmem:[#allocation37_spill] sm:$0xff] %v8137_v33  ;;  %v1705_v5 = vsub.f32 1.0, %v8137_v33  ;;  %v8175_v8 = vpop.f32.mrf.mxu1  ;;  %10948 = vst [vmem:[#allocation24_spill] sm:$0xff] %v8187_v62  ;;  %v2429_v33 = vadd.f32 %v2413_v37, %v7727_v28  ;;  %v2416_v54 = vmul.f32 %v2400_v0, %v7245_v43  ;;  %v8201_v19 = vsel %vm2446_vm4, 1.0, %v10746_v9 }
 0x52e   :  { %10949 = vst [vmem:[#allocation39_spill] sm:$0xff] %v8197_v12  ;;  %10950 = vst [vmem:[#allocation8_spill] sm:$0xff] %v8201_v19  ;;  %v1988_v28 = vadd.f32 %v8077_v35, %v10936_v40  ;;  %v8215_v0 = vsel %vm98_vm0, %v2132_v60, 0.0  ;;  %v2105_v20 = vsub.f32 1.0, %v8187_v62  ;;  %v2104_v47 = vsub.f32 1.0, %v8197_v12 }
 0x52f   :  { %v1721_v34 = vmul.f32 %v1705_v5, %v1641_v63  ;;  %v8209_v63 = vpop.f32.mrf.mxu0  ;;  %v2103_v5 = vsub.f32 1.0, %v8184_v48  ;;  %v8212_v37 = vpop.f32.mrf.mxu1  ;;  %10952 = vst [vmem:[#allocation15_spill] sm:$0xff] %v8215_v0  ;;  %v8225_v35 = vsel %vm98_vm0, %v1733_v57, 0.0  ;;  %vm2445_vm5 = vcmp.ge.f32.partialorder %v2429_v33, 0.005  ;;  %v10965_v48 = vld [vmem:[#allocation59_spill] sm:$0xff] }
 0x530   :  { %10951 = vst [vmem:[#allocation10_spill] sm:$0xff] %v8209_v63  ;;  %10953 = vst [vmem:[#allocation18_spill] sm:$0xff] %v8225_v35  ;;  %v2494_v63 = vsub.f32 1.0, %v8201_v19  ;;  %v2399_v60 = vsub.f32 %v2329_v26, %v7834_v21  ;;  %v10957_v19 = vld [vmem:[#allocation13_spill] sm:$0xff] }
 0x531   :  { %v2010_v15 = vsub.f32 %v1988_v28, %v1721_v34  ;;  %v8236_v12 = vmul.f32 %v2103_v5, %v2039_v24  ;;  %v8238_v57 = vpop.f32.mrf.mxu0  ;;  %v8240_v0 = vpop.f32.mrf.mxu1  ;;  %v2359_v24 = vadd.f32 %v8107_v23, %v10905_v51 }
 0x532   :  { %v8263_v5 = vmul.f32 %v2494_v63, %v8146_v31  ;;  %v2415_v26 = vmul.f32 %v2399_v60, %v7245_v43  ;;  %v10959_v31 = vld [vmem:[#allocation26_spill] sm:$0xff]  ;;  %v10962_v60 = vld [vmem:[#allocation48_spill] sm:$0xff] }
 0x533   :  { %v2026_v28 = vmul.f32 %v2010_v15, %v7245_v43  ;;  %v8277_v63 = vadd.f32 %v10959_v31, %v7236_v25 }
 0x534   :  { %v8298_v25 = vadd.f32 %v2415_v26, %v7834_v21 }
 0x536   :  { %vm2447_vm9 = vcmp.ge.f32.partialorder %v8298_v25, 0.005 }
 0x53d   :  { %5704 = vrot.lane.b32.xlu0 %v10944_v36, %s6005_s23  ;;  %v2011_v36 = vsub.f32 %v1993_v58, %v1722_v53  ;;  %v2349_v58 = vadd.f32 %v8088_v7, %v10895_v1  ;;  %v8222_v7 = vsel %vm98_vm0, %v1734_v46, 0.0  ;;  %v2364_v46 = vadd.f32 %v8097_v6, %v10902_v41 }
 0x53e   :  { %v2344_v6 = vadd.f32 %v8065_v30, %v10876_v52 }
 0x53f   :  { %v2027_v3 = vmul.f32 %v2011_v36, %v7245_v43  ;;  %v2403_v62 = vsub.f32 %v2349_v58, %v7934_v17  ;;  %v8259_v58 = vmul.f32 %v2105_v20, %v8132_v10  ;;  %v2406_v23 = vsub.f32 %v2364_v46, %v10957_v19  ;;  %v10958_v10 = vld [vmem:[#allocation22_spill] sm:$0xff]  ;;  %v10963_v46 = vld [vmem:[#allocation12_spill] sm:$0xff] }
 0x540   :  { %2159 = vadd.xlane.f32.xlu1 %v2158_v14  ;;  %v1735_v14 = vmul.f32 %v7948_v44, %v8045_v2  ;;  %v8231_v2 = vadd.f32 %v2416_v54, %v7828_v16  ;;  %v8249_v16 = vmul.f32 %v7948_v44, %v8025_v61  ;;  %v8252_v54 = vsel %vm2445_vm5, 1.0, %v10746_v9  ;;  %v10964_v61 = vld [vmem:[#allocation7_spill] sm:$0xff] }
 0x541   :  { %10956 = vst [vmem:[#allocation32_spill] sm:$0xff] %v8252_v54  ;;  %v8266_v44 = vmul.f32 %v2104_v47, %v8141_v45  ;;  %v2419_v30 = vmul.f32 %v2403_v62, %v7245_v43  ;;  %v2709_v20 = vadd.f32 %v10958_v10, %v7327_v13  ;;  %v2493_v15 = vsub.f32 1.0, %v8252_v54  ;;  %v10961_v47 = vld [vmem:[#allocation41_spill] sm:$0xff] }
 0x542   :  { %v8243_v36 = vsel %vm98_vm0, %v1735_v14, 0.0  ;;  %10955 = vst [vmem:[#allocation33_spill] sm:$0xff] %v8249_v16  ;;  %v2043_v14 = vadd.f32 %v2027_v3, %v1722_v53  ;;  %vm2448_vm6 = vcmp.ge.f32.partialorder %v8231_v2, 0.005  ;;  %v2374_v45 = vadd.f32 %v8114_v38, %v10913_v11  ;;  %v8281_v3 = vpop.f32.mrf.mxu0  ;;  %v8283_v53 = vpop.f32.mrf.mxu1 }
 0x543   :  { %10954 = vst [vmem:[#allocation30_spill] sm:$0xff] %v8243_v36  ;;  %10960 = vst [vmem:[#allocation65_spill] sm:$0xff] %v8283_v53  ;;  %v2402_v62 = vsub.f32 %v2344_v6, %v10961_v47  ;;  %v2339_v16 = vadd.f32 %v10963_v46, %v10962_v60  ;;  %v2405_v10 = vsub.f32 %v2359_v24, %v10964_v61  ;;  %v8293_v36 = vsel %vm2448_vm6, 1.0, %v10746_v9  ;;  %v10967_v6 = vld [vmem:[#allocation28_spill] sm:$0xff]  ;;  %v10968_v53 = vld [vmem:[#allocation53_spill] sm:$0xff] }
 0x544   :  { %v2369_v54 = vadd.f32 %v8126_v18, %v10965_v48  ;;  %v2783_v31 = vsub.f32 %v2709_v20, %v8263_v5  ;;  %10966 = vst [vmem:[#allocation55_spill] sm:$0xff] %v8293_v36  ;;  %vm2059_vm7 = vcmp.ge.f32.partialorder %v2043_v14, 0.005  ;;  %v8295_v38 = vadd.f32 %v2026_v28, %v1721_v34  ;;  %v8313_v21 = vpop.f32.mrf.mxu0  ;;  %v8315_v26 = vpop.f32.mrf.mxu1 }
 0x545   :  { %v2354_v13 = vadd.f32 %v10968_v53, %v10967_v6  ;;  %v2422_v46 = vmul.f32 %v2406_v23, %v7245_v43  ;;  %v2435_v24 = vadd.f32 %v2419_v30, %v7934_v17  ;;  %v8304_v35 = vmul.f32 %v2493_v15, %v2429_v33  ;;  %10969 = vst [vmem:[#allocation51_spill] sm:$0xff] %v8315_v26  ;;  %v10970_v17 = vld [vmem:[#allocation20_spill] sm:$0xff]  ;;  %v10973_v53 = vld [vmem:[#allocation11_spill] sm:$0xff] }
 0x546   :  { %v8308_v18 = vadd.f32 %v8105_v4, %v10859_v27  ;;  %v2408_v20 = vsub.f32 %v2374_v45, %v8236_v12  ;;  %v2384_v34 = vadd.f32 %v8150_v56, %v10923_v32  ;;  %v2418_v28 = vmul.f32 %v2402_v62, %v7245_v43  ;;  %v10972_v45 = vld [vmem:[#allocation6_spill] sm:$0xff]  ;;  %v8344_v27 = vpop.f32.mrf.mxu0  ;;  %v8347_v26 = vpop.f32.mrf.mxu1 }
 0x547   :  { %v2421_v23 = vmul.f32 %v2405_v10, %v7245_v43  ;;  %v2407_v33 = vsub.f32 %v2369_v54, %v10970_v17  ;;  %v8321_v30 = vsel %vm2059_vm7, 1.0, %v10746_v9  ;;  %v8324_v4 = vmul.f32 %v2783_v31, %v7245_v43  ;;  %10975 = vst [vmem:[#allocation54_spill] sm:$0xff] %v8347_v26 }
 0x548   :  { %10971 = vst [vmem:[#allocation78_spill] sm:$0xff] %v8321_v30  ;;  %v2496_v15 = vsub.f32 1.0, %v8293_v36  ;;  %v2401_v56 = vsub.f32 %v2339_v16, %v10972_v45  ;;  %vm2058_vm8 = vcmp.ge.f32.partialorder %v8295_v38, 0.005  ;;  %v2404_v62 = vsub.f32 %v2354_v13, %v10973_v53 }
 0x549   :  { %vm2451_vm10 = vcmp.ge.f32.partialorder %v2435_v24, 0.005  ;;  %v8332_v10 = vadd.f32 %v2422_v46, %v10957_v19  ;;  %v10974_v54 = vpack.i.bf16 %v8005_v39, %v8008_v55  ;;  %v8340_v31 = vadd.f32 %v8112_v42, %v10863_v50  ;;  %v8383_v50 = vpop.f32.mrf.mxu1 }
 0x54a   :  { %v2424_v16 = vmul.f32 %v2408_v20, %v7245_v43  ;;  %v2410_v36 = vsub.f32 %v2384_v34, %v8259_v58  ;;  %v2107_v13 = vsub.f32 1.0, %v8321_v30  ;;  %v2423_v19 = vmul.f32 %v2407_v33, %v7245_v43  ;;  %v8380_v30 = vpop.f32.mrf.mxu0 }
 0x54b   :  { %v8351_v46 = vadd.f32 %v2421_v23, %v10964_v61  ;;  %v2379_v39 = vadd.f32 %v8175_v8, %v10925_v49  ;;  %v8356_v55 = vsel %vm2058_vm8, 1.0, %v10746_v9  ;;  %v2782_v42 = vsub.f32 %v8277_v63, %v8304_v35 }
 0x54c   :  { %10976 = vst [vmem:[#allocation50_spill] sm:$0xff] %v8356_v55  ;;  %v2417_v20 = vmul.f32 %v2401_v56, %v7245_v43  ;;  %v8362_v34 = vsel %vm2451_vm10, 1.0, %v10746_v9  ;;  %v2394_v33 = vadd.f32 %v8212_v37, %v10932_v59  ;;  %v8369_v61 = vsel %vm2447_vm9, 1.0, %v10746_v9 }
 0x54d   :  { %10977 = vst [vmem:[#allocation61_spill] sm:$0xff] %v8362_v34  ;;  %10978 = vst [vmem:[#allocation35_spill] sm:$0xff] %v8369_v61  ;;  %v2420_v8 = vmul.f32 %v2404_v62, %v7245_v43  ;;  %v8373_v23 = vadd.f32 %v2418_v28, %v10961_v47  ;;  %vm2454_vm11 = vcmp.ge.f32.partialorder %v8332_v10, 0.005  ;;  %v2426_v63 = vmul.f32 %v2410_v36, %v7245_v43 }
 0x54e   :  { %v8378_v56 = vadd.f32 %v2424_v16, %v8236_v12  ;;  %v2106_v37 = vsub.f32 1.0, %v8356_v55  ;;  %v2499_v26 = vsub.f32 1.0, %v8362_v34  ;;  %vm2453_vm12 = vcmp.ge.f32.partialorder %v8351_v46, 0.005 }
 0x54f   :  { %v2409_v47 = vsub.f32 %v2379_v39, %v8266_v44  ;;  %v8389_v28 = vadd.f32 %v2423_v19, %v10970_v17  ;;  %v8392_v36 = vmul.f32 %v2496_v15, %v8231_v2  ;;  %v8395_v12 = vsel %vm2454_vm11, 1.0, %v10746_v9  ;;  %v8415_v19 = vpop.f32.mrf.mxu0  ;;  %v8417_v39 = vpop.f32.mrf.mxu1 }
 0x550   :  { %10979 = vst [vmem:[#allocation62_spill] sm:$0xff] %v8395_v12  ;;  %v2389_v62 = vadd.f32 %v8240_v0, %v10936_v40  ;;  %v2495_v16 = vsub.f32 1.0, %v8369_v61  ;;  %vm2450_vm13 = vcmp.ge.f32.partialorder %v8373_v23, 0.005  ;;  %v8405_v17 = vadd.f32 %v2420_v8, %v10973_v53  ;;  %v10986_v61 = vld [vmem:[#allocation29_spill] sm:$0xff] }
 0x551   :  { %5714 = vrot.lane.b32.xlu1 %v10974_v54, %s6005_s23  ;;  %v2123_v54 = vmul.f32 %v2107_v13, %v2043_v14  ;;  %v8402_v13 = vadd.f32 %v2417_v20, %v10972_v45  ;;  %v8408_v2 = vsel %vm2453_vm12, 1.0, %v10746_v9  ;;  %vm2456_vm14 = vcmp.ge.f32.partialorder %v8378_v56, 0.005 }
 0x552   :  { %10980 = vst [vmem:[#allocation58_spill] sm:$0xff] %v8408_v2  ;;  %v8412_v15 = vadd.f32 %v2426_v63, %v8259_v58  ;;  %v2122_v0 = vmul.f32 %v2106_v37, %v8295_v38  ;;  %v2502_v45 = vsub.f32 1.0, %v8395_v12  ;;  %v2425_v53 = vmul.f32 %v2409_v47, %v7245_v43  ;;  %v8453_v47 = vpop.f32.mrf.mxu1 }
 0x553   :  { %v2412_v14 = vsub.f32 %v2394_v33, %v2123_v54  ;;  %v2515_v33 = vmul.f32 %v2499_v26, %v2435_v24  ;;  %vm2455_vm15 = vcmp.ge.f32.partialorder %v8389_v28, 0.005  ;;  %v8423_v20 = vmul.f32 %v2782_v42, %v7245_v43  ;;  %v10981_v26 = vld [vmem:[#allocation10_spill] sm:$0xff]  ;;  %10985 = vst [vmem:[#allocation40_spill] sm:$0xff] %v8453_v47 }
 0x554   :  { %v8427_v58 = vadd.f32 %v8124_v22, %v10876_v52  ;;  %v2411_v8 = vsub.f32 %v2389_v62, %v2122_v0  ;;  %v2785_v24 = vsub.f32 %v8308_v18, %v8392_v36  ;;  %v2734_v63 = vadd.f32 %v10981_v26, %v10895_v1  ;;  %v8451_v18 = vpop.f32.mrf.mxu0 }
 0x555   :  { %v2428_v38 = vmul.f32 %v2412_v14, %v7245_v43  ;;  %v2501_v37 = vsub.f32 1.0, %v8408_v2  ;;  %v8439_v42 = vsel %vm2456_vm14, 1.0, %v10746_v9  ;;  %v8444_v22 = vsel %vm2450_vm13, 1.0, %v10746_v9 }
 0x556   :  { %10982 = vst [vmem:[#allocation36_spill] sm:$0xff] %v8439_v42  ;;  %10983 = vst [vmem:[#allocation43_spill] sm:$0xff] %v8444_v22  ;;  %vm2449_vm1 = vcmp.ge.f32.partialorder %v8402_v13, 0.005  ;;  %vm2458_vm2 = vcmp.ge.f32.partialorder %v8412_v15, 0.005  ;;  %v2788_v14 = vsub.f32 %v2734_v63, %v2515_v33  ;;  %v2518_v62 = vmul.f32 %v2502_v45, %v8332_v10  ;;  %v8490_v45 = vpop.f32.mrf.mxu1 }
 0x557   :  { %vm2452_vm3 = vcmp.ge.f32.partialorder %v8405_v17, 0.005  ;;  %v8458_v26 = vadd.f32 %v2425_v53, %v8266_v44  ;;  %v8461_v12 = vmul.f32 %v2495_v16, %v8298_v25  ;;  %v2504_v2 = vsub.f32 1.0, %v8439_v42  ;;  %10991 = vst [vmem:[#allocation13_spill] sm:$0xff] %v8490_v45 }
 0x558   :  { %v2427_v34 = vmul.f32 %v2411_v8, %v7245_v43  ;;  %v2444_v55 = vadd.f32 %v2428_v38, %v2123_v54  ;;  %v2749_v47 = vadd.f32 %v8238_v57, %v10902_v41  ;;  %v2517_v63 = vmul.f32 %v2501_v37, %v8351_v46  ;;  %v10989_v54 = vld [vmem:[#allocation31_spill] sm:$0xff]  ;;  %v8488_v46 = vpop.f32.mrf.mxu0 }
 0x559   :  { %v8471_v44 = vsel %vm2458_vm2, 1.0, %v10746_v9  ;;  %v2498_v25 = vsub.f32 1.0, %v8444_v22  ;;  %v8477_v16 = vsel %vm2449_vm1, 1.0, %v10746_v9  ;;  %v8486_v57 = vsel %vm2452_vm3, 1.0, %v10746_v9 }
 0x55a   :  { %10987 = vst [vmem:[#allocation68_spill] sm:$0xff] %v8471_v44  ;;  %10988 = vst [vmem:[#allocation74_spill] sm:$0xff] %v8477_v16  ;;  %v2804_v53 = vmul.f32 %v2788_v14, %v7245_v43  ;;  %v2791_v38 = vsub.f32 %v2749_v47, %v2518_v62  ;;  %v2744_v8 = vadd.f32 %v8281_v3, %v10905_v51  ;;  %vm2457_vm4 = vcmp.ge.f32.partialorder %v8458_v26, 0.005 }
 0x55b   :  { %10990 = vst [vmem:[#allocation75_spill] sm:$0xff] %v8486_v57  ;;  %v2520_v37 = vmul.f32 %v2504_v2, %v8378_v56  ;;  %vm2460_vm5 = vcmp.ge.f32.partialorder %v2444_v55, 0.005  ;;  %v2443_v42 = vadd.f32 %v2427_v34, %v2122_v0  ;;  %v2497_v22 = vsub.f32 1.0, %v8477_v16  ;;  %v3134_v2 = vpop.f32.mrf.mxu1 }
 0x55c   :  { %1767 = vadd.xlane.f32.xlu0 %v8168_v29  ;;  %v8448_v29 = vsel %vm2455_vm15, 1.0, %v10746_v9  ;;  %v2790_v14 = vsub.f32 %v2744_v8, %v2517_v63  ;;  %v8505_v3 = vmul.f32 %v2498_v25, %v8373_v23  ;;  %v2500_v45 = vsub.f32 1.0, %v8486_v57 }
 0x55d   :  { %10984 = vst [vmem:[#allocation66_spill] sm:$0xff] %v8448_v29  ;;  %v2503_v10 = vsub.f32 1.0, %v8448_v29  ;;  %v8500_v29 = vmul.f32 %v2785_v24, %v7245_v43  ;;  %v2759_v56 = vadd.f32 %v8313_v21, %v10913_v11  ;;  %v8511_v34 = vsel %vm2457_vm4, 1.0, %v10746_v9 }
 0x55e   :  { %10992 = vst [vmem:[#allocation22_spill] sm:$0xff] %v8511_v34  ;;  %v2807_v0 = vmul.f32 %v2791_v38, %v7245_v43  ;;  %v2754_v24 = vadd.f32 %v8344_v27, %v10965_v48  ;;  %v2820_v23 = vadd.f32 %v2804_v53, %v2515_v33  ;;  %vm2459_vm6 = vcmp.ge.f32.partialorder %v2443_v42, 0.005 }
 0x55f   :  { %v2519_v47 = vmul.f32 %v2503_v10, %v8389_v28  ;;  %v8519_v28 = vsel %vm2460_vm5, 1.0, %v10746_v9  ;;  %v2784_v10 = vsub.f32 %v8340_v31, %v8461_v12  ;;  %v2793_v25 = vsub.f32 %v2759_v56, %v2520_v37 }
 0x560   :  { %2162 = vadd.xlane.f32.xlu0 %v10986_v61  ;;  %v8481_v61 = vadd.f32 %v10989_v54, %v10962_v60  ;;  %v2506_v54 = vsub.f32 1.0, %v8471_v44  ;;  %10994 = vst [vmem:[#allocation41_spill] sm:$0xff] %v8519_v28  ;;  %v8527_v8 = vmul.f32 %v2497_v22, %v8402_v13  ;;  %v2806_v38 = vmul.f32 %v2790_v14, %v7245_v43  ;;  %v5576_v13 = vpop.f32.mrf.mxu1 }
 0x561   :  { %v2792_v44 = vsub.f32 %v2754_v24, %v2519_v47  ;;  %v2505_v27 = vsub.f32 1.0, %v8511_v34  ;;  %v2787_v57 = vsub.f32 %v8427_v58, %v8505_v3  ;;  %v2769_v33 = vadd.f32 %v8380_v30, %v10923_v32  ;;  %v10997_v30 = vld [vmem:[#allocation27_spill] sm:$0xff] }
 0x562   :  { %v8524_v21 = vmul.f32 %v2506_v54, %v8412_v15  ;;  %v2508_v31 = vsub.f32 1.0, %v8519_v28  ;;  %v2815_v15 = vadd.f32 %v8324_v4, %v8263_v5  ;;  %v8541_v22 = vmul.f32 %v2500_v45, %v8405_v17 }
 0x563   :  { %v8544_v54 = vsel %vm2459_vm6, 1.0, %v10746_v9  ;;  %vm2836_vm7 = vcmp.ge.f32.partialorder %v2820_v23, 0.005  ;;  %v2823_v14 = vadd.f32 %v2807_v0, %v2518_v62  ;;  %v8547_v58 = vmul.f32 %v2784_v10, %v7245_v43 }
 0x564   :  { %1773 = vadd.xlane.f32.xlu0 %v8222_v7  ;;  %v8513_v7 = vpop.f32.mrf.mxu0  ;;  %10996 = vst [vmem:[#allocation12_spill] sm:$0xff] %v8544_v54  ;;  %v2739_v56 = vadd.f32 %v10997_v30, %v10967_v6  ;;  %v2809_v24 = vmul.f32 %v2793_v25, %v7245_v43  ;;  %v2795_v5 = vsub.f32 %v2769_v33, %v8524_v21  ;;  %vm2831_vm8 = vcmp.ge.f32.partialorder %v2815_v15, 0.005  ;;  %v3144_v33 = vpop.f32.mrf.mxu1 }
 0x565   :  { %10993 = vst [vmem:[#allocation26_spill] sm:$0xff] %v8513_v7  ;;  %v2786_v4 = vsub.f32 %v8481_v61, %v8527_v8  ;;  %v2808_v17 = vmul.f32 %v2792_v44, %v7245_v43  ;;  %v2521_v45 = vmul.f32 %v2505_v27, %v8458_v26  ;;  %v8557_v28 = vadd.f32 %v2806_v38, %v2517_v63 }
 0x566   :  { %v8538_v53 = vpop.f32.mrf.mxu0  ;;  %v8559_v62 = vmul.f32 %v2508_v31, %v2444_v55  ;;  %v2507_v0 = vsub.f32 1.0, %v8544_v54  ;;  %v8565_v25 = vsel %vm2836_vm7, 1.0, %v10746_v9  ;;  %v8568_v30 = vmul.f32 %v2787_v57, %v7245_v43 }
 0x567   :  { %10995 = vst [vmem:[#allocation48_spill] sm:$0xff] %v8538_v53  ;;  %10999 = vst [vmem:[#allocation59_spill] sm:$0xff] %v8565_v25  ;;  %v2789_v44 = vsub.f32 %v2739_v56, %v8541_v22  ;;  %v2764_v26 = vadd.f32 %v8415_v19, %v10925_v49  ;;  %vm2839_vm9 = vcmp.ge.f32.partialorder %v2823_v14, 0.005  ;;  %v2811_v55 = vmul.f32 %v2795_v5, %v7245_v43 }
 0x568   :  { %v8562_v10 = vpop.f32.mrf.mxu0  ;;  %v2779_v63 = vadd.f32 %v8451_v18, %v10932_v59  ;;  %v8578_v61 = vadd.f32 %v8423_v20, %v8304_v35  ;;  %v8580_v38 = vadd.f32 %v2809_v24, %v2520_v37  ;;  %v8583_v57 = vsel %vm2831_vm8, 1.0, %v10746_v9  ;;  %v5579_v35 = vpop.f32.mrf.mxu1 }
 0x569   :  { %10998 = vst [vmem:[#allocation7_spill] sm:$0xff] %v8562_v10  ;;  %v2794_v27 = vsub.f32 %v2764_v26, %v2521_v45  ;;  %11000 = vst [vmem:[#allocation28_spill] sm:$0xff] %v8583_v57  ;;  %v2884_v31 = vsub.f32 1.0, %v8565_v25  ;;  %vm2838_vm10 = vcmp.ge.f32.partialorder %v8557_v28, 0.005  ;;  %v8588_v56 = vmul.f32 %v2507_v0, %v2443_v42 }
 0x56a   :  { %v2797_v19 = vsub.f32 %v2779_v63, %v8559_v62  ;;  %v8590_v5 = vpop.f32.mrf.mxu0  ;;  %v8593_v18 = vsel %vm2839_vm9, 1.0, %v10746_v9  ;;  %v8595_v20 = vadd.f32 %v2808_v17, %v2519_v47  ;;  %v8598_v37 = vmul.f32 %v2786_v4, %v7245_v43  ;;  %v3154_v34 = vpop.f32.mrf.mxu1 }
 0x56b   :  { %11001 = vst [vmem:[#allocation53_spill] sm:$0xff] %v8593_v18  ;;  %v8601_v24 = vmul.f32 %v2789_v44, %v7245_v43  ;;  %v2774_v26 = vadd.f32 %v8488_v46, %v10936_v40  ;;  %v3135_v42 = vadd.f32 %v3134_v2, %v10895_v1  ;;  %v2879_v0 = vsub.f32 1.0, %v8583_v57  ;;  %v11003_v44 = vld [vmem:[#allocation18_spill] sm:$0xff] }
 0x56c   :  { %vm2830_vm11 = vcmp.ge.f32.partialorder %v8578_v61, 0.005  ;;  %v8609_v63 = vsel %vm2838_vm10, 1.0, %v10746_v9  ;;  %vm2841_vm12 = vcmp.ge.f32.partialorder %v8580_v38, 0.005  ;;  %v2810_v47 = vmul.f32 %v2794_v27, %v7245_v43  ;;  %v8621_v25 = vpop.f32.mrf.mxu0 }
 0x56d   :  { %11002 = vst [vmem:[#allocation20_spill] sm:$0xff] %v8609_v63  ;;  %v8615_v4 = vadd.f32 %v8500_v29, %v8392_v36  ;;  %v2900_v17 = vmul.f32 %v2884_v31, %v2820_v23  ;;  %v2887_v46 = vsub.f32 1.0, %v8593_v18  ;;  %v2813_v2 = vmul.f32 %v2797_v19, %v7245_v43  ;;  %11004 = vst [vmem:[#allocation6_spill] sm:$0xff] %v8621_v25  ;;  %v11006_v19 = vld [vmem:[#allocation45_spill] sm:$0xff] }
 0x56e   :  { %v2796_v54 = vsub.f32 %v2774_v26, %v8588_v56  ;;  %vm2840_vm13 = vcmp.ge.f32.partialorder %v8595_v20, 0.005  ;;  %v8625_v27 = vadd.f32 %v2811_v55, %v8524_v21  ;;  %v3150_v36 = vadd.f32 %v5576_v13, %v10902_v41  ;;  %v11007_v26 = vld [vmem:[#allocation65_spill] sm:$0xff]  ;;  %v11009_v21 = vld [vmem:[#allocation14_spill] sm:$0xff]  ;;  %v11010_v55 = vld [vmem:[#allocation51_spill] sm:$0xff]  ;;  %v8654_v53 = vpop.f32.mrf.mxu0 }
 0x56f   :  { %v3189_v57 = vsub.f32 %v3135_v42, %v2900_v17  ;;  %v2886_v29 = vsub.f32 1.0, %v8609_v63  ;;  %v8630_v23 = vsel %vm2841_vm12, 1.0, %v10746_v9  ;;  %v8632_v31 = vmul.f32 %v2879_v0, %v2815_v15  ;;  %v11012_v0 = vld [vmem:[#allocation15_spill] sm:$0xff]  ;;  %11013 = vst [vmem:[#allocation31_spill] sm:$0xff] %v8654_v53 }
 0x570   :  { %11005 = vst [vmem:[#allocation11_spill] sm:$0xff] %v8630_v23  ;;  %v8641_v18 = vsel %vm2830_vm11, 1.0, %v10746_v9  ;;  %v8645_v42 = vadd.f32 %v11010_v55, %v11009_v21  ;;  %v2903_v13 = vmul.f32 %v2887_v46, %v2823_v14  ;;  %v3145_v63 = vadd.f32 %v3144_v33, %v10905_v51  ;;  %v5582_v55 = vpop.f32.mrf.mxu1  ;;  %v11014_v14 = vld [vmem:[#allocation42_spill] sm:$0xff]  ;;  %v11015_v33 = vld [vmem:[#allocation21_spill] sm:$0xff] }
 0x571   :  { %11008 = vst [vmem:[#allocation10_spill] sm:$0xff] %v8641_v18  ;;  %v8649_v16 = vsel %vm2840_vm13, 1.0, %v10746_v9  ;;  %v2826_v15 = vadd.f32 %v2810_v47, %v2521_v45  ;;  %vm2833_vm14 = vcmp.ge.f32.partialorder %v8615_v4, 0.005  ;;  %v2889_v25 = vsub.f32 1.0, %v8630_v23 }
 0x572   :  { %11011 = vst [vmem:[#allocation29_spill] sm:$0xff] %v8649_v16  ;;  %vm2843_vm15 = vcmp.ge.f32.partialorder %v8625_v27, 0.005  ;;  %v11016_v46 = vpack.i.bf16 %v11014_v14, %v11015_v33  ;;  %v3205_v45 = vmul.f32 %v3189_v57, %v7245_v43  ;;  %v3192_v47 = vsub.f32 %v3150_v36, %v2903_v13  ;;  %v11019_v57 = vld [vmem:[#allocation30_spill] sm:$0xff] }
 0x573   :  { %v2878_v21 = vsub.f32 1.0, %v8641_v18  ;;  %v3160_v53 = vadd.f32 %v5579_v35, %v10913_v11  ;;  %v2888_v23 = vsub.f32 1.0, %v8649_v16  ;;  %vm2842_vm1 = vcmp.ge.f32.partialorder %v2826_v15, 0.005  ;;  %v11021_v36 = vld [vmem:[#allocation54_spill] sm:$0xff] }
 0x574   :  { %v8669_v10 = vsel %vm2833_vm14, 1.0, %v10746_v9  ;;  %v8672_v14 = vsel %vm2843_vm15, 1.0, %v10746_v9  ;;  %v2816_v35 = vadd.f32 %v8547_v58, %v8461_v12  ;;  %v3155_v33 = vadd.f32 %v3154_v34, %v10965_v48 }
 0x575   :  { %1770 = vadd.xlane.f32.xlu1 %v11003_v44  ;;  %v8636_v44 = vadd.f32 %v11007_v26, %v11006_v19  ;;  %v2812_v26 = vmul.f32 %v2796_v54, %v7245_v43  ;;  %v2829_v54 = vadd.f32 %v2813_v2, %v8559_v62  ;;  %11017 = vst [vmem:[#allocation27_spill] sm:$0xff] %v8669_v10  ;;  %11018 = vst [vmem:[#allocation18_spill] sm:$0xff] %v8672_v14  ;;  %v8681_v2 = vpop.f32.mrf.mxu0 }
 0x576   :  { %11022 = vst [vmem:[#allocation45_spill] sm:$0xff] %v8681_v2  ;;  %v3221_v16 = vadd.f32 %v3205_v45, %v2900_v17  ;;  %v8687_v18 = vsel %vm2842_vm1, 1.0, %v10746_v9  ;;  %v2891_v12 = vsub.f32 1.0, %v8672_v14  ;;  %vm2832_vm4 = vcmp.ge.f32.partialorder %v2816_v35, 0.005 }
 0x577   :  { %vm2845_vm2 = vcmp.ge.f32.partialorder %v2829_v54, 0.005  ;;  %11023 = vst [vmem:[#allocation65_spill] sm:$0xff] %v8687_v18  ;;  %v3184_v34 = vsub.f32 %v8636_v44, %v8632_v31  ;;  %v3535_v17 = vpop.f32.mrf.mxu0 }
 0x578   :  { %v8693_v58 = vsel %vm2845_vm2, 1.0, %v10746_v9  ;;  %vm3237_vm5 = vcmp.ge.f32.partialorder %v3221_v16, 0.005 }
 0x579   :  { %2165 = vadd.xlane.f32.xlu1 %v11012_v0  ;;  %v2902_v0 = vmul.f32 %v2886_v29, %v8557_v28  ;;  %v11020_v28 = vld [vmem:[#allocation16_spill] sm:$0xff]  ;;  %v2905_v29 = vmul.f32 %v2889_v25, %v8580_v38  ;;  %11024 = vst [vmem:[#allocation51_spill] sm:$0xff] %v8693_v58  ;;  %v8698_v25 = vmul.f32 %v2878_v21, %v8578_v61  ;;  %v2893_v44 = vsub.f32 1.0, %v8693_v58 }
 0x57a   :  { %5719 = vrot.lane.b32.xlu0 %v11016_v46, %s6004_s3  ;;  %v8677_v62 = vadd.f32 %v11021_v36, %v11020_v28  ;;  %v3208_v46 = vmul.f32 %v3192_v47, %v7245_v43  ;;  %v2904_v28 = vmul.f32 %v2888_v23, %v8595_v20  ;;  %v2890_v20 = vsub.f32 1.0, %v8687_v18 }
 0x57b   :  { %v3191_v7 = vsub.f32 %v3145_v63, %v2902_v0  ;;  %v3164_v63 = vpop.f32.mrf.mxu1  ;;  %v3194_v36 = vsub.f32 %v3160_v53, %v2905_v29  ;;  %v3170_v53 = vadd.f32 %v5582_v55, %v10923_v32  ;;  %v8714_v55 = vsel %vm2832_vm4, 1.0, %v10746_v9 }
 0x57c   :  { %v8704_v45 = vadd.f32 %v3208_v46, %v2903_v13  ;;  %v3165_v21 = vadd.f32 %v3164_v63, %v10925_v49  ;;  %11026 = vst [vmem:[#allocation42_spill] sm:$0xff] %v8714_v55  ;;  %v2906_v58 = vmul.f32 %v2890_v20, %v2826_v15 }
 0x57d   :  { %1776 = vadd.xlane.f32.xlu1 %v11019_v57  ;;  %v2828_v57 = vadd.f32 %v2812_v26, %v8588_v56  ;;  %v3207_v38 = vmul.f32 %v3191_v7, %v7245_v43  ;;  %v3193_v56 = vsub.f32 %v3155_v33, %v2904_v28  ;;  %v5585_v23 = vpop.f32.mrf.mxu1  ;;  %v2881_v26 = vsub.f32 1.0, %v8669_v10  ;;  %v11028_v10 = vld [vmem:[#allocation19_spill] sm:$0xff] }
 0x57e   :  { %v3210_v61 = vmul.f32 %v3194_v36, %v7245_v43  ;;  %v2907_v7 = vmul.f32 %v2891_v12, %v8625_v27  ;;  %v8718_v33 = vadd.f32 %v8568_v30, %v8505_v3  ;;  %v3180_v46 = vadd.f32 %v5585_v23, %v10932_v59  ;;  %v5608_v27 = vpop.f32.mrf.mxu0 }
 0x57f   :  { %vm2844_vm3 = vcmp.ge.f32.partialorder %v2828_v57, 0.005  ;;  %v8720_v13 = vadd.f32 %v3207_v38, %v2902_v0  ;;  %v8724_v36 = vsel %vm3237_vm5, 1.0, %v10746_v9  ;;  %v3209_v63 = vmul.f32 %v3193_v56, %v7245_v43  ;;  %v3174_v18 = vpop.f32.mrf.mxu1 }
 0x580   :  { %v8711_v47 = vsel %vm2844_vm3, 1.0, %v10746_v9  ;;  %11027 = vst [vmem:[#allocation21_spill] sm:$0xff] %v8724_v36  ;;  %v3196_v12 = vsub.f32 %v3170_v53, %v2907_v7  ;;  %v8728_v14 = vmul.f32 %v2881_v26, %v8615_v4  ;;  %v3115_v3 = vadd.f32 %v8383_v50, %v11028_v10  ;;  %v3545_v50 = vpop.f32.mrf.mxu0 }
 0x581   :  { %11025 = vst [vmem:[#allocation15_spill] sm:$0xff] %v8711_v47  ;;  %v2909_v30 = vmul.f32 %v2893_v44, %v2829_v54  ;;  %v2892_v0 = vsub.f32 1.0, %v8711_v47  ;;  %v2880_v38 = vsub.f32 1.0, %v8714_v55  ;;  %vm3240_vm6 = vcmp.ge.f32.partialorder %v8704_v45, 0.005 }
 0x582   :  { %v3226_v23 = vadd.f32 %v3210_v61, %v2905_v29  ;;  %v3195_v2 = vsub.f32 %v3165_v21, %v2906_v58  ;;  %v3285_v56 = vsub.f32 1.0, %v8724_v36  ;;  %vm3239_vm7 = vcmp.ge.f32.partialorder %v8720_v13, 0.005 }
 0x583   :  { %v3198_v15 = vsub.f32 %v3180_v46, %v2909_v30  ;;  %v3175_v4 = vadd.f32 %v3174_v18, %v10936_v40  ;;  %v3183_v53 = vsub.f32 %v8645_v42, %v8698_v25  ;;  %vm2835_vm8 = vcmp.ge.f32.partialorder %v8718_v33, 0.005 }
 0x584   :  { %v3212_v54 = vmul.f32 %v3196_v12, %v7245_v43  ;;  %v3225_v20 = vadd.f32 %v3209_v63, %v2904_v28  ;;  %v3200_v26 = vmul.f32 %v3184_v34, %v7245_v43  ;;  %v3186_v29 = vsub.f32 %v8677_v62, %v8728_v14 }
 0x585   :  { %v8746_v44 = vsel %vm3240_vm6, 1.0, %v10746_v9  ;;  %v2908_v61 = vmul.f32 %v2892_v0, %v2828_v57  ;;  %v8748_v21 = vmul.f32 %v2880_v38, %v2816_v35  ;;  %v8751_v18 = vsel %vm3239_vm7, 1.0, %v10746_v9  ;;  %v5611_v35 = vpop.f32.mrf.mxu0  ;;  %v11032_v0 = vld [vmem:[#allocation38_spill] sm:$0xff]  ;;  %v11033_v38 = vld [vmem:[#allocation23_spill] sm:$0xff] }
 0x586   :  { %11029 = vst [vmem:[#allocation30_spill] sm:$0xff] %v8746_v44  ;;  %11030 = vst [vmem:[#allocation54_spill] sm:$0xff] %v8751_v18  ;;  %vm3242_vm9 = vcmp.ge.f32.partialorder %v3226_v23, 0.005  ;;  %v3211_v42 = vmul.f32 %v3195_v2, %v7245_v43  ;;  %v8755_v46 = vsel %vm2835_vm8, 1.0, %v10746_v9  ;;  %v3301_v28 = vmul.f32 %v3285_v56, %v3221_v16 }
 0x587   :  { %11031 = vst [vmem:[#allocation19_spill] sm:$0xff] %v8755_v46  ;;  %v3214_v34 = vmul.f32 %v3198_v15, %v7245_v43  ;;  %v3197_v63 = vsub.f32 %v3175_v4, %v2908_v61  ;;  %v8759_v62 = vmul.f32 %v3183_v53, %v7245_v43  ;;  %v3288_v57 = vsub.f32 1.0, %v8746_v44 }
 0x588   :  { %vm3241_vm10 = vcmp.ge.f32.partialorder %v3225_v20, 0.005  ;;  %v3228_v12 = vadd.f32 %v3212_v54, %v2907_v7  ;;  %v11034_v36 = vpack.i.bf16 %v11032_v0, %v11033_v38  ;;  %v3185_v2 = vsub.f32 %v3115_v3, %v8748_v21 }
 0x589   :  { %v3536_v16 = vadd.f32 %v3535_v17, %v10895_v1  ;;  %v3287_v56 = vsub.f32 1.0, %v8751_v18  ;;  %v8770_v15 = vsel %vm3242_vm9, 1.0, %v10746_v9  ;;  %v3202_v4 = vmul.f32 %v3186_v29, %v7245_v43 }
 0x58a   :  { %11035 = vst [vmem:[#allocation38_spill] sm:$0xff] %v8770_v15  ;;  %v8774_v53 = vadd.f32 %v3200_v26, %v8632_v31  ;;  %v2883_v7 = vsub.f32 1.0, %v8755_v46  ;;  %v3227_v54 = vadd.f32 %v3211_v42, %v2906_v58  ;;  %v3213_v3 = vmul.f32 %v3197_v63, %v7245_v43  ;;  %v3555_v31 = vpop.f32.mrf.mxu0  ;;  %v11071_v46 = vld [vmem:[#allocation7_spill] sm:$0xff] }
 0x58b   :  { %v3590_v44 = vsub.f32 %v3536_v16, %v3301_v28  ;;  %v3230_v17 = vadd.f32 %v3214_v34, %v2909_v30  ;;  %v8783_v38 = vadd.f32 %v8601_v24, %v8541_v22  ;;  %v3304_v18 = vmul.f32 %v3288_v57, %v8704_v45 }
 0x58c   :  { %v3290_v29 = vsub.f32 1.0, %v8770_v15  ;;  %vm3244_vm11 = vcmp.ge.f32.partialorder %v3228_v12, 0.005  ;;  %v3201_v26 = vmul.f32 %v3185_v2, %v7245_v43  ;;  %v8790_v58 = vadd.f32 %v8417_v39, %v10876_v52 }
 0x58d   :  { %v8794_v42 = vadd.f32 %v8598_v37, %v8527_v8  ;;  %v3303_v30 = vmul.f32 %v3287_v56, %v8720_v13  ;;  %v3551_v22 = vadd.f32 %v5608_v27, %v10902_v41  ;;  %v3546_v24 = vadd.f32 %v3545_v50, %v10905_v51  ;;  %v5614_v13 = vpop.f32.mrf.mxu0  ;;  %v11038_v50 = vld [vmem:[#allocation40_spill] sm:$0xff] }
 0x58e   :  { %5729 = vrot.lane.b32.xlu1 %v11034_v36, %s6004_s3  ;;  %v8778_v36 = vsel %vm3241_vm10, 1.0, %v10746_v9  ;;  %vm3243_vm12 = vcmp.ge.f32.partialorder %v3227_v54, 0.005  ;;  %v3606_v34 = vmul.f32 %v3590_v44, %v7245_v43  ;;  %v8802_v63 = vsel %vm3244_vm11, 1.0, %v10746_v9 }
 0x58f   :  { %11036 = vst [vmem:[#allocation23_spill] sm:$0xff] %v8778_v36  ;;  %v3289_v45 = vsub.f32 1.0, %v8778_v36  ;;  %11037 = vst [vmem:[#allocation79_spill] sm:$0xff] %v8802_v63  ;;  %vm3246_vm13 = vcmp.ge.f32.partialorder %v3230_v17, 0.005  ;;  %v3229_v39 = vadd.f32 %v3213_v3, %v2908_v61  ;;  %v8805_v57 = vadd.f32 %v3202_v4, %v8728_v14 }
 0x590   :  { %vm2837_vm14 = vcmp.ge.f32.partialorder %v8783_v38, 0.005  ;;  %v3593_v8 = vsub.f32 %v3551_v22, %v3304_v18  ;;  %v3306_v37 = vmul.f32 %v3290_v29, %v3226_v23  ;;  %v8809_v27 = vmul.f32 %v2883_v7, %v8718_v33  ;;  %v11042_v7 = vld [vmem:[#allocation52_spill] sm:$0xff]  ;;  %v3565_v22 = vpop.f32.mrf.mxu0 }
 0x591   :  { %v8813_v2 = vadd.f32 %v11038_v50, %v10962_v60  ;;  %v3592_v44 = vsub.f32 %v3546_v24, %v3303_v30  ;;  %v8816_v16 = vsel %vm3243_vm12, 1.0, %v10746_v9  ;;  %v3561_v61 = vadd.f32 %v5611_v35, %v10913_v11 }
 0x592   :  { %11039 = vst [vmem:[#allocation40_spill] sm:$0xff] %v8816_v16  ;;  %v3305_v14 = vmul.f32 %v3289_v45, %v3225_v20  ;;  %v3292_v56 = vsub.f32 1.0, %v8802_v63  ;;  %v8821_v4 = vsel %vm3246_vm13, 1.0, %v10746_v9  ;;  %vm2834_vm15 = vcmp.ge.f32.partialorder %v8794_v42, 0.005 }
 0x593   :  { %11040 = vst [vmem:[#allocation80_spill] sm:$0xff] %v8821_v4  ;;  %v8825_v33 = vsel %vm2837_vm14, 1.0, %v10746_v9  ;;  %vm3245_vm1 = vcmp.ge.f32.partialorder %v3229_v39, 0.005  ;;  %v3622_v23 = vadd.f32 %v3606_v34, %v3301_v28  ;;  %v3609_v3 = vmul.f32 %v3593_v8, %v7245_v43 }
 0x594   :  { %11041 = vst [vmem:[#allocation81_spill] sm:$0xff] %v8825_v33  ;;  %v3595_v29 = vsub.f32 %v3561_v61, %v3306_v37  ;;  %v3556_v35 = vadd.f32 %v3555_v31, %v10965_v48  ;;  %v3291_v20 = vsub.f32 1.0, %v8816_v16  ;;  %v8832_v24 = vadd.f32 %v3201_v26, %v8748_v21 }
 0x595   :  { %v3608_v45 = vmul.f32 %v3592_v44, %v7245_v43  ;;  %v3294_v50 = vsub.f32 1.0, %v8821_v4  ;;  %vm3638_vm2 = vcmp.ge.f32.partialorder %v3622_v23, 0.005  ;;  %v3308_v28 = vmul.f32 %v3292_v56, %v3228_v12 }
 0x596   :  { %v3594_v63 = vsub.f32 %v3556_v35, %v3305_v14  ;;  %v8837_v34 = vsel %vm3245_vm1, 1.0, %v10746_v9  ;;  %v8840_v8 = vsel %vm3638_vm2, 1.0, %v10746_v9  ;;  %v3188_v31 = vsub.f32 %v8790_v58, %v8809_v27 }
 0x597   :  { %11043 = vst [vmem:[#allocation52_spill] sm:$0xff] %v8837_v34  ;;  %11044 = vst [vmem:[#allocation82_spill] sm:$0xff] %v8840_v8  ;;  %v8847_v21 = vsel %vm2834_vm15, 1.0, %v10746_v9  ;;  %v2885_v26 = vsub.f32 1.0, %v8825_v33  ;;  %v3686_v44 = vsub.f32 1.0, %v8840_v8  ;;  %v3611_v12 = vmul.f32 %v3595_v29, %v7245_v43  ;;  %v11046_v8 = vld [vmem:[#allocation13_spill] sm:$0xff] }
 0x598   :  { %11045 = vst [vmem:[#allocation83_spill] sm:$0xff] %v8847_v21  ;;  %v3571_v61 = vadd.f32 %v5614_v13, %v10923_v32  ;;  %v3307_v56 = vmul.f32 %v3291_v20, %v3227_v54  ;;  %v3625_v35 = vadd.f32 %v3609_v3, %v3304_v18  ;;  %v3310_v4 = vmul.f32 %v3294_v50, %v3230_v17 }
 0x599   :  { %2168 = vadd.xlane.f32.xlu0 %v11042_v7  ;;  %v5617_v7 = vpop.f32.mrf.mxu0  ;;  %v3293_v16 = vsub.f32 1.0, %v8837_v34  ;;  %v8854_v58 = vmul.f32 %v3686_v44, %v3622_v23  ;;  %v3624_v15 = vadd.f32 %v3608_v45, %v3303_v30  ;;  %v3610_v36 = vmul.f32 %v3594_v63, %v7245_v43 }
 0x59a   :  { %v3597_v47 = vsub.f32 %v3571_v61, %v3308_v28  ;;  %v3566_v33 = vadd.f32 %v3565_v22, %v10925_v49  ;;  %vm3641_vm3 = vcmp.ge.f32.partialorder %v3625_v35, 0.005  ;;  %v3140_v29 = vadd.f32 %v11046_v8, %v10967_v6 }
 0x59b   :  { %v3581_v13 = vadd.f32 %v5617_v7, %v10932_v59  ;;  %v8862_v54 = vsel %vm3641_vm3, 1.0, %v10746_v9  ;;  %vm3640_vm4 = vcmp.ge.f32.partialorder %v3624_v15, 0.005  ;;  %v2901_v18 = vmul.f32 %v2885_v26, %v8783_v38  ;;  %v3575_v23 = vpop.f32.mrf.mxu0 }
 0x59c   :  { %11047 = vst [vmem:[#allocation13_spill] sm:$0xff] %v8862_v54  ;;  %v3596_v17 = vsub.f32 %v3566_v33, %v3307_v56  ;;  %v3689_v30 = vsub.f32 1.0, %v8862_v54  ;;  %v8867_v63 = vsel %vm3640_vm4, 1.0, %v10746_v9  ;;  %v3309_v20 = vmul.f32 %v3293_v16, %v3229_v39 }
 0x59d   :  { %11048 = vst [vmem:[#allocation84_spill] sm:$0xff] %v8867_v63  ;;  %v3599_v3 = vsub.f32 %v3581_v13, %v3310_v4  ;;  %v3688_v22 = vsub.f32 1.0, %v8867_v63  ;;  %v3627_v45 = vadd.f32 %v3611_v12, %v3306_v37  ;;  %v2882_v50 = vsub.f32 1.0, %v8847_v21 }
 0x59e   :  { %v3613_v8 = vmul.f32 %v3597_v47, %v7245_v43  ;;  %v8872_v44 = vmul.f32 %v3689_v30, %v3625_v35  ;;  %v3626_v61 = vadd.f32 %v3610_v36, %v3305_v14  ;;  %v3190_v38 = vsub.f32 %v3140_v29, %v2901_v18  ;;  %v8883_v47 = vpop.f32.mrf.mxu1 }
 0x59f   :  { %v3576_v33 = vadd.f32 %v3575_v23, %v10936_v40  ;;  %v8875_v26 = vmul.f32 %v3688_v22, %v3624_v15  ;;  %vm3643_vm5 = vcmp.ge.f32.partialorder %v3627_v45, 0.005  ;;  %v3204_v7 = vmul.f32 %v3188_v31, %v7245_v43 }
 0x5a0   :  { %v3612_v39 = vmul.f32 %v3596_v17, %v7245_v43  ;;  %v8880_v16 = vsel %vm3643_vm5, 1.0, %v10746_v9  ;;  %vm3642_vm6 = vcmp.ge.f32.partialorder %v3626_v61, 0.005  ;;  %v3615_v37 = vmul.f32 %v3599_v3, %v7245_v43 }
 0x5a1   :  { %11049 = vst [vmem:[#allocation85_spill] sm:$0xff] %v8880_v16  ;;  %v3598_v12 = vsub.f32 %v3576_v33, %v3309_v20  ;;  %v3691_v36 = vsub.f32 1.0, %v8880_v16  ;;  %v8887_v14 = vsel %vm3642_vm6, 1.0, %v10746_v9  ;;  %vm3232_vm7 = vcmp.ge.f32.partialorder %v8774_v53, 0.005  ;;  %v8902_v33 = vpop.f32.mrf.mxu1 }
 0x5a2   :  { %11050 = vst [vmem:[#allocation86_spill] sm:$0xff] %v8887_v14  ;;  %vm3234_vm8 = vcmp.ge.f32.partialorder %v8805_v57, 0.005  ;;  %v3690_v15 = vsub.f32 1.0, %v8887_v14  ;;  %v3629_v31 = vadd.f32 %v3613_v8, %v3308_v28  ;;  %v2898_v35 = vmul.f32 %v2882_v50, %v8794_v42 }
 0x5a3   :  { %vm3233_vm9 = vcmp.ge.f32.partialorder %v8832_v24, 0.005  ;;  %v3206_v29 = vmul.f32 %v3190_v38, %v7245_v43  ;;  %v8895_v13 = vmul.f32 %v3691_v36, %v3627_v45  ;;  %v3220_v17 = vadd.f32 %v3204_v7, %v8809_v27 }
 0x5a4   :  { %v8898_v23 = vmul.f32 %v3690_v15, %v3626_v61  ;;  %vm3645_vm10 = vcmp.ge.f32.partialorder %v3629_v31, 0.005  ;;  %v3628_v30 = vadd.f32 %v3612_v39, %v3307_v56  ;;  %v3187_v3 = vsub.f32 %v8813_v2, %v2898_v35 }
 0x5a5   :  { %v3614_v22 = vmul.f32 %v3598_v12, %v7245_v43  ;;  %v8905_v42 = vsel %vm3645_vm10, 1.0, %v10746_v9  ;;  %v3631_v28 = vadd.f32 %v3615_v37, %v3310_v4  ;;  %v8910_v45 = vsel %vm3232_vm7, 1.0, %v10746_v9  ;;  %v11058_v37 = vld [vmem:[#allocation9_spill] sm:$0xff]  ;;  %v11059_v12 = vld [vmem:[#allocation47_spill] sm:$0xff] }
 0x5a6   :  { %11051 = vst [vmem:[#allocation87_spill] sm:$0xff] %v8905_v42  ;;  %11052 = vst [vmem:[#allocation88_spill] sm:$0xff] %v8910_v45  ;;  %v3215_v27 = vadd.f32 %v8759_v62, %v8698_v25  ;;  %v3693_v56 = vsub.f32 1.0, %v8905_v42  ;;  %vm3644_vm11 = vcmp.ge.f32.partialorder %v3628_v30, 0.005  ;;  %v8918_v2 = vsel %vm3233_vm9, 1.0, %v10746_v9 }
 0x5a7   :  { %11053 = vst [vmem:[#allocation89_spill] sm:$0xff] %v8918_v2  ;;  %v3222_v50 = vadd.f32 %v3206_v29, %v2901_v18  ;;  %v8921_v8 = vsel %vm3644_vm11, 1.0, %v10746_v9  ;;  %vm3647_vm12 = vcmp.ge.f32.partialorder %v3631_v28, 0.005  ;;  %v8926_v4 = vsel %vm3234_vm8, 1.0, %v10746_v9  ;;  %v8935_v18 = vpop.f32.mrf.mxu1  ;;  %v11062_v29 = vld [vmem:[#allocation33_spill] sm:$0xff] }
 0x5a8   :  { %11054 = vst [vmem:[#allocation90_spill] sm:$0xff] %v8921_v8  ;;  %11055 = vst [vmem:[#allocation91_spill] sm:$0xff] %v8926_v4  ;;  %v8928_v61 = vmul.f32 %v3693_v56, %v3629_v31  ;;  %v3692_v25 = vsub.f32 1.0, %v8921_v8  ;;  %v8932_v62 = vsel %vm3647_vm12, 1.0, %v10746_v9  ;;  %v3203_v38 = vmul.f32 %v3187_v3, %v7245_v43 }
 0x5a9   :  { %11057 = vst [vmem:[#allocation93_spill] sm:$0xff] %v8932_v62  ;;  %vm3236_vm13 = vcmp.ge.f32.partialorder %v3220_v17, 0.005  ;;  %v3695_v7 = vsub.f32 1.0, %v8932_v62  ;;  %v3630_v39 = vadd.f32 %v3614_v22, %v3309_v20  ;;  %v11060_v36 = vpack.i.bf16 %v11058_v37, %v11059_v12 }
 0x5aa   :  { %11056 = vst [vmem:[#allocation92_spill] sm:$0xff] %v8928_v61  ;;  %v3281_v15 = vsub.f32 1.0, %v8918_v2  ;;  %v8943_v31 = vmul.f32 %v3692_v25, %v3628_v30  ;;  %v2170_v56 = vsel %vm98_vm0, %v11062_v29, 0.0  ;;  %v3280_v3 = vsub.f32 1.0, %v8910_v45 }
 0x5ab   :  { %vm3238_vm14 = vcmp.ge.f32.partialorder %v3222_v50, 0.005  ;;  %v8948_v34 = vmul.f32 %v3695_v7, %v3631_v28  ;;  %vm3646_vm15 = vcmp.ge.f32.partialorder %v3630_v39, 0.005  ;;  %vm3231_vm1 = vcmp.ge.f32.partialorder %v3215_v27, 0.005 }
 0x5ac   :  { %11061 = vst [vmem:[#allocation9_spill] sm:$0xff] %v8943_v31  ;;  %v3282_v20 = vsub.f32 1.0, %v8926_v4  ;;  %v8952_v22 = vsel %vm3236_vm13, 1.0, %v10746_v9  ;;  %v3219_v12 = vadd.f32 %v3203_v38, %v2898_v35  ;;  %v8957_v30 = vsel %vm3646_vm15, 1.0, %v10746_v9 }
 0x5ad   :  { %11063 = vst [vmem:[#allocation47_spill] sm:$0xff] %v8948_v34  ;;  %11064 = vst [vmem:[#allocation33_spill] sm:$0xff] %v8952_v22  ;;  %v3297_v25 = vmul.f32 %v3281_v15, %v8832_v24  ;;  %v8961_v29 = vsel %vm3238_vm14, 1.0, %v10746_v9  ;;  %v3694_v28 = vsub.f32 1.0, %v8957_v30  ;;  %v3296_v7 = vmul.f32 %v3280_v3, %v8774_v53  ;;  %v11069_v24 = vld [vmem:[#allocation26_spill] sm:$0xff]  ;;  %v11070_v3 = vld [vmem:[#allocation16_spill] sm:$0xff] }
 0x5ae   :  { %11065 = vst [vmem:[#allocation94_spill] sm:$0xff] %v8957_v30  ;;  %11066 = vst [vmem:[#allocation95_spill] sm:$0xff] %v8961_v29  ;;  %v8966_v4 = vsel %vm3231_vm1, 1.0, %v10746_v9  ;;  %v3298_v35 = vmul.f32 %v3282_v20, %v8805_v57  ;;  %v3516_v38 = vadd.f32 %v8590_v5, %v11028_v10  ;;  %v3511_v15 = vadd.f32 %v11069_v24, %v11006_v19  ;;  %v11072_v57 = vld [vmem:[#allocation37_spill] sm:$0xff]  ;;  %v11075_v24 = vld [vmem:[#allocation6_spill] sm:$0xff] }
 0x5af   :  { %5724 = vrot.lane.b32.xlu0 %v11060_v36, %s6005_s23  ;;  %v8954_v36 = vpop.f32.mrf.mxu1  ;;  %11067 = vst [vmem:[#allocation96_spill] sm:$0xff] %v8966_v4  ;;  %v8972_v2 = vmul.f32 %v3694_v28, %v3630_v39  ;;  %vm3235_vm2 = vcmp.ge.f32.partialorder %v3219_v12, 0.005  ;;  %v3286_v45 = vsub.f32 1.0, %v8961_v29  ;;  %v3279_v53 = vsub.f32 1.0, %v8966_v4  ;;  %v11073_v20 = vld [vmem:[#allocation57_spill] sm:$0xff] }
 0x5b0   :  { %v3586_v55 = vsub.f32 %v3516_v38, %v3297_v25  ;;  %v5733_v34 = vpack.i.bf16 %v11073_v20, %v11072_v57  ;;  %v3585_v5 = vsub.f32 %v3511_v15, %v3296_v7  ;;  %v3531_v29 = vadd.f32 %v11075_v24, %v10876_v52  ;;  %v11078_v15 = vld [vmem:[#allocation48_spill] sm:$0xff] }
 0x5b1   :  { %11068 = vst [vmem:[#allocation97_spill] sm:$0xff] %v8972_v2  ;;  %v8977_v21 = vpop.f32.mrf.mxu1  ;;  %v8985_v2 = vsel %vm3235_vm2, 1.0, %v10746_v9  ;;  %v3302_v31 = vmul.f32 %v3286_v45, %v3222_v50  ;;  %v3295_v4 = vmul.f32 %v3279_v53, %v3215_v27 }
 0x5b2   :  { %2171 = vadd.xlane.f32.xlu1 %v2170_v56  ;;  %v3284_v56 = vsub.f32 1.0, %v8952_v22  ;;  %v3521_v22 = vadd.f32 %v11071_v46, %v11070_v3  ;;  %11074 = vst [vmem:[#allocation26_spill] sm:$0xff] %v8985_v2  ;;  %v3602_v30 = vmul.f32 %v3586_v55, %v7245_v43  ;;  %v3601_v46 = vmul.f32 %v3585_v5, %v7245_v43 }
 0x5b3   :  { %v8989_v62 = vpop.f32.mrf.mxu1  ;;  %v3283_v40 = vsub.f32 1.0, %v8985_v2 }
 0x5b4   :  { %v3300_v39 = vmul.f32 %v3284_v56, %v3220_v17  ;;  %v3587_v28 = vsub.f32 %v3521_v22, %v3298_v35  ;;  %v11076_v17 = vld [vmem:[#allocation45_spill] sm:$0xff]  ;;  %v11077_v56 = vld [vmem:[#allocation14_spill] sm:$0xff]  ;;  %v3618_v42 = vadd.f32 %v3602_v30, %v3297_v25  ;;  %v3617_v53 = vadd.f32 %v3601_v46, %v3296_v7 }
 0x5b5   :  { %v3541_v22 = vadd.f32 %v11076_v17, %v10967_v6  ;;  %v3506_v61 = vadd.f32 %v11078_v15, %v11077_v56  ;;  %v5637_v45 = vpop.f32.mrf.mxu1  ;;  %v3299_v55 = vmul.f32 %v3283_v40, %v3219_v12  ;;  %v3917_v46 = vadd.f32 %v8954_v36, %v11028_v10 }
 0x5b6   :  { %v3589_v38 = vsub.f32 %v3531_v29, %v3300_v39  ;;  %v3603_v59 = vmul.f32 %v3587_v28, %v7245_v43  ;;  %v11079_v29 = vld [vmem:[#allocation31_spill] sm:$0xff]  ;;  %vm3634_vm3 = vcmp.ge.f32.partialorder %v3618_v42, 0.005  ;;  %vm3633_vm4 = vcmp.ge.f32.partialorder %v3617_v53, 0.005 }
 0x5b7   :  { %v3591_v24 = vsub.f32 %v3541_v22, %v3302_v31  ;;  %v3584_v50 = vsub.f32 %v3506_v61, %v3295_v4  ;;  %v3526_v2 = vadd.f32 %v11079_v29, %v10962_v60  ;;  %v3936_v17 = vpop.f32.mrf.mxu1  ;;  %v9006_v30 = vsel %vm3634_vm3, 1.0, %v10746_v9 }
 0x5b8   :  { %v3605_v27 = vmul.f32 %v3589_v38, %v7245_v43  ;;  %v3619_v5 = vadd.f32 %v3603_v59, %v3298_v35  ;;  %v9009_v12 = vsel %vm3633_vm4, 1.0, %v10746_v9  ;;  %v3912_v10 = vadd.f32 %v8883_v47, %v11006_v19 }
 0x5b9   :  { %v3607_v8 = vmul.f32 %v3591_v24, %v7245_v43  ;;  %v3600_v15 = vmul.f32 %v3584_v50, %v7245_v43  ;;  %v3588_v28 = vsub.f32 %v3526_v2, %v3299_v55  ;;  %v5640_v59 = vpop.f32.mrf.mxu1  ;;  %v9018_v2 = vld [vmem:[%s10373_s10] ss:$0 sm:$0xff]  ;;  %v3922_v50 = vadd.f32 %v8935_v18, %v11070_v3 }
 0x5ba   :  { %v3621_v61 = vadd.f32 %v3605_v27, %v3300_v39  ;;  %vm3635_vm5 = vcmp.ge.f32.partialorder %v3619_v5, 0.005  ;;  %v1736_v35 = vmul.f32 %v9018_v2, %v11058_v37  ;;  %v2135_v37 = vmul.f32 %v9018_v2, %v11032_v0 }
 0x5bb   :  { %v3623_v40 = vadd.f32 %v3607_v8, %v3302_v31  ;;  %v3616_v25 = vadd.f32 %v3600_v15, %v3295_v4  ;;  %v3604_v7 = vmul.f32 %v3588_v28, %v7245_v43  ;;  %v3682_v8 = vsub.f32 1.0, %v9006_v30  ;;  %v9024_v4 = vpop.f32.mrf.mxu1 }
 0x5bc   :  { %vm3637_vm6 = vcmp.ge.f32.partialorder %v3621_v61, 0.005  ;;  %v3681_v31 = vsub.f32 1.0, %v9009_v12  ;;  %v1778_v24 = vsel %vm98_vm0, %v1736_v35, 0.0  ;;  %v3932_v18 = vadd.f32 %v8977_v21, %v10876_v52 }
 0x5bd   :  { %vm3639_vm7 = vcmp.ge.f32.partialorder %v3623_v40, 0.005  ;;  %vm3632_vm8 = vcmp.ge.f32.partialorder %v3616_v25, 0.005  ;;  %v9030_v38 = vsel %vm3637_vm6, 1.0, %v10746_v9  ;;  %v3620_v22 = vadd.f32 %v3604_v7, %v3299_v55  ;;  %v5643_v28 = vpop.f32.mrf.mxu1 }
 0x5be   :  { %11080 = vst [vmem:[#allocation16_spill] sm:$0xff] %v9030_v38  ;;  %v3698_v27 = vmul.f32 %v3682_v8, %v3618_v42  ;;  %v9038_v29 = vsel %vm3639_vm7, 1.0, %v10746_v9  ;;  %v3697_v15 = vmul.f32 %v3681_v31, %v3617_v53  ;;  %v9043_v36 = vsel %vm3632_vm8, 1.0, %v10746_v9 }
 0x5bf   :  { %11081 = vst [vmem:[#allocation7_spill] sm:$0xff] %v9038_v29  ;;  %v3685_v55 = vsub.f32 1.0, %v9030_v38  ;;  %v3937_v42 = vadd.f32 %v3936_v17, %v10895_v1  ;;  %vm3636_vm9 = vcmp.ge.f32.partialorder %v3620_v22, 0.005  ;;  %v3687_v3 = vsub.f32 1.0, %v9038_v29  ;;  %v3956_v31 = vpop.f32.mrf.mxu1 }
 0x5c0   :  { %v3987_v0 = vsub.f32 %v3917_v46, %v3698_v27  ;;  %v2173_v53 = vsel %vm98_vm0, %v2135_v37, 0.0  ;;  %v1738_v19 = vmul.f32 %v9018_v2, %v11073_v20  ;;  %v3986_v35 = vsub.f32 %v3912_v10, %v3697_v15 }
 0x5c1   :  { %v3701_v8 = vmul.f32 %v3685_v55, %v3621_v61  ;;  %v9057_v1 = vsel %vm3636_vm9, 1.0, %v10746_v9  ;;  %v3991_v21 = vsub.f32 %v3937_v42, %v8854_v58  ;;  %v3703_v46 = vmul.f32 %v3687_v3, %v3623_v40 }
 0x5c2   :  { %v4003_v52 = vmul.f32 %v3987_v0, %v7245_v43  ;;  %v1784_v20 = vsel %vm98_vm0, %v1738_v19, 0.0  ;;  %v3684_v37 = vsub.f32 1.0, %v9057_v1  ;;  %v3952_v40 = vadd.f32 %v5640_v59, %v10902_v41 }
 0x5c3   :  { %5734 = vrot.lane.b32.xlu1 %v5733_v34, %s6005_s23  ;;  %v9013_v34 = vsel %vm3635_vm5, 1.0, %v10746_v9  ;;  %v3990_v17 = vsub.f32 %v3932_v18, %v3701_v8  ;;  %v4007_v0 = vmul.f32 %v3991_v21, %v7245_v43  ;;  %v5646_v18 = vpop.f32.mrf.mxu1 }
 0x5c4   :  { %v3683_v39 = vsub.f32 1.0, %v9013_v34  ;;  %v4019_v55 = vadd.f32 %v4003_v52, %v3698_v27  ;;  %v3994_v41 = vsub.f32 %v3952_v40, %v8872_v44 }
 0x5c5   :  { %v4006_v42 = vmul.f32 %v3990_v17, %v7245_v43  ;;  %v4023_v27 = vadd.f32 %v4007_v0, %v8854_v58  ;;  %v3966_v59 = vpop.f32.mrf.mxu1  ;;  %v3947_v58 = vadd.f32 %v9024_v4, %v10905_v51  ;;  %v1737_v4 = vmul.f32 %v9018_v2, %v11072_v57  ;;  %v11156_v57 = vld [vmem:[#allocation53_spill] sm:$0xff] }
 0x5c6   :  { %v3699_v7 = vmul.f32 %v3683_v39, %v3619_v5  ;;  %v3942_v5 = vadd.f32 %v5637_v45, %v10967_v6  ;;  %v3680_v39 = vsub.f32 1.0, %v9043_v36  ;;  %v3957_v6 = vadd.f32 %v3956_v31, %v10965_v48  ;;  %v11134_v31 = vld [vmem:[#allocation19_spill] sm:$0xff] }
 0x5c7   :  { %v4002_v45 = vmul.f32 %v3986_v35, %v7245_v43  ;;  %v3962_v48 = vadd.f32 %v5643_v28, %v10913_v11  ;;  %vm4035_vm10 = vcmp.ge.f32.partialorder %v4019_v55, 0.005  ;;  %v4022_v35 = vadd.f32 %v4006_v42, %v3701_v8  ;;  %v11087_v55 = vld [vmem:[#allocation70_spill] sm:$0xff] }
 0x5c8   :  { %v3988_v47 = vsub.f32 %v3922_v50, %v3699_v7  ;;  %v3992_v50 = vsub.f32 %v3942_v5, %v3703_v46  ;;  %v3696_v10 = vmul.f32 %v3680_v39, %v3616_v25  ;;  %vm4039_vm13 = vcmp.ge.f32.partialorder %v4023_v27, 0.005 }
 0x5c9   :  { %v4018_v19 = vadd.f32 %v4002_v45, %v3697_v15  ;;  %v4010_v28 = vmul.f32 %v3994_v41, %v7245_v43  ;;  %vm4038_vm14 = vcmp.ge.f32.partialorder %v4022_v35, 0.005  ;;  %v3967_v45 = vadd.f32 %v3966_v59, %v10925_v49  ;;  %v11090_v49 = vld [vmem:[#allocation8_spill] sm:$0xff]  ;;  %v11096_v41 = vld [vmem:[#allocation9_spill] sm:$0xff] }
 0x5ca   :  { %v4004_v61 = vmul.f32 %v3988_v47, %v7245_v43  ;;  %v3700_v47 = vmul.f32 %v3684_v37, %v3620_v22  ;;  %v4008_v25 = vmul.f32 %v3992_v50, %v7245_v43  ;;  %v9081_v22 = vsel %vm4035_vm10, 1.0, %v10746_v9 }
 0x5cb   :  { %vm4034_vm12 = vcmp.ge.f32.partialorder %v4018_v19, 0.005  ;;  %11082 = vst [vmem:[#allocation37_spill] sm:$0xff] %v9081_v22  ;;  %v3997_v59 = vsub.f32 %v3967_v45, %v11096_v41  ;;  %v2915_v8 = vmul.f32 %v9018_v2, %v11134_v31  ;;  %v2919_v37 = vmul.f32 %v9018_v2, %v11156_v57 }
 0x5cc   :  { %v4020_v3 = vadd.f32 %v4004_v61, %v3699_v7  ;;  %v4024_v15 = vadd.f32 %v4008_v25, %v3703_v46  ;;  %v5649_v7 = vpop.f32.mrf.mxu1  ;;  %v3972_v61 = vadd.f32 %v5646_v18, %v10923_v32  ;;  %v9116_v42 = vsel %vm4034_vm12, 1.0, %v10746_v9 }
 0x5cd   :  { %v3982_v0 = vadd.f32 %v5649_v7, %v11087_v55  ;;  %11089 = vst [vmem:[#allocation14_spill] sm:$0xff] %v9116_v42  ;;  %v1781_v32 = vsel %vm98_vm0, %v1737_v4, 0.0  ;;  %v11100_v7 = vld [vmem:[#allocation24_spill] sm:$0xff]  ;;  %v4013_v45 = vmul.f32 %v3997_v59, %v7245_v43  ;;  %vm4756_vm12 = vcmask 15360  }
 0x5ce   :  { %1779 = vadd.xlane.f32.xlu0 %v1778_v24  ;;  %v3907_v24 = vadd.f32 %v8902_v33, %v11077_v56  ;;  %v3927_v33 = vadd.f32 %v8989_v62, %v10962_v60  ;;  %v3996_v60 = vsub.f32 %v3962_v48, %v8895_v13  ;;  %vm4036_vm11 = vcmp.ge.f32.partialorder %v4020_v3, 0.005 }
 0x5cf   :  { %v9091_v39 = vsel %vm4036_vm11, 1.0, %v10746_v9  ;;  %vm4040_vm15 = vcmp.ge.f32.partialorder %v4024_v15, 0.005  ;;  %v11133_v15 = vld [vmem:[#allocation27_spill] sm:$0xff]  ;;  %vm4739_vm11 = vcmask 7168  }
 0x5d0   :  { %v3985_v56 = vsub.f32 %v3907_v24, %v3696_v10  ;;  %v3989_v5 = vsub.f32 %v3927_v33, %v3700_v47  ;;  %11083 = vst [vmem:[#allocation57_spill] sm:$0xff] %v9091_v39  ;;  %v4012_v21 = vmul.f32 %v3996_v60, %v7245_v43  ;;  %v3993_v24 = vsub.f32 %v3947_v58, %v8875_v26  ;;  %v11092_v33 = vld [vmem:[#allocation92_spill] sm:$0xff] }
 0x5d1   :  { %v3998_v48 = vsub.f32 %v3972_v61, %v11092_v33 }
 0x5d2   :  { %2174 = vadd.xlane.f32.xlu0 %v2173_v53  ;;  %v3995_v53 = vsub.f32 %v3957_v6, %v8898_v23  ;;  %v4001_v11 = vmul.f32 %v3985_v56, %v7245_v43  ;;  %v4005_v52 = vmul.f32 %v3989_v5, %v7245_v43  ;;  %v4026_v6 = vadd.f32 %v4010_v28, %v8872_v44  ;;  %v11093_v56 = vld [vmem:[#allocation73_spill] sm:$0xff]  ;;  %v11099_v28 = vld [vmem:[#allocation39_spill] sm:$0xff] }
 0x5d3   :  { %v2526_v44 = vmul.f32 %v9018_v2, %v11090_v49  ;;  %v4009_v27 = vmul.f32 %v3993_v24, %v7245_v43  ;;  %v9151_v24 = vsel %vm4038_vm14, 1.0, %v10746_v9  ;;  %vm4790_vm14 = vcmask 31744  }
 0x5d4   :  { %v4011_v62 = vmul.f32 %v3995_v53, %v7245_v43  ;;  %v4017_v17 = vadd.f32 %v4001_v11, %v3696_v10  ;;  %v4028_v10 = vadd.f32 %v4012_v21, %v8895_v13  ;;  %v9125_v13 = vsel %vm4040_vm15, 1.0, %v10746_v9  ;;  %v11098_v11 = vld [vmem:[#allocation47_spill] sm:$0xff]  ;;  %11103 = vst [vmem:[#allocation8_spill] sm:$0xff] %v9151_v24 }
 0x5d5   :  { %11091 = vst [vmem:[#allocation48_spill] sm:$0xff] %v9125_v13  ;;  %vm4042_vm3 = vcmp.ge.f32.partialorder %v4026_v6, 0.005  ;;  %v4021_v5 = vadd.f32 %v4005_v52, %v3700_v47  ;;  %v2544_v58 = vsel %vm98_vm0, %v2526_v44, 0.0  ;;  %v5738_v21 = vpack.i.bf16 %v11100_v7, %v11099_v28  ;;  %v11101_v52 = vld [vmem:[#allocation97_spill] sm:$0xff] }
 0x5d6   :  { %1785 = vadd.xlane.f32.xlu0 %v1784_v20  ;;  %v4027_v51 = vadd.f32 %v4011_v62, %v8898_v23  ;;  %v9101_v20 = vsel %vm4039_vm13, 1.0, %v10746_v9  ;;  %v3976_v23 = vpop.f32.mrf.mxu1  ;;  %vm4033_vm1 = vcmp.ge.f32.partialorder %v4017_v17, 0.005  ;;  %vm4044_vm4 = vcmp.ge.f32.partialorder %v4028_v10, 0.005 }
 0x5d7   :  { %11084 = vst [vmem:[#allocation6_spill] sm:$0xff] %v9101_v20  ;;  %v9112_v40 = vsel %vm4033_vm1, 1.0, %v10746_v9  ;;  %v3977_v3 = vadd.f32 %v3976_v23, %v11093_v56  ;;  %v4000_v62 = vsub.f32 %v3982_v0, %v11098_v11  ;;  %vm4037_vm5 = vcmp.ge.f32.partialorder %v4021_v5, 0.005 }
 0x5d8   :  { %11088 = vst [vmem:[#allocation45_spill] sm:$0xff] %v9112_v40  ;;  %vm4043_vm2 = vcmp.ge.f32.partialorder %v4027_v51, 0.005  ;;  %v2136_v51 = vmul.f32 %v9018_v2, %v11099_v28  ;;  %v4014_v47 = vmul.f32 %v3998_v48, %v7245_v43  ;;  %v9147_v17 = vsel %vm4037_vm5, 1.0, %v10746_v9  ;;  %v11113_v28 = vld [vmem:[#allocation55_spill] sm:$0xff]  ;;  %v11164_v40 = vld [vmem:[#allocation29_spill] sm:$0xff] }
 0x5d9   :  { %v9134_v60 = vsel %vm4043_vm2, 1.0, %v10746_v9  ;;  %v3999_v4 = vsub.f32 %v3977_v3, %v11101_v52  ;;  %11102 = vst [vmem:[#allocation70_spill] sm:$0xff] %v9147_v17  ;;  %v9154_v61 = vsel %vm4044_vm4, 1.0, %v10746_v9  ;;  %v4025_v10 = vadd.f32 %v4009_v27, %v8875_v26 }
 0x5da   :  { %11097 = vst [vmem:[#allocation31_spill] sm:$0xff] %v9134_v60  ;;  %11104 = vst [vmem:[#allocation92_spill] sm:$0xff] %v9154_v61  ;;  %v4016_v55 = vmul.f32 %v4000_v62, %v7245_v43  ;;  %v2176_v35 = vsel %vm98_vm0, %v2136_v51, 0.0  ;;  %v9173_v26 = vsel %vm4042_vm3, 1.0, %v10746_v9  ;;  %v4030_v3 = vadd.f32 %v4014_v47, %v11092_v33  ;;  %v11114_v51 = vld [vmem:[#allocation50_spill] sm:$0xff]  ;;  %v11141_v61 = vld [vmem:[#allocation59_spill] sm:$0xff] }
 0x5db   :  { %vm4041_vm6 = vcmp.ge.f32.partialorder %v4025_v10, 0.005  ;;  %v4015_v48 = vmul.f32 %v3999_v4, %v7245_v43  ;;  %11107 = vst [vmem:[#allocation9_spill] sm:$0xff] %v9173_v26  ;;  %v11115_v47 = vld [vmem:[#allocation78_spill] sm:$0xff]  ;;  %v2137_v4 = vmul.f32 %v9018_v2, %v11100_v7  ;;  %v2913_v23 = vmul.f32 %v9018_v2, %v11133_v15  ;;  %v11143_v15 = vld [vmem:[#allocation68_spill] sm:$0xff] }
 0x5dc   :  { %v9169_v56 = vsel %vm4041_vm6, 1.0, %v10746_v9  ;;  %vm4046_vm7 = vcmp.ge.f32.partialorder %v4030_v3, 0.005  ;;  %v4032_v43 = vadd.f32 %v4016_v55, %v11098_v11  ;;  %v2528_v55 = vmul.f32 %v9018_v2, %v11113_v28  ;;  %v11116_v3 = vld [vmem:[#allocation74_spill] sm:$0xff] }
 0x5dd   :  { %11106 = vst [vmem:[#allocation73_spill] sm:$0xff] %v9169_v56  ;;  %v4031_v59 = vadd.f32 %v4015_v48, %v11101_v52  ;;  %v9183_v6 = vsel %vm4046_vm7, 1.0, %v10746_v9  ;;  %v5753_v52 = vpack.i.bf16 %v11115_v47, %v11114_v51  ;;  %v2138_v48 = vmul.f32 %v9018_v2, %v11114_v51 }
 0x5de   :  { %vm4048_vm9 = vcmp.ge.f32.partialorder %v4032_v43, 0.005  ;;  %11108 = vst [vmem:[#allocation47_spill] sm:$0xff] %v9183_v6  ;;  %v2139_v51 = vmul.f32 %v9018_v2, %v11115_v47  ;;  %v2935_v50 = vsel %vm98_vm0, %v2913_v23, 0.0  ;;  %vm4773_vm13 = vcmask 23552  }
 0x5df   :  { %vm4047_vm10 = vcmp.ge.f32.partialorder %v4031_v59, 0.005  ;;  %v9191_v62 = vsel %vm4048_vm9, 1.0, %v10746_v9  ;;  %v11117_v59 = vld [vmem:[#allocation43_spill] sm:$0xff]  ;;  %vm4807_vm15 = vcmask 39936   ;;  %vm4824_vm1 = vcmask 48128  }
 0x5e0   :  { %11110 = vst [vmem:[#allocation24_spill] sm:$0xff] %v9191_v62  ;;  %vm4545_vm2 = vcmask 523264   ;;  %vm4562_vm3 = vcmask 785408   ;;  %vm4841_vm4 = vcmask 56320   ;;  %vm4858_vm5 = vcmask 64512  }
 0x5e7   :  { %1782 = vadd.xlane.f32.xlu1 %v1781_v32  ;;  %v11105_v32 = vld [vmem:[#allocation32_spill] sm:$0xff] }
 0x5e8   :  { %v5743_v44 = vpack.i.bf16 %v11090_v49, %v11105_v32  ;;  %v4029_v49 = vadd.f32 %v4013_v45, %v11096_v41  ;;  %v9194_v41 = vsel %vm4047_vm10, 1.0, %v10746_v9  ;;  %v2179_v45 = vsel %vm98_vm0, %v2137_v4, 0.0 }
 0x5e9   :  { %11111 = vst [vmem:[#allocation97_spill] sm:$0xff] %v9194_v41  ;;  %v2185_v4 = vsel %vm98_vm0, %v2139_v51, 0.0  ;;  %v11123_v51 = vld [vmem:[#allocation42_spill] sm:$0xff] }
 0x5ea   :  { %vm4045_vm8 = vcmp.ge.f32.partialorder %v4029_v49, 0.005  ;;  %v2529_v49 = vmul.f32 %v9018_v2, %v11116_v3 }
 0x5eb   :  { %2545 = vadd.xlane.f32.xlu1 %v2544_v58  ;;  %v9186_v5 = vsel %vm4045_vm8, 1.0, %v10746_v9  ;;  %v11112_v58 = vld [vmem:[#allocation35_spill] sm:$0xff]  ;;  %v2525_v9 = vmul.f32 %v9018_v2, %v11105_v32  ;;  %v2182_v32 = vsel %vm98_vm0, %v2138_v48, 0.0  ;;  %v9242_v48 = vpop.xlane.xlu0 %1339 }
 0x5ec   :  { %5739 = vrot.lane.b32.xlu0 %v5738_v21, %s6004_s3  ;;  %11109 = vst [vmem:[#allocation39_spill] sm:$0xff] %v9186_v5  ;;  %v5748_v21 = vpack.i.bf16 %v11113_v28, %v11112_v58  ;;  %v2553_v43 = vsel %vm98_vm0, %v2529_v49, 0.0  ;;  %v5758_v28 = vpack.i.bf16 %v11117_v59, %v11116_v3  ;;  %v11121_v3 = vld [vmem:[#allocation10_spill] sm:$0xff] }
 0x5ed   :  { %v2541_v10 = vsel %vm98_vm0, %v2525_v9, 0.0  ;;  %v2910_v49 = vmul.f32 %v9018_v2, %v11121_v3 }
 0x5ef   :  { %2177 = vadd.xlane.f32.xlu1 %v2176_v35  ;;  %v2550_v35 = vsel %vm98_vm0, %v2528_v55, 0.0 }
 0x5f0   :  { %5744 = vrot.lane.b32.xlu0 %v5743_v44, %s6003_s4  ;;  %v2527_v44 = vmul.f32 %v9018_v2, %v11112_v58  ;;  %v11118_v58 = vld [vmem:[#allocation61_spill] sm:$0xff] }
 0x5f2   :  { %v2547_v7 = vsel %vm98_vm0, %v2527_v44, 0.0 }
 0x600   :  { %5749 = vrot.lane.b32.xlu1 %v5748_v21, %s6003_s4  ;;  %v11119_v21 = vld [vmem:[#allocation75_spill] sm:$0xff] }
 0x604   :  { %5754 = vrot.lane.b32.xlu1 %v5753_v52, %s6004_s3  ;;  %v5763_v52 = vpack.i.bf16 %v11119_v21, %v11118_v58 }
 0x60f   :  { %2180 = vadd.xlane.f32.xlu0 %v2179_v45  ;;  %v2530_v45 = vmul.f32 %v9018_v2, %v11117_v59  ;;  %v2926_v59 = vsel %vm98_vm0, %v2910_v49, 0.0  ;;  %v11128_v49 = vld [vmem:[#allocation66_spill] sm:$0xff] }
 0x610   :  { %v2535_v23 = vmul.f32 %v9018_v2, %v11128_v49 }
 0x611   :  { %v2556_v9 = vsel %vm98_vm0, %v2530_v45, 0.0 }
 0x613   :  { %2542 = vadd.xlane.f32.xlu0 %v2541_v10  ;;  %v2532_v10 = vmul.f32 %v9018_v2, %v11119_v21 }
 0x615   :  { %v2562_v55 = vsel %vm98_vm0, %v2532_v10, 0.0  ;;  %v11125_v10 = vld [vmem:[#allocation62_spill] sm:$0xff] }
 0x616   :  { %v2534_v11 = vmul.f32 %v9018_v2, %v11125_v10 }
 0x617   :  { %2551 = vadd.xlane.f32.xlu0 %v2550_v35  ;;  %v11120_v35 = vld [vmem:[#allocation28_spill] sm:$0xff] }
 0x618   :  { %v2911_v44 = vmul.f32 %v9018_v2, %v11120_v35  ;;  %v11147_v35 = vld [vmem:[#allocation12_spill] sm:$0xff] }
 0x61a   :  { %v2929_v47 = vsel %vm98_vm0, %v2911_v44, 0.0 }
 0x61b   :  { %2548 = vadd.xlane.f32.xlu0 %v2547_v7  ;;  %v2531_v7 = vmul.f32 %v9018_v2, %v11118_v58  ;;  %v2912_v58 = vmul.f32 %v9018_v2, %v11123_v51 }
 0x61d   :  { %v2932_v45 = vsel %vm98_vm0, %v2912_v58, 0.0 }
 0x628   :  { %2183 = vadd.xlane.f32.xlu1 %v2182_v32  ;;  %v2559_v32 = vsel %vm98_vm0, %v2531_v7, 0.0 }
 0x62c   :  { %2554 = vadd.xlane.f32.xlu1 %v2553_v43  ;;  %v9247_v43 = vpop.xlane.xlu0 %1348 }
 0x631   :  { %5759 = vrot.lane.b32.xlu0 %v5758_v28, %s6003_s4  ;;  %v11122_v28 = vld [vmem:[#allocation58_spill] sm:$0xff] }
 0x632   :  { %v2533_v21 = vmul.f32 %v9018_v2, %v11122_v28 }
 0x63d   :  { %5764 = vrot.lane.b32.xlu1 %v5763_v52, %s6003_s4  ;;  %v2565_v52 = vsel %vm98_vm0, %v2533_v21, 0.0 }
 0x650   :  { %2186 = vadd.xlane.f32.xlu0 %v2185_v4  ;;  %v9255_v4 = vpop.xlane.xlu0 %1345 }
 0x654   :  { %2557 = vadd.xlane.f32.xlu0 %v2556_v9  ;;  %v9258_v9 = vpop.xlane.xlu0 %1354 }
 0x655   :  { %11124 = vst [vmem:[#allocation32_spill] sm:$0xff] %v9258_v9 }
 0x658   :  { %2563 = vadd.xlane.f32.xlu0 %v2562_v55  ;;  %v5768_v55 = vpack.i.bf16 %v11125_v10, %v11122_v28  ;;  %v9263_v44 = vpop.xlane.xlu0 %1360 }
 0x659   :  { %11126 = vst [vmem:[#allocation35_spill] sm:$0xff] %v9263_v44 }
 0x65c   :  { %2930 = vadd.xlane.f32.xlu0 %v2929_v47  ;;  %v9265_v47 = vpop.xlane.xlu0 %1366 }
 0x660   :  { %v9267_v7 = vpop.xlane.xlu0 %1372 }
 0x661   :  { %2560 = vadd.xlane.f32.xlu1 %v2559_v32  ;;  %v9269_v32 = vpop.xlane.xlu1 %1342 }
 0x662   :  { %11127 = vst [vmem:[#allocation55_spill] sm:$0xff] %v9269_v32  ;;  %v11175_v32 = vld [vmem:[#allocation18_spill] sm:$0xff] }
 0x665   :  { %2927 = vadd.xlane.f32.xlu1 %v2926_v59  ;;  %v11129_v59 = vld [vmem:[#allocation36_spill] sm:$0xff]  ;;  %v9276_v58 = vpop.xlane.xlu1 %1351 }
 0x666   :  { %v5773_v21 = vpack.i.bf16 %v11129_v59, %v11128_v49  ;;  %v2536_v46 = vmul.f32 %v9018_v2, %v11129_v59 }
 0x668   :  { %v2574_v10 = vsel %vm98_vm0, %v2536_v46, 0.0  ;;  %v2571_v46 = vsel %vm98_vm0, %v2535_v23, 0.0  ;;  %v2916_v23 = vmul.f32 %v9018_v2, %v11141_v61 }
 0x669   :  { %2566 = vadd.xlane.f32.xlu1 %v2565_v52  ;;  %v9274_v52 = vpop.xlane.xlu0 %1378 }
 0x66d   :  { %2933 = vadd.xlane.f32.xlu1 %v2932_v45  ;;  %v9278_v28 = vpop.xlane.xlu0 %1384 }
 0x66e   :  { %11130 = vst [vmem:[#allocation50_spill] sm:$0xff] %v9278_v28 }
 0x671   :  { %v9280_v45 = vpop.xlane.xlu0 %1740 }
 0x672   :  { %5769 = vrot.lane.b32.xlu0 %v5768_v55, %s6003_s4  ;;  %v9282_v55 = vpop.xlane.xlu1 %1357 }
 0x673   :  { %11131 = vst [vmem:[#allocation78_spill] sm:$0xff] %v9282_v55 }
 0x675   :  { %v9284_v33 = vpop.permute.xlu0 %5674 }
 0x676   :  { %11132 = vst [vmem:[#allocation74_spill] sm:$0xff] %v9284_v33  ;;  %v9288_v27 = vpop.xlane.xlu1 %1363 }
 0x679   :  { %v9290_v0 = vpop.xlane.xlu0 %1749 }
 0x67a   :  { %v9295_v25 = vpop.xlane.xlu1 %1369 }
 0x67d   :  { %v9300_v18 = vpop.xlane.xlu0 %1746 }
 0x67e   :  { %5774 = vrot.lane.b32.xlu1 %v5773_v21, %s6003_s4  ;;  %v2568_v21 = vsel %vm98_vm0, %v2534_v11, 0.0  ;;  %v9305_v11 = vpop.xlane.xlu1 %1375 }
 0x681   :  { %v9307_v41 = vpop.permute.xlu0 %5679 }
 0x682   :  { %11135 = vst [vmem:[#allocation43_spill] sm:$0xff] %v9307_v41  ;;  %v9314_v62 = vpop.xlane.xlu1 %1381 }
 0x685   :  { %v9312_v59 = vpop.xlane.xlu0 %2141 }
 0x689   :  { %v9321_v6 = vpop.xlane.xlu0 %1755 }
 0x68a   :  { %11138 = vst [vmem:[#allocation75_spill] sm:$0xff] %v9321_v6 }
 0x68d   :  { %v9331_v56 = vpop.xlane.xlu0 %2150 }
 0x691   :  { %2569 = vadd.xlane.f32.xlu0 %v2568_v21  ;;  %v2941_v21 = vsel %vm98_vm0, %v2915_v8, 0.0 }
 0x695   :  { %2936 = vadd.xlane.f32.xlu0 %v2935_v50  ;;  %v11136_v50 = vld [vmem:[#allocation83_spill] sm:$0xff] }
 0x696   :  { %v2914_v5 = vmul.f32 %v9018_v2, %v11136_v50  ;;  %v11169_v50 = vld [vmem:[#allocation89_spill] sm:$0xff] }
 0x698   :  { %v2938_v8 = vsel %vm98_vm0, %v2914_v5, 0.0  ;;  %v9336_v5 = vpop.xlane.xlu0 %2147 }
 0x699   :  { %2575 = vadd.xlane.f32.xlu0 %v2574_v10  ;;  %v9319_v10 = vpop.permute.xlu1 %5669 }
 0x69a   :  { %11137 = vst [vmem:[#allocation61_spill] sm:$0xff] %v9319_v10 }
 0x69d   :  { %2942 = vadd.xlane.f32.xlu0 %v2941_v21  ;;  %v11139_v21 = vld [vmem:[#allocation22_spill] sm:$0xff]  ;;  %v9326_v49 = vpop.xlane.xlu1 %1743 }
 0x69e   :  { %v2537_v26 = vmul.f32 %v9018_v2, %v11139_v21  ;;  %11140 = vst [vmem:[#allocation58_spill] sm:$0xff] %v9326_v49  ;;  %v2923_v49 = vmul.f32 %v9018_v2, %v11175_v32  ;;  %v11178_v32 = vld [vmem:[#allocation65_spill] sm:$0xff] }
 0x6a0   :  { %v2577_v60 = vsel %vm98_vm0, %v2537_v26, 0.0  ;;  %v9343_v26 = vpop.xlane.xlu0 %1761 }
 0x6a1   :  { %v9334_v51 = vpop.xlane.xlu1 %2144  ;;  %11145 = vst [vmem:[#allocation36_spill] sm:$0xff] %v9343_v26 }
 0x6a2   :  { %2572 = vadd.xlane.f32.xlu1 %v2571_v46  ;;  %v2944_v46 = vsel %vm98_vm0, %v2916_v23, 0.0  ;;  %11142 = vst [vmem:[#allocation62_spill] sm:$0xff] %v9334_v51  ;;  %v11148_v23 = vld [vmem:[#allocation41_spill] sm:$0xff] }
 0x6a3   :  { %v5783_v20 = vpack.i.bf16 %v11148_v23, %v11147_v35  ;;  %v2540_v53 = vmul.f32 %v9018_v2, %v11148_v23 }
 0x6a5   :  { %v9341_v33 = vpop.permute.xlu1 %5684 }
 0x6a6   :  { %2939 = vadd.xlane.f32.xlu1 %v2938_v8  ;;  %v5778_v8 = vpack.i.bf16 %v11143_v15, %v11139_v21  ;;  %11144 = vst [vmem:[#allocation66_spill] sm:$0xff] %v9341_v33 }
 0x6a9   :  { %v9345_v3 = vpop.xlane.xlu1 %1752 }
 0x6aa   :  { %2578 = vadd.xlane.f32.xlu1 %v2577_v60  ;;  %v9347_v60 = vpop.permute.xlu0 %5699 }
 0x6ab   :  { %11146 = vst [vmem:[#allocation22_spill] sm:$0xff] %v9347_v60  ;;  %v2538_v60 = vmul.f32 %v9018_v2, %v11143_v15  ;;  %v2586_v15 = vsel %vm98_vm0, %v2540_v53, 0.0 }
 0x6ad   :  { %v9351_v13 = vpop.permute.xlu1 %5689 }
 0x6ae   :  { %2945 = vadd.xlane.f32.xlu1 %v2944_v46  ;;  %11149 = vst [vmem:[#allocation68_spill] sm:$0xff] %v9351_v13  ;;  %v9354_v46 = vpop.xlane.xlu0 %2156  ;;  %v2580_v13 = vsel %vm98_vm0, %v2538_v60, 0.0 }
 0x6af   :  { %11150 = vst [vmem:[#allocation12_spill] sm:$0xff] %v9354_v46  ;;  %v11194_v46 = vld [vmem:[#allocation51_spill] sm:$0xff] }
 0x6b1   :  { %v9356_v21 = vpop.permute.xlu1 %5694 }
 0x6b2   :  { %11151 = vst [vmem:[#allocation41_spill] sm:$0xff] %v9356_v21 }
 0x6b3   :  { %5779 = vrot.lane.b32.xlu0 %v5778_v8, %s6003_s4  ;;  %v9358_v8 = vpop.permute.xlu0 %5704 }
 0x6b4   :  { %11152 = vst [vmem:[#allocation98_spill] sm:$0xff] %v9358_v8 }
 0x6b5   :  { %v9360_v33 = vpop.xlane.xlu1 %1758 }
 0x6b6   :  { %11153 = vst [vmem:[#allocation99_spill] sm:$0xff] %v9360_v33  ;;  %v11190_v33 = vld [vmem:[#allocation21_spill] sm:$0xff] }
 0x6b7   :  { %v9362_v41 = vpop.xlane.xlu0 %1767 }
 0x6b9   :  { %v9366_v24 = vpop.xlane.xlu1 %2153 }
 0x6bb   :  { %v9368_v10 = vpop.xlane.xlu0 %2162 }
 0x6bc   :  { %11154 = vst [vmem:[#allocation100_spill] sm:$0xff] %v9368_v10 }
 0x6bd   :  { %v9373_v21 = vpop.xlane.xlu1 %1764 }
 0x6bf   :  { %5784 = vrot.lane.b32.xlu1 %v5783_v20, %s6003_s4  ;;  %v11155_v20 = vld [vmem:[#allocation81_spill] sm:$0xff]  ;;  %v9378_v19 = vpop.xlane.xlu0 %1773 }
 0x6c0   :  { %v2917_v17 = vmul.f32 %v9018_v2, %v11155_v20 }
 0x6c1   :  { %v9383_v60 = vpop.permute.xlu1 %5709 }
 0x6c2   :  { %v2947_v8 = vsel %vm98_vm0, %v2917_v17, 0.0  ;;  %11157 = vst [vmem:[#allocation101_spill] sm:$0xff] %v9383_v60  ;;  %v2539_v17 = vmul.f32 %v9018_v2, %v11147_v35 }
 0x6c3   :  { %v9385_v22 = vpop.permute.xlu0 %5719 }
 0x6c4   :  { %11158 = vst [vmem:[#allocation102_spill] sm:$0xff] %v9385_v22  ;;  %v2583_v53 = vsel %vm98_vm0, %v2539_v17, 0.0  ;;  %v11162_v22 = vld [vmem:[#allocation88_spill] sm:$0xff]  ;;  %v2920_v17 = vmul.f32 %v9018_v2, %v11164_v40 }
 0x6c5   :  { %v9388_v39 = vpop.xlane.xlu1 %2159 }
 0x6c6   :  { %11159 = vst [vmem:[#allocation103_spill] sm:$0xff] %v9388_v39 }
 0x6c7   :  { %v9392_v23 = vpop.xlane.xlu0 %2168 }
 0x6c9   :  { %v9397_v60 = vpop.permute.xlu1 %5714 }
 0x6ca   :  { %11161 = vst [vmem:[#allocation104_spill] sm:$0xff] %v9397_v60 }
 0x6cb   :  { %v9402_v42 = vpop.permute.xlu0 %5724 }
 0x6cc   :  { %11163 = vst [vmem:[#allocation88_spill] sm:$0xff] %v9402_v42 }
 0x6cf   :  { %v9409_v61 = vpop.xlane.xlu0 %1779 }
 0x6d2   :  { %2581 = vadd.xlane.f32.xlu0 %v2580_v13  ;;  %v2953_v13 = vsel %vm98_vm0, %v2919_v37, 0.0  ;;  %v3312_v37 = vmul.f32 %v9018_v2, %v11162_v22 }
 0x6d3   :  { %v9414_v60 = vpop.xlane.xlu0 %2174 }
 0x6d4   :  { %v3330_v35 = vsel %vm98_vm0, %v3312_v37, 0.0 }
 0x6d6   :  { %2948 = vadd.xlane.f32.xlu0 %v2947_v8  ;;  %v11160_v8 = vld [vmem:[#allocation20_spill] sm:$0xff] }
 0x6d7   :  { %v2918_v57 = vmul.f32 %v9018_v2, %v11160_v8  ;;  %v11165_v8 = vld [vmem:[#allocation96_spill] sm:$0xff]  ;;  %v9421_v37 = vpop.xlane.xlu0 %1785 }
 0x6d8   :  { %11166 = vst [vmem:[#allocation96_spill] sm:$0xff] %v9421_v37 }
 0x6da   :  { %2587 = vadd.xlane.f32.xlu0 %v2586_v15  ;;  %v2950_v15 = vsel %vm98_vm0, %v2918_v57, 0.0  ;;  %v2956_v57 = vsel %vm98_vm0, %v2920_v17, 0.0  ;;  %v11170_v17 = vld [vmem:[#allocation91_spill] sm:$0xff] }
 0x6db   :  { %v9425_v20 = vpop.permute.xlu0 %5739 }
 0x6dc   :  { %11168 = vst [vmem:[#allocation106_spill] sm:$0xff] %v9425_v20  ;;  %v11174_v20 = vld [vmem:[#allocation11_spill] sm:$0xff] }
 0x6dd   :  { %v2921_v16 = vmul.f32 %v9018_v2, %v11174_v20  ;;  %v3313_v20 = vmul.f32 %v9018_v2, %v11169_v50 }
 0x6de   :  { %2954 = vadd.xlane.f32.xlu0 %v2953_v13  ;;  %v9404_v13 = vpop.xlane.xlu1 %1770 }
 0x6df   :  { %v9432_v31 = vpop.permute.xlu0 %5744  ;;  %v2959_v63 = vsel %vm98_vm0, %v2921_v16, 0.0  ;;  %v2965_v16 = vsel %vm98_vm0, %v2923_v49, 0.0 }
 0x6e0   :  { %11171 = vst [vmem:[#allocation89_spill] sm:$0xff] %v9432_v31 }
 0x6e3   :  { %2584 = vadd.xlane.f32.xlu1 %v2583_v53  ;;  %v9411_v53 = vpop.xlane.xlu1 %2165  ;;  %v9436_v54 = vpop.xlane.xlu0 %2180 }
 0x6e7   :  { %2951 = vadd.xlane.f32.xlu1 %v2950_v15  ;;  %v5788_v15 = vpack.i.bf16 %v11162_v22, %v11165_v8  ;;  %v9418_v42 = vpop.xlane.xlu1 %1776  ;;  %v9440_v14 = vpop.xlane.xlu0 %2542 }
 0x6eb   :  { %3331 = vadd.xlane.f32.xlu1 %v3330_v35  ;;  %v9423_v40 = vpop.permute.xlu1 %5729  ;;  %v9449_v51 = vpop.xlane.xlu0 %2551 }
 0x6ec   :  { %11167 = vst [vmem:[#allocation105_spill] sm:$0xff] %v9423_v40 }
 0x6ef   :  { %2957 = vadd.xlane.f32.xlu1 %v2956_v57  ;;  %v9427_v35 = vpop.xlane.xlu1 %2171  ;;  %v5793_v57 = vpack.i.bf16 %v11170_v17, %v11169_v50 }
 0x6f3   :  { %v9434_v22 = vpop.permute.xlu1 %5734 }
 0x6f4   :  { %5789 = vrot.lane.b32.xlu0 %v5788_v15, %s6005_s23  ;;  %11172 = vst [vmem:[#allocation91_spill] sm:$0xff] %v9434_v22 }
 0x6f7   :  { %v9438_v15 = vpop.xlane.xlu1 %1782 }
 0x6fb   :  { %v9442_v40 = vpop.xlane.xlu1 %2545 }
 0x6fc   :  { %11173 = vst [vmem:[#allocation107_spill] sm:$0xff] %v9442_v40  ;;  %v9456_v40 = vpop.xlane.xlu0 %2548 }
 0x6ff   :  { %v9451_v22 = vpop.xlane.xlu1 %2177 }
 0x700   :  { %5794 = vrot.lane.b32.xlu1 %v5793_v57, %s6005_s23  ;;  %v3311_v57 = vmul.f32 %v9018_v2, %v11165_v8  ;;  %v3314_v8 = vmul.f32 %v9018_v2, %v11170_v17 }
 0x702   :  { %v3327_v31 = vsel %vm98_vm0, %v3311_v57, 0.0  ;;  %v9466_v57 = vpop.permute.xlu0 %5759 }
 0x703   :  { %v9458_v10 = vpop.permute.xlu1 %5749  ;;  %11177 = vst [vmem:[#allocation109_spill] sm:$0xff] %v9466_v57 }
 0x704   :  { %11176 = vst [vmem:[#allocation108_spill] sm:$0xff] %v9458_v10  ;;  %v3333_v10 = vsel %vm98_vm0, %v3313_v20, 0.0 }
 0x706   :  { %v9473_v49 = vpop.xlane.xlu0 %2186 }
 0x707   :  { %v9470_v44 = vpop.permute.xlu1 %5754  ;;  %11180 = vst [vmem:[#allocation111_spill] sm:$0xff] %v9473_v49 }
 0x708   :  { %11179 = vst [vmem:[#allocation110_spill] sm:$0xff] %v9470_v44 }
 0x70a   :  { %v9483_v44 = vpop.xlane.xlu0 %2557 }
 0x70b   :  { %v9478_v26 = vpop.xlane.xlu1 %2183 }
 0x70f   :  { %v9485_v20 = vpop.xlane.xlu1 %2554 }
 0x713   :  { %2960 = vadd.xlane.f32.xlu0 %v2959_v63  ;;  %v3336_v63 = vsel %vm98_vm0, %v3314_v8, 0.0 }
 0x717   :  { %3328 = vadd.xlane.f32.xlu0 %v3327_v31  ;;  %v2922_v31 = vmul.f32 %v9018_v2, %v11178_v32 }
 0x719   :  { %v2962_v17 = vsel %vm98_vm0, %v2922_v31, 0.0  ;;  %v9490_v31 = vpop.permute.xlu1 %5764 }
 0x71a   :  { %11185 = vst [vmem:[#allocation113_spill] sm:$0xff] %v9490_v31 }
 0x71b   :  { %2966 = vadd.xlane.f32.xlu0 %v2965_v16  ;;  %v11181_v16 = vld [vmem:[#allocation15_spill] sm:$0xff] }
 0x71c   :  { %v2924_v8 = vmul.f32 %v9018_v2, %v11181_v16 }
 0x71d   :  { %v9492_v16 = vpop.xlane.xlu1 %2560 }
 0x71e   :  { %v2968_v50 = vsel %vm98_vm0, %v2924_v8, 0.0  ;;  %11186 = vst [vmem:[#allocation114_spill] sm:$0xff] %v9492_v16  ;;  %v11188_v8 = vld [vmem:[#allocation33_spill] sm:$0xff] }
 0x71f   :  { %3337 = vadd.xlane.f32.xlu0 %v3336_v63  ;;  %v11182_v63 = vld [vmem:[#allocation26_spill] sm:$0xff]  ;;  %v3316_v6 = vmul.f32 %v9018_v2, %v11188_v8 }
 0x720   :  { %v3315_v57 = vmul.f32 %v9018_v2, %v11182_v63  ;;  %11183 = vst [vmem:[#allocation26_spill] sm:$0xff] %v9483_v44  ;;  %v5798_v39 = vpack.i.bf16 %v11188_v8, %v11182_v63 }
 0x722   :  { %v3339_v32 = vsel %vm98_vm0, %v3315_v57, 0.0  ;;  %v11191_v57 = vld [vmem:[#allocation95_spill] sm:$0xff] }
 0x723   :  { %3334 = vadd.xlane.f32.xlu0 %v3333_v10  ;;  %v9488_v10 = vpop.xlane.xlu0 %2563 }
 0x724   :  { %2963 = vadd.xlane.f32.xlu1 %v2962_v17  ;;  %11184 = vst [vmem:[#allocation112_spill] sm:$0xff] %v9488_v10 }
 0x727   :  { %v9494_v17 = vpop.xlane.xlu0 %2930 }
 0x728   :  { %2969 = vadd.xlane.f32.xlu1 %v2968_v50  ;;  %11187 = vst [vmem:[#allocation115_spill] sm:$0xff] %v9494_v17  ;;  %v9499_v50 = vpop.xlane.xlu1 %2927 }
 0x72b   :  { %v9501_v55 = vpop.permute.xlu0 %5769 }
 0x72c   :  { %3340 = vadd.xlane.f32.xlu1 %v3339_v32  ;;  %11189 = vst [vmem:[#allocation33_spill] sm:$0xff] %v9501_v55  ;;  %v5803_v32 = vpack.i.bf16 %v11191_v57, %v11190_v33  ;;  %v2567_v31 = vpop.xlane.xlu1 %2566  ;;  %v2925_v55 = vmul.f32 %v9018_v2, %v11194_v46  ;;  %v3317_v46 = vmul.f32 %v9018_v2, %v11190_v33 }
 0x72f   :  { %v2570_v10 = vpop.xlane.xlu0 %2569 }
 0x730   :  { %v9508_v16 = vpop.xlane.xlu1 %2933 }
 0x733   :  { %v9506_v38 = vpop.xlane.xlu0 %2936 }
 0x734   :  { %v9512_v63 = vpop.permute.xlu1 %5774 }
 0x735   :  { %11192 = vst [vmem:[#allocation21_spill] sm:$0xff] %v9512_v63  ;;  %v3342_v63 = vsel %vm98_vm0, %v3316_v6, 0.0  ;;  %v4749_v6 = vsel %vm4739_vm11, %v9265_v47, %v9362_v41 }
 0x736   :  { %v4766_v8 = vsel %vm4756_vm12, %v4749_v6, %v9392_v23  ;;  %v5808_v6 = vpack.i.bf16 %v9009_v12, %v9043_v36 }
 0x737   :  { %v9510_v17 = vpop.xlane.xlu0 %2575  ;;  %v4783_v33 = vsel %vm4773_vm13, %v4766_v8, %v2570_v10  ;;  %v5818_v10 = vpack.i.bf16 %v9013_v34, %v9006_v30 }
 0x739   :  { %5799 = vrot.lane.b32.xlu0 %v5798_v39, %s6005_s23  ;;  %v2573_v39 = vpop.xlane.xlu1 %2572 }
 0x73b   :  { %v9514_v44 = vpop.xlane.xlu0 %2942 }
 0x73c   :  { %11193 = vst [vmem:[#allocation95_spill] sm:$0xff] %v9514_v44 }
 0x73d   :  { %5804 = vrot.lane.b32.xlu1 %v5803_v32, %s6005_s23  ;;  %v9518_v29 = vpop.xlane.xlu1 %2939  ;;  %v2971_v32 = vsel %vm98_vm0, %v2925_v55, 0.0 }
 0x73f   :  { %v9520_v9 = vpop.permute.xlu0 %5779 }
 0x740   :  { %11195 = vst [vmem:[#allocation116_spill] sm:$0xff] %v9520_v9  ;;  %v3345_v9 = vsel %vm98_vm0, %v3317_v46, 0.0 }
 0x741   :  { %v9528_v28 = vpop.xlane.xlu1 %2578 }
 0x745   :  { %v9535_v55 = vpop.xlane.xlu1 %2945 }
 0x749   :  { %v9545_v46 = vpop.permute.xlu1 %5784 }
 0x758   :  { %2972 = vadd.xlane.f32.xlu0 %v2971_v32 }
 0x75b   :  { %v9525_v49 = vpop.xlane.xlu0 %2581 }
 0x75c   :  { %3343 = vadd.xlane.f32.xlu0 %v3342_v63 }
 0x75f   :  { %v9532_v44 = vpop.xlane.xlu0 %2948 }
 0x760   :  { %11196 = vst [vmem:[#allocation117_spill] sm:$0xff] %v9532_v44  ;;  %v4748_v44 = vsel %vm4739_vm11, %v9288_v27, %v9373_v21 }
 0x761   :  { %3346 = vadd.xlane.f32.xlu1 %v3345_v9  ;;  %v4765_v41 = vsel %vm4756_vm12, %v4748_v44, %v9411_v53  ;;  %v4750_v44 = vsel %vm4739_vm11, %v9295_v25, %v9404_v13 }
 0x762   :  { %v4782_v47 = vsel %vm4773_vm13, %v4765_v41, %v2567_v31  ;;  %v4767_v21 = vsel %vm4756_vm12, %v4750_v44, %v9427_v35  ;;  %v3712_v35 = vmul.f32 %v9018_v2, %v9043_v36  ;;  %v4751_v44 = vsel %vm4739_vm11, %v9267_v7, %v9378_v19 }
 0x763   :  { %v9537_v37 = vpop.xlane.xlu0 %2587  ;;  %v4784_v53 = vsel %vm4773_vm13, %v4767_v21, %v2573_v39  ;;  %v4768_v36 = vsel %vm4756_vm12, %v4751_v44, %v9414_v60 }
 0x764   :  { %v4785_v21 = vsel %vm4773_vm13, %v4768_v36, %v9510_v17 }
 0x767   :  { %v2955_v63 = vpop.xlane.xlu0 %2954 }
 0x768   :  { %v9548_v9 = vsel %vm4790_vm14, %v4783_v33, %v2955_v63  ;;  %v3318_v63 = vmul.f32 %v9018_v2, %v11191_v57  ;;  %v3714_v57 = vmul.f32 %v9018_v2, %v9006_v30 }
 0x76a   :  { %v3348_v41 = vsel %vm98_vm0, %v3318_v63, 0.0 }
 0x76c   :  { %v9550_v32 = vpop.xlane.xlu1 %2584 }
 0x770   :  { %v2952_v23 = vpop.xlane.xlu1 %2951 }
 0x771   :  { %v9563_v8 = vsel %vm4790_vm14, %v4782_v47, %v2952_v23  ;;  %v3713_v47 = vmul.f32 %v9018_v2, %v9009_v12  ;;  %v11197_v23 = vld [vmem:[#allocation54_spill] sm:$0xff]  ;;  %v3728_v12 = vsel %vm98_vm0, %v3712_v35, 0.0 }
 0x772   :  { %5819 = vrot.lane.b32.xlu1 %v5818_v10, %s6004_s3  ;;  %5809 = vrot.lane.b32.xlu0 %v5808_v6, %s6004_s3  ;;  %v3319_v25 = vmul.f32 %v9018_v2, %v11197_v23  ;;  %v9591_v10 = vpop.permute.xlu0 %5789  ;;  %v3734_v6 = vsel %vm98_vm0, %v3714_v57, 0.0 }
 0x773   :  { %v3731_v13 = vsel %vm98_vm0, %v3713_v47, 0.0 }
 0x774   :  { %v9567_v27 = vpop.xlane.xlu1 %3331  ;;  %v3351_v39 = vsel %vm98_vm0, %v3319_v25, 0.0 }
 0x778   :  { %v2958_v31 = vpop.xlane.xlu1 %2957 }
 0x779   :  { %v9576_v33 = vsel %vm4790_vm14, %v4784_v53, %v2958_v31  ;;  %v4740_v53 = vsel %vm4739_vm11, %v9242_v48, %v9280_v45  ;;  %v4753_v48 = vsel %vm4739_vm11, %v9274_v52, %v9409_v61 }
 0x77a   :  { %v4757_v63 = vsel %vm4756_vm12, %v4740_v53, %v9312_v59  ;;  %v4770_v45 = vsel %vm4756_vm12, %v4753_v48, %v9436_v54 }
 0x77b   :  { %v4774_v19 = vsel %vm4773_vm13, %v4757_v63, %v9440_v14  ;;  %v4787_v59 = vsel %vm4773_vm13, %v4770_v45, %v9525_v49  ;;  %v4743_v14 = vsel %vm4739_vm11, %v9247_v43, %v9290_v0  ;;  %v4742_v49 = vsel %vm4739_vm11, %v9255_v4, %v9300_v18  ;;  %v11198_v43 = vld [vmem:[#allocation23_spill] sm:$0xff] }
 0x77c   :  { %v4791_v7 = vsel %vm4790_vm14, %v4774_v19, %v9499_v50  ;;  %v4760_v47 = vsel %vm4756_vm12, %v4743_v14, %v9331_v56  ;;  %v9639_v25 = vpop.permute.xlu1 %5794  ;;  %v4759_v56 = vsel %vm4756_vm12, %v4742_v49, %v9336_v5  ;;  %v11201_v19 = vld [vmem:[#allocation96_spill] sm:$0xff] }
 0x77d   :  { %v4777_v61 = vsel %vm4773_vm13, %v4760_v47, %v9449_v51  ;;  %v4776_v51 = vsel %vm4773_vm13, %v4759_v56, %v9456_v40  ;;  %v11208_v49 = vld [vmem:[#allocation12_spill] sm:$0xff] }
 0x77e   :  { %v4794_v54 = vsel %vm4790_vm14, %v4777_v61, %v9506_v38  ;;  %v4752_v38 = vsel %vm4739_vm11, %v9305_v11, %v9418_v42  ;;  %v4793_v4 = vsel %vm4790_vm14, %v4776_v51, %v9508_v16  ;;  %v11200_v42 = vld [vmem:[#allocation30_spill] sm:$0xff] }
 0x77f   :  { %v4769_v18 = vsel %vm4756_vm12, %v4752_v38, %v9451_v22  ;;  %v5813_v11 = vpack.i.bf16 %v11200_v42, %v11197_v23  ;;  %v4754_v22 = vsel %vm4739_vm11, %v9314_v62, %v9438_v15  ;;  %v4744_v23 = vsel %vm4739_vm11, %v9276_v58, %v9345_v3  ;;  %v11206_v61 = vld [vmem:[#allocation82_spill] sm:$0xff] }
 0x780   :  { %v4786_v57 = vsel %vm4773_vm13, %v4769_v18, %v9528_v28  ;;  %v4771_v16 = vsel %vm4756_vm12, %v4754_v22, %v9478_v26  ;;  %v4761_v36 = vsel %vm4756_vm12, %v4744_v23, %v9366_v24  ;;  %v3321_v3 = vmul.f32 %v9018_v2, %v11198_v43  ;;  %v11214_v22 = vld [vmem:[#allocation103_spill] sm:$0xff] }
 0x781   :  { %v4788_v28 = vsel %vm4773_vm13, %v4771_v16, %v9550_v32  ;;  %v4778_v62 = vsel %vm4773_vm13, %v4761_v36, %v9485_v20  ;;  %v3715_v24 = vmul.f32 %v9018_v2, %v9013_v34  ;;  %v11203_v34 = vld [vmem:[#allocation111_spill] sm:$0xff] }
 0x782   :  { %v4795_v26 = vsel %vm4790_vm14, %v4778_v62, %v9518_v29  ;;  %v3357_v20 = vsel %vm98_vm0, %v3321_v3, 0.0  ;;  %v3716_v29 = vmul.f32 %v9018_v2, %v9057_v1 }
 0x784   :  { %v3740_v53 = vsel %vm98_vm0, %v3716_v29, 0.0 }
 0x791   :  { %3349 = vadd.xlane.f32.xlu0 %v3348_v41 }
 0x795   :  { %3732 = vadd.xlane.f32.xlu0 %v3731_v13  ;;  %v11199_v13 = vld [vmem:[#allocation38_spill] sm:$0xff] }
 0x796   :  { %3352 = vadd.xlane.f32.xlu1 %v3351_v39  ;;  %v5823_v35 = vpack.i.bf16 %v11199_v13, %v11198_v43 }
 0x799   :  { %3729 = vadd.xlane.f32.xlu0 %v3728_v12 }
 0x79a   :  { %3735 = vadd.xlane.f32.xlu1 %v3734_v6 }
 0x79c   :  { %v2961_v30 = vpop.xlane.xlu0 %2960 }
 0x79d   :  { %v9606_v31 = vsel %vm4790_vm14, %v4785_v21, %v2961_v30  ;;  %v3320_v21 = vmul.f32 %v9018_v2, %v11200_v42  ;;  %v3737_v30 = vsel %vm98_vm0, %v3715_v24, 0.0  ;;  %v11213_v42 = vld [vmem:[#allocation78_spill] sm:$0xff] }
 0x79f   :  { %v3354_v58 = vsel %vm98_vm0, %v3320_v21, 0.0 }
 0x7a0   :  { %v3329_v60 = vpop.xlane.xlu0 %3328 }
 0x7a1   :  { %v9615_v17 = vsel %vm4807_vm15, %v4791_v7, %v3329_v60  ;;  %v11202_v7 = vld [vmem:[#allocation50_spill] sm:$0xff] }
 0x7a2   :  { %v4755_v60 = vsel %vm4739_vm11, %v11202_v7, %v11201_v19  ;;  %v11219_v7 = vld [vmem:[#allocation100_spill] sm:$0xff] }
 0x7a3   :  { %v4772_v48 = vsel %vm4756_vm12, %v4755_v60, %v11203_v34  ;;  %v11220_v34 = vld [vmem:[#allocation112_spill] sm:$0xff] }
 0x7a4   :  { %v2967_v41 = vpop.xlane.xlu0 %2966  ;;  %v4789_v45 = vsel %vm4773_vm13, %v4772_v48, %v9537_v37  ;;  %v11210_v37 = vld [vmem:[#allocation95_spill] sm:$0xff] }
 0x7a5   :  { %v9628_v50 = vsel %vm4790_vm14, %v4787_v59, %v2967_v41  ;;  %v11204_v59 = vld [vmem:[#allocation75_spill] sm:$0xff]  ;;  %v11205_v41 = vld [vmem:[#allocation32_spill] sm:$0xff] }
 0x7a6   :  { %v4745_v14 = vsel %vm4739_vm11, %v11205_v41, %v11204_v59  ;;  %v11223_v41 = vld [vmem:[#allocation117_spill] sm:$0xff] }
 0x7a7   :  { %v4762_v43 = vsel %vm4756_vm12, %v4745_v14, %v11208_v49 }
 0x7a8   :  { %v3338_v52 = vpop.xlane.xlu0 %3337 }
 0x7a9   :  { %v9642_v0 = vsel %vm4807_vm15, %v4794_v54, %v3338_v52  ;;  %v11207_v54 = vld [vmem:[#allocation7_spill] sm:$0xff] }
 0x7aa   :  { %v5838_v52 = vpack.i.bf16 %v11207_v54, %v11206_v61 }
 0x7ab   :  { %5824 = vrot.lane.b32.xlu1 %v5823_v35, %s6005_s23  ;;  %v11209_v35 = vld [vmem:[#allocation26_spill] sm:$0xff] }
 0x7ac   :  { %v3335_v39 = vpop.xlane.xlu0 %3334  ;;  %v4779_v56 = vsel %vm4773_vm13, %v4762_v43, %v11209_v35 }
 0x7ad   :  { %v2964_v5 = vpop.xlane.xlu1 %2963  ;;  %v9661_v12 = vsel %vm4807_vm15, %v4793_v4, %v3335_v39  ;;  %v4796_v38 = vsel %vm4790_vm14, %v4779_v56, %v11210_v37  ;;  %v11211_v39 = vld [vmem:[#allocation16_spill] sm:$0xff] }
 0x7ae   :  { %v9666_v40 = vsel %vm4790_vm14, %v4786_v57, %v2964_v5  ;;  %v5828_v57 = vpack.i.bf16 %v11211_v39, %v9057_v1  ;;  %v11212_v5 = vld [vmem:[#allocation99_spill] sm:$0xff]  ;;  %v9750_v1 = vld [vmem:[%s10373_s10] ss:$0 sm:$0xff]  ;;  %v11225_v56 = vld [vmem:[#allocation52_spill] sm:$0xff] }
 0x7af   :  { %5814 = vrot.lane.b32.xlu0 %v5813_v11, %s6005_s23  ;;  %v4746_v11 = vsel %vm4739_vm11, %v11213_v42, %v11212_v5  ;;  %v3718_v24 = vmul.f32 %v9750_v1, %v11206_v61  ;;  %v11226_v37 = vld [vmem:[#allocation80_spill] sm:$0xff] }
 0x7b0   :  { %v9703_v63 = vpop.permute.xlu0 %5799  ;;  %v4763_v16 = vsel %vm4756_vm12, %v4746_v11, %v11214_v22 }
 0x7b1   :  { %v2970_v6 = vpop.xlane.xlu1 %2969  ;;  %v3746_v29 = vsel %vm98_vm0, %v3718_v24, 0.0  ;;  %v11230_v24 = vld [vmem:[#allocation84_spill] sm:$0xff] }
 0x7b2   :  { %v9680_v44 = vsel %vm4790_vm14, %v4788_v28, %v2970_v6  ;;  %v11215_v28 = vld [vmem:[#allocation114_spill] sm:$0xff] }
 0x7b3   :  { %v4780_v6 = vsel %vm4773_vm13, %v4763_v16, %v11215_v28  ;;  %v11229_v28 = vld [vmem:[#allocation79_spill] sm:$0xff] }
 0x7b4   :  { %v4797_v23 = vsel %vm4790_vm14, %v4780_v6, %v9535_v55  ;;  %v3717_v55 = vmul.f32 %v9750_v1, %v11211_v39 }
 0x7b5   :  { %v3341_v15 = vpop.xlane.xlu1 %3340 }
 0x7b6   :  { %v9689_v32 = vsel %vm4807_vm15, %v4795_v26, %v3341_v15  ;;  %v3322_v26 = vmul.f32 %v9750_v1, %v11199_v13  ;;  %v11216_v15 = vld [vmem:[#allocation40_spill] sm:$0xff] }
 0x7b7   :  { %v3323_v21 = vmul.f32 %v9750_v1, %v11216_v15  ;;  %v5833_v6 = vpack.i.bf16 %v11229_v28, %v11216_v15  ;;  %v3719_v15 = vmul.f32 %v9750_v1, %v11207_v54 }
 0x7b8   :  { %v3360_v3 = vsel %vm98_vm0, %v3322_v26, 0.0 }
 0x7b9   :  { %v9727_v18 = vpop.permute.xlu1 %5804 }
 0x7ce   :  { %3355 = vadd.xlane.f32.xlu0 %v3354_v58  ;;  %v3363_v58 = vsel %vm98_vm0, %v3323_v21, 0.0  ;;  %v3326_v21 = vmul.f32 %v9750_v1, %v11226_v37 }
 0x7cf   :  { %3358 = vadd.xlane.f32.xlu1 %v3357_v20  ;;  %v3743_v20 = vsel %vm98_vm0, %v3717_v55, 0.0  ;;  %v3325_v55 = vmul.f32 %v9750_v1, %v11225_v56 }
 0x7d2   :  { %3738 = vadd.xlane.f32.xlu0 %v3737_v30  ;;  %v11217_v30 = vld [vmem:[#allocation36_spill] sm:$0xff] }
 0x7d3   :  { %3741 = vadd.xlane.f32.xlu1 %v3740_v53  ;;  %v11218_v53 = vld [vmem:[#allocation35_spill] sm:$0xff] }
 0x7d4   :  { %v4747_v19 = vsel %vm4739_vm11, %v11218_v53, %v11217_v30 }
 0x7d5   :  { %v4764_v60 = vsel %vm4756_vm12, %v4747_v19, %v11219_v7 }
 0x7d6   :  { %v4781_v48 = vsel %vm4773_vm13, %v4764_v60, %v11220_v34 }
 0x7d7   :  { %v4798_v14 = vsel %vm4790_vm14, %v4781_v48, %v11223_v41  ;;  %v11231_v48 = vld [vmem:[#allocation85_spill] sm:$0xff] }
 0x7e1   :  { %v2973_v2 = vpop.xlane.xlu0 %2972 }
 0x7e2   :  { %v9716_v47 = vsel %vm4790_vm14, %v4789_v45, %v2973_v2  ;;  %v11221_v45 = vld [vmem:[#allocation58_spill] sm:$0xff]  ;;  %v11222_v2 = vld [vmem:[#allocation55_spill] sm:$0xff] }
 0x7e3   :  { %v4741_v59 = vsel %vm4739_vm11, %v11222_v2, %v11221_v45  ;;  %v11232_v45 = vld [vmem:[#allocation86_spill] sm:$0xff] }
 0x7e4   :  { %5839 = vrot.lane.b32.xlu1 %v5838_v52, %s6004_s3  ;;  %v11224_v52 = vld [vmem:[#allocation62_spill] sm:$0xff]  ;;  %v11233_v2 = vpack.i.bf16 %v11231_v48, %v11232_v45 }
 0x7e5   :  { %v3344_v51 = vpop.xlane.xlu0 %3343  ;;  %v4758_v49 = vsel %vm4756_vm12, %v4741_v59, %v11224_v52  ;;  %v11234_v59 = vld [vmem:[#allocation13_spill] sm:$0xff]  ;;  %v5802_v52 = vunpack.i.h.bf16 %v9703_v63 }
 0x7e6   :  { %v9730_v4 = vsel %vm4807_vm15, %v4796_v38, %v3344_v51  ;;  %v5843_v38 = vpack.i.bf16 %v11226_v37, %v11225_v56  ;;  %v11227_v51 = vld [vmem:[#allocation107_spill] sm:$0xff]  ;;  %v11235_v41 = vpack.i.bf16 %v11234_v59, %v11230_v24  ;;  %v5807_v56 = vunpack.i.h.bf16 %v9727_v18 }
 0x7e7   :  { %v4775_v39 = vsel %vm4773_vm13, %v4758_v49, %v11227_v51  ;;  %v5806_v37 = vunpack.i.l.bf16 %v9727_v18 }
 0x7e8   :  { %5829 = vrot.lane.b32.xlu0 %v5828_v57, %s6004_s3  ;;  %v11228_v57 = vld [vmem:[#allocation115_spill] sm:$0xff] }
 0x7e9   :  { %v9764_v13 = vpop.permute.xlu0 %5809  ;;  %v4792_v5 = vsel %vm4790_vm14, %v4775_v39, %v11228_v57 }
 0x7ea   :  { %v3347_v36 = vpop.xlane.xlu1 %3346  ;;  %v4809_v42 = vsel %vm4807_vm15, %v4792_v5, %v9567_v27  ;;  %v3324_v27 = vmul.f32 %v9750_v1, %v11229_v28  ;;  %v11236_v5 = vld [vmem:[#allocation19_spill] sm:$0xff]  ;;  %v11238_v28 = vld [vmem:[#allocation81_spill] sm:$0xff] }
 0x7eb   :  { %v9745_v62 = vsel %vm4807_vm15, %v4797_v23, %v3347_v36 }
 0x7ee   :  { %v9780_v43 = vpop.permute.xlu1 %5819 }
 0x807   :  { %3361 = vadd.xlane.f32.xlu0 %v3360_v3  ;;  %v3366_v3 = vsel %vm98_vm0, %v3324_v27, 0.0 }
 0x808   :  { %3364 = vadd.xlane.f32.xlu1 %v3363_v58  ;;  %v3369_v58 = vsel %vm98_vm0, %v3325_v55, 0.0  ;;  %v3722_v55 = vmul.f32 %v9750_v1, %v11232_v45 }
 0x80b   :  { %3744 = vadd.xlane.f32.xlu0 %v3743_v20  ;;  %v3720_v20 = vmul.f32 %v9750_v1, %v11230_v24 }
 0x80c   :  { %3747 = vadd.xlane.f32.xlu1 %v3746_v29 }
 0x80d   :  { %v3752_v29 = vsel %vm98_vm0, %v3720_v20, 0.0 }
 0x81a   :  { %v3350_v61 = vpop.xlane.xlu0 %3349 }
 0x81b   :  { %v9783_v35 = vsel %vm4807_vm15, %v4798_v14, %v3350_v61 }
 0x81d   :  { %5844 = vrot.lane.b32.xlu1 %v5843_v38, %s6005_s23 }
 0x81e   :  { %v3733_v11 = vpop.xlane.xlu0 %3732 }
 0x81f   :  { %v3353_v22 = vpop.xlane.xlu1 %3352  ;;  %v9795_v16 = vsel %vm4824_vm1, %v4809_v42, %v3733_v11  ;;  %v11237_v42 = vld [vmem:[#allocation83_spill] sm:$0xff] }
 0x820   :  { %v9801_v23 = vsel %vm4807_vm15, %v9563_v8, %v3353_v22  ;;  %v3372_v8 = vsel %vm98_vm0, %v3326_v21, 0.0 }
 0x821   :  { %5834 = vrot.lane.b32.xlu0 %v5833_v6, %s6005_s23  ;;  %v11239_v6 = vld [vmem:[#allocation59_spill] sm:$0xff] }
 0x822   :  { %v9823_v54 = vpop.xlane.xlu0 %3729 }
 0x823   :  { %v3736_v36 = vpop.xlane.xlu1 %3735 }
 0x824   :  { %v9806_v26 = vsel %vm4824_vm1, %v9661_v12, %v3736_v36  ;;  %v3749_v12 = vsel %vm98_vm0, %v3719_v15, 0.0  ;;  %v4585_v36 = vsel %vm98_vm0, %v11239_v6, %v5806_v37  ;;  %v3721_v15 = vmul.f32 %v9750_v1, %v11234_v59  ;;  %v11249_v6 = vld [vmem:[#allocation93_spill] sm:$0xff] }
 0x826   :  { %v9825_v30 = vpop.permute.xlu0 %5814 }
 0x827   :  { %v9827_v53 = vpop.permute.xlu1 %5824 }
 0x840   :  { %3367 = vadd.xlane.f32.xlu0 %v3366_v3 }
 0x841   :  { %3373 = vadd.xlane.f32.xlu1 %v3372_v8  ;;  %v3755_v8 = vsel %vm98_vm0, %v3721_v15, 0.0 }
 0x844   :  { %3750 = vadd.xlane.f32.xlu0 %v3749_v12  ;;  %v3758_v12 = vsel %vm98_vm0, %v3722_v55, 0.0 }
 0x845   :  { %3370 = vadd.xlane.f32.xlu1 %v3369_v58  ;;  %v11240_v58 = vld [vmem:[#allocation45_spill] sm:$0xff] }
 0x846   :  { %v4081_v24 = vmul.f32 %v9750_v1, %v11240_v58 }
 0x848   :  { %v4097_v20 = vsel %vm98_vm0, %v4081_v24, 0.0 }
 0x849   :  { %3753 = vadd.xlane.f32.xlu1 %v3752_v29  ;;  %v11241_v29 = vld [vmem:[#allocation14_spill] sm:$0xff] }
 0x857   :  { %v3356_v19 = vpop.xlane.xlu0 %3355 }
 0x858   :  { %v3359_v7 = vpop.xlane.xlu1 %3358  ;;  %v9831_v60 = vsel %vm4807_vm15, %v9548_v9, %v3356_v19  ;;  %v11242_v19 = vpack.i.bf16 %v11241_v29, %v11240_v58  ;;  %v5817_v58 = vunpack.i.h.bf16 %v9825_v30 }
 0x859   :  { %v9835_v34 = vsel %vm4807_vm15, %v9576_v33, %v3359_v7  ;;  %v5801_v33 = vunpack.i.l.bf16 %v9703_v63 }
 0x85a   :  { %5854 = vrot.lane.b32.xlu1 %v11233_v2, %s6004_s3  ;;  %5849 = vrot.lane.b32.xlu0 %v11235_v41, %s6004_s3  ;;  %v11243_v41 = vld [vmem:[#allocation57_spill] sm:$0xff] }
 0x85b   :  { %v3739_v14 = vpop.xlane.xlu0 %3738  ;;  %v4583_v11 = vsel %vm98_vm0, %v11237_v42, %v5801_v33  ;;  %v11247_v42 = vld [vmem:[#allocation87_spill] sm:$0xff] }
 0x85c   :  { %v3742_v61 = vpop.xlane.xlu1 %3741  ;;  %v9847_v9 = vsel %vm4824_vm1, %v9642_v0, %v3739_v14  ;;  %v4584_v0 = vsel %vm98_vm0, %v11236_v5, %v5802_v52  ;;  %v11244_v14 = vld [vmem:[#allocation37_spill] sm:$0xff] }
 0x85d   :  { %v9853_v49 = vsel %vm4824_vm1, %v9689_v32, %v3742_v61  ;;  %v4586_v32 = vsel %vm98_vm0, %v11238_v28, %v5807_v56  ;;  %v11245_v61 = vpack.i.bf16 %v11243_v41, %v11244_v14 }
 0x85f   :  { %v5830_v38 = vpop.permute.xlu0 %5829 }
 0x860   :  { %v5840_v51 = vpop.permute.xlu1 %5839  ;;  %v5832_v39 = vunpack.i.h.bf16 %v5830_v38  ;;  %v5831_v57 = vunpack.i.l.bf16 %v5830_v38  ;;  %v4082_v38 = vmul.f32 %v9750_v1, %v11241_v29 }
 0x861   :  { %v5842_v63 = vunpack.i.h.bf16 %v5840_v51  ;;  %v5841_v22 = vunpack.i.l.bf16 %v5840_v51 }
 0x862   :  { %v9866_v18 = vsel %vm4545_vm2, %v4584_v0, %v5832_v39  ;;  %v9869_v27 = vsel %vm4545_vm2, %v4583_v11, %v5831_v57  ;;  %v4100_v51 = vsel %vm98_vm0, %v4082_v38, 0.0  ;;  %v11246_v39 = vld [vmem:[#allocation90_spill] sm:$0xff] }
 0x863   :  { %v9872_v21 = vsel %vm4545_vm2, %v4585_v36, %v5841_v22  ;;  %v9875_v3 = vsel %vm4545_vm2, %v4586_v32, %v5842_v63  ;;  %v11248_v11 = vpack.i.bf16 %v11247_v42, %v11246_v39  ;;  %v11250_v36 = vld [vmem:[#allocation94_spill] sm:$0xff] }
 0x864   :  { %v11251_v15 = vpack.i.bf16 %v11249_v6, %v11250_v36 }
 0x879   :  { %3756 = vadd.xlane.f32.xlu0 %v3755_v8 }
 0x87e   :  { %3759 = vadd.xlane.f32.xlu1 %v3758_v12 }
 0x882   :  { %4098 = vadd.xlane.f32.xlu1 %v4097_v20 }
 0x88f   :  { %5859 = vrot.lane.b32.xlu0 %v11242_v19, %s6003_s4 }
 0x890   :  { %v3362_v7 = vpop.xlane.xlu0 %3361 }
 0x891   :  { %v3365_v2 = vpop.xlane.xlu1 %3364  ;;  %v9892_v59 = vsel %vm4807_vm15, %v9606_v31, %v3362_v7  ;;  %v3723_v31 = vmul.f32 %v9750_v1, %v11231_v48  ;;  %v11252_v7 = vld [vmem:[#allocation53_spill] sm:$0xff] }
 0x892   :  { %v9896_v45 = vsel %vm4807_vm15, %v9666_v40, %v3365_v2  ;;  %v4588_v2 = vsel %vm98_vm0, %v11252_v7, %v5817_v58  ;;  %v11257_v58 = vld [vmem:[#allocation61_spill] sm:$0xff] }
 0x893   :  { %5869 = vrot.lane.b32.xlu1 %v11245_v61, %s6003_s4  ;;  %v3761_v40 = vsel %vm98_vm0, %v3723_v31, 0.0 }
 0x894   :  { %v3745_v52 = vpop.xlane.xlu0 %3744 }
 0x895   :  { %v3748_v33 = vpop.xlane.xlu1 %3747  ;;  %v9904_v56 = vsel %vm4824_vm1, %v9730_v4, %v3745_v52  ;;  %v3724_v4 = vmul.f32 %v9750_v1, %v11246_v39  ;;  %v5826_v52 = vunpack.i.l.bf16 %v9827_v53 }
 0x896   :  { %v9908_v37 = vsel %vm4824_vm1, %v9745_v62, %v3748_v33  ;;  %v4083_v62 = vmul.f32 %v9750_v1, %v11244_v14  ;;  %v11253_v14 = vld [vmem:[#allocation20_spill] sm:$0xff] }
 0x897   :  { %v3764_v57 = vsel %vm98_vm0, %v3724_v4, 0.0  ;;  %v11255_v4 = vld [vmem:[#allocation29_spill] sm:$0xff] }
 0x898   :  { %v4103_v48 = vsel %vm98_vm0, %v4083_v62, 0.0  ;;  %v9922_v5 = vpop.permute.xlu0 %5834  ;;  %v3725_v62 = vmul.f32 %v9750_v1, %v11247_v42 }
 0x899   :  { %v9924_v0 = vpop.permute.xlu1 %5844 }
 0x8ae   :  { %3762 = vadd.xlane.f32.xlu0 %v3761_v40 }
 0x8b2   :  { %4101 = vadd.xlane.f32.xlu0 %v4100_v51  ;;  %v11254_v51 = vld [vmem:[#allocation11_spill] sm:$0xff] }
 0x8b7   :  { %3765 = vadd.xlane.f32.xlu1 %v3764_v57 }
 0x8bb   :  { %4104 = vadd.xlane.f32.xlu1 %v4103_v48  ;;  %v3767_v48 = vsel %vm98_vm0, %v3725_v62, 0.0  ;;  %v11265_v62 = vld [vmem:[#allocation6_spill] sm:$0xff] }
 0x8c8   :  { %5864 = vrot.lane.b32.xlu0 %v11248_v11, %s6004_s3  ;;  %v4084_v11 = vmul.f32 %v9750_v1, %v11243_v41  ;;  %v5671_v41 = vunpack.i.l.bf16 %v11257_v58 }
 0x8c9   :  { %v3368_v63 = vpop.xlane.xlu0 %3367 }
 0x8ca   :  { %v3374_v22 = vpop.xlane.xlu1 %3373  ;;  %v9932_v28 = vsel %vm4807_vm15, %v9628_v50, %v3368_v63  ;;  %v5816_v50 = vunpack.i.l.bf16 %v9825_v30  ;;  %v5827_v30 = vunpack.i.h.bf16 %v9827_v53  ;;  %v4106_v63 = vsel %vm98_vm0, %v4084_v11, 0.0 }
 0x8cb   :  { %v9936_v32 = vsel %vm4807_vm15, %v9716_v47, %v3374_v22  ;;  %v3726_v22 = vmul.f32 %v9750_v1, %v11250_v36 }
 0x8cc   :  { %5874 = vrot.lane.b32.xlu1 %v11251_v15, %s6004_s3  ;;  %v4587_v61 = vsel %vm98_vm0, %v11253_v14, %v5816_v50  ;;  %v4590_v39 = vsel %vm98_vm0, %v11254_v51, %v5827_v30  ;;  %v5672_v50 = vunpack.i.h.bf16 %v11257_v58  ;;  %v5791_v14 = vunpack.i.l.bf16 %v9591_v10  ;;  %v11261_v30 = vld [vmem:[#allocation89_spill] sm:$0xff] }
 0x8cd   :  { %v3751_v8 = vpop.xlane.xlu0 %3750  ;;  %v3770_v15 = vsel %vm98_vm0, %v3726_v22, 0.0 }
 0x8ce   :  { %v3371_v55 = vpop.xlane.xlu1 %3370  ;;  %v9944_v12 = vsel %vm4824_vm1, %v9783_v35, %v3751_v8  ;;  %v11256_v8 = vld [vmem:[#allocation70_spill] sm:$0xff] }
 0x8cf   :  { %v9950_v24 = vsel %vm4807_vm15, %v9680_v44, %v3371_v55  ;;  %v4085_v55 = vmul.f32 %v9750_v1, %v11256_v8 }
 0x8d1   :  { %v5850_v47 = vpop.permute.xlu0 %5849  ;;  %v4109_v42 = vsel %vm98_vm0, %v4085_v55, 0.0 }
 0x8d2   :  { %v3754_v20 = vpop.xlane.xlu1 %3753  ;;  %v5852_v29 = vunpack.i.h.bf16 %v5850_v47  ;;  %v5851_v19 = vunpack.i.l.bf16 %v5850_v47  ;;  %v11258_v47 = vld [vmem:[#allocation8_spill] sm:$0xff] }
 0x8d3   :  { %v9958_v35 = vsel %vm4824_vm1, %v9801_v23, %v3754_v20  ;;  %v4589_v23 = vsel %vm98_vm0, %v11255_v4, %v5826_v52  ;;  %v11259_v20 = vpack.i.bf16 %v11258_v47, %v11256_v8  ;;  %v5747_v52 = vunpack.i.h.bf16 %v11261_v30 }
 0x8d4   :  { %v9963_v44 = vsel %vm4545_vm2, %v4587_v61, %v5851_v19  ;;  %v9966_v33 = vsel %vm4545_vm2, %v4588_v2, %v5852_v29  ;;  %v11260_v29 = vld [vmem:[#allocation43_spill] sm:$0xff]  ;;  %v5792_v2 = vunpack.i.h.bf16 %v9591_v10  ;;  %v11264_v10 = vld [vmem:[#allocation48_spill] sm:$0xff] }
 0x8d5   :  { %v5682_v36 = vunpack.i.h.bf16 %v11260_v29  ;;  %v5681_v19 = vunpack.i.l.bf16 %v11260_v29 }
 0x8d6   :  { %v5855_v31 = vpop.permute.xlu1 %5854 }
 0x8d7   :  { %v5857_v40 = vunpack.i.h.bf16 %v5855_v31  ;;  %v5856_v38 = vunpack.i.l.bf16 %v5855_v31  ;;  %v5812_v31 = vunpack.i.h.bf16 %v9764_v13 }
 0x8d9   :  { %v9973_v57 = vsel %vm4545_vm2, %v4589_v23, %v5856_v38  ;;  %v9976_v53 = vsel %vm4545_vm2, %v4590_v39, %v5857_v40  ;;  %v5811_v40 = vunpack.i.l.bf16 %v9764_v13  ;;  %v11262_v38 = vld [vmem:[#allocation34_spill] sm:$0xff]  ;;  %v11263_v39 = vld [vmem:[#allocation17_spill] sm:$0xff]  ;;  %v5746_v23 = vunpack.i.l.bf16 %v11261_v30  ;;  %v11267_v13 = vld [vmem:[#allocation28_spill] sm:$0xff] }
 0x8da   :  { %v4530_v51 = vsel %vm98_vm0, %v11262_v38, %v5672_v50  ;;  %v4529_v4 = vsel %vm98_vm0, %v11263_v39, %v5671_v41  ;;  %v4580_v22 = vsel %vm98_vm0, %v11267_v13, %v5792_v2  ;;  %v11269_v30 = vld [vmem:[#allocation74_spill] sm:$0xff]  ;;  %v5797_v38 = vunpack.i.h.bf16 %v9639_v25 }
 0x8db   :  { %v4546_v11 = vsel %vm4545_vm2, %v4529_v4, %v5681_v19  ;;  %v4596_v41 = vsel %vm4545_vm2, %v4580_v22, %v5812_v31  ;;  %v5676_v31 = vunpack.i.l.bf16 %v11269_v30  ;;  %v11270_v4 = vld [vmem:[#allocation68_spill] sm:$0xff] }
 0x8dc   :  { %v11273_v22 = vld [vmem:[#allocation44_spill] sm:$0xff] }
 0x8e7   :  { %3768 = vadd.xlane.f32.xlu0 %v3767_v48  ;;  %v4547_v48 = vsel %vm4545_vm2, %v4530_v51, %v5682_v36  ;;  %v4563_v36 = vsel %vm4562_vm3, %v4546_v11, %v5746_v23  ;;  %v5796_v51 = vunpack.i.l.bf16 %v9639_v25  ;;  %v5692_v23 = vunpack.i.h.bf16 %v11270_v4 }
 0x8e8   :  { %v4564_v50 = vsel %vm4562_vm3, %v4547_v48, %v5747_v52  ;;  %v5677_v52 = vunpack.i.h.bf16 %v11269_v30  ;;  %v5822_v48 = vunpack.i.h.bf16 %v9780_v43  ;;  %v5821_v11 = vunpack.i.l.bf16 %v9780_v43  ;;  %v11275_v43 = vld [vmem:[#allocation42_spill] sm:$0xff] }
 0x8eb   :  { %4107 = vadd.xlane.f32.xlu0 %v4106_v63 }
 0x8f0   :  { %3771 = vadd.xlane.f32.xlu1 %v3770_v15  ;;  %v11268_v15 = vld [vmem:[#allocation10_spill] sm:$0xff] }
 0x8f1   :  { %v4579_v8 = vsel %vm98_vm0, %v11268_v15, %v5791_v14  ;;  %v4531_v15 = vsel %vm98_vm0, %v11273_v22, %v5676_v31  ;;  %v11278_v22 = vld [vmem:[#allocation31_spill] sm:$0xff] }
 0x8f4   :  { %4110 = vadd.xlane.f32.xlu1 %v4109_v42 }
 0x901   :  { %5879 = vrot.lane.b32.xlu0 %v11259_v20, %s6003_s4  ;;  %v4595_v20 = vsel %vm4545_vm2, %v4579_v8, %v5811_v40  ;;  %v4825_v40 = vsel %vm4824_vm1, %v9615_v17, %v9823_v54  ;;  %v11271_v17 = vld [vmem:[#allocation108_spill] sm:$0xff] }
 0x902   :  { %v3757_v7 = vpop.xlane.xlu0 %3756  ;;  %v5752_v54 = vunpack.i.h.bf16 %v11271_v17  ;;  %v5751_v25 = vunpack.i.l.bf16 %v11271_v17 }
 0x903   :  { %v10002_v61 = vsel %vm4824_vm1, %v9831_v60, %v3757_v7  ;;  %v11266_v60 = vpack.i.bf16 %v11264_v10, %v11265_v62 }
 0x905   :  { %5884 = vrot.lane.b32.xlu1 %v11266_v60, %s6003_s4  ;;  %v5691_v60 = vunpack.i.l.bf16 %v11270_v4  ;;  %v4088_v4 = vmul.f32 %v9750_v1, %v11264_v10 }
 0x906   :  { %v5860_v63 = vpop.permute.xlu0 %5859 }
 0x907   :  { %v3760_v55 = vpop.xlane.xlu1 %3759  ;;  %v5862_v42 = vunpack.i.h.bf16 %v5860_v63  ;;  %v5861_v58 = vunpack.i.l.bf16 %v5860_v63  ;;  %v11272_v63 = vld [vmem:[#allocation25_spill] sm:$0xff] }
 0x908   :  { %v10027_v29 = vsel %vm4824_vm1, %v9835_v34, %v3760_v55  ;;  %v4532_v13 = vsel %vm98_vm0, %v11272_v63, %v5677_v52  ;;  %v11274_v55 = vld [vmem:[#allocation27_spill] sm:$0xff]  ;;  %v5836_v63 = vunpack.i.l.bf16 %v9922_v5 }
 0x909   :  { %v4612_v19 = vsel %vm4562_vm3, %v4596_v41, %v5862_v42  ;;  %v4611_v7 = vsel %vm4562_vm3, %v4595_v20, %v5861_v58  ;;  %v4582_v42 = vsel %vm98_vm0, %v11274_v55, %v5797_v38  ;;  %v4581_v58 = vsel %vm98_vm0, %v11275_v43, %v5796_v51 }
 0x90a   :  { %v5219_v2 = vpack.c.bf16 %v4612_v19, %v4564_v50  ;;  %v5218_v14 = vpack.c.bf16 %v4611_v7, %v4563_v36  ;;  %v4548_v20 = vsel %vm4545_vm2, %v4531_v15, %v5691_v60  ;;  %v4549_v36 = vsel %vm4545_vm2, %v4532_v13, %v5692_v23  ;;  %v11277_v13 = vld [vmem:[#allocation92_spill] sm:$0xff] }
 0x90b   :  { %v4099_v34 = vpop.xlane.xlu1 %4098  ;;  %v4597_v19 = vsel %vm4545_vm2, %v4581_v58, %v5821_v11  ;;  %v4598_v7 = vsel %vm4545_vm2, %v4582_v42, %v5822_v48  ;;  %v4086_v51 = vmul.f32 %v9750_v1, %v11258_v47  ;;  %v4087_v23 = vmul.f32 %v9750_v1, %v11265_v62  ;;  %v11276_v48 = vld [vmem:[#allocation73_spill] sm:$0xff] }
 0x90c   :  { %4724 = vst [vmem:[#allocation3 + $0x8] sm:$0xff] %v5219_v2  ;;  %4723 = vst [vmem:[#allocation3] sm:$0xff] %v5218_v14  ;;  %v4842_v39 = vsel %vm4841_vm4, %v4825_v40, %v4099_v34  ;;  %v4565_v2 = vsel %vm4562_vm3, %v4548_v20, %v5751_v25  ;;  %v4566_v14 = vsel %vm4562_vm3, %v4549_v36, %v5752_v54  ;;  %v4118_v60 = vsel %vm98_vm0, %v4088_v4, 0.0 }
 0x90d   :  { %4859 = vst.msk [vmem:[%s10375_s12] sm:$0xff] %vm4858_vm5, %v4842_v39  ;;  %v3727_v34 = vmul.f32 %v9750_v1, %v11249_v6  ;;  %v4112_v39 = vsel %vm98_vm0, %v4086_v51, 0.0  ;;  %v4115_v6 = vsel %vm98_vm0, %v4087_v23, 0.0  ;;  %v4089_v11 = vmul.f32 %v9750_v1, %v11276_v48 }
 0x90e   :  { %v5837_v25 = vunpack.i.h.bf16 %v9922_v5  ;;  %v11279_v15 = vpack.i.bf16 %v11277_v13, %v11278_v22  ;;  %v11282_v5 = vld [vmem:[#allocation18_spill] sm:$0xff]  ;;  %v4092_v23 = vmul.f32 %v9750_v1, %v11277_v13 }
 0x90f   :  { %v5870_v8 = vpop.permute.xlu1 %5869  ;;  %v3773_v38 = vsel %vm98_vm0, %v3727_v34, 0.0  ;;  %v4121_v47 = vsel %vm98_vm0, %v4089_v11, 0.0 }
 0x910   :  { %v5872_v50 = vunpack.i.h.bf16 %v5870_v8  ;;  %v5871_v41 = vunpack.i.l.bf16 %v5870_v8  ;;  %v4592_v58 = vsel %vm98_vm0, %v11282_v5, %v5837_v25  ;;  %v11288_v25 = vld [vmem:[#allocation24_spill] sm:$0xff] }
 0x912   :  { %v4614_v30 = vsel %vm4562_vm3, %v4598_v7, %v5872_v50  ;;  %v4613_v52 = vsel %vm4562_vm3, %v4597_v19, %v5871_v41  ;;  %v11283_v50 = vld [vmem:[#allocation65_spill] sm:$0xff] }
 0x913   :  { %v5221_v31 = vpack.c.bf16 %v4614_v30, %v4566_v14  ;;  %v5220_v40 = vpack.c.bf16 %v4613_v52, %v4565_v2  ;;  %v4591_v41 = vsel %vm98_vm0, %v11283_v50, %v5836_v63  ;;  %v5847_v14 = vunpack.i.h.bf16 %v9924_v0  ;;  %v11291_v50 = vld [vmem:[#allocation22_spill] sm:$0xff] }
 0x914   :  { %v5846_v30 = vunpack.i.l.bf16 %v9924_v0  ;;  %v4096_v63 = vmul.f32 %v9750_v1, %v11288_v25 }
 0x915   :  { %4726 = vst [vmem:[#allocation3 + $0x18] sm:$0xff] %v5221_v31  ;;  %4725 = vst [vmem:[#allocation3 + $0x10] sm:$0xff] %v5220_v40  ;;  %v11284_v40 = vld [vmem:[#allocation51_spill] sm:$0xff] }
 0x916   :  { %v4594_v34 = vsel %vm98_vm0, %v11284_v40, %v5847_v14 }
 0x920   :  { %3774 = vadd.xlane.f32.xlu0 %v3773_v38  ;;  %v11285_v38 = vld [vmem:[#allocation15_spill] sm:$0xff] }
 0x921   :  { %v4593_v51 = vsel %vm98_vm0, %v11285_v38, %v5846_v30 }
 0x924   :  { %4113 = vadd.xlane.f32.xlu0 %v4112_v39 }
 0x928   :  { %4119 = vadd.xlane.f32.xlu0 %v4118_v60  ;;  %v4091_v60 = vmul.f32 %v9750_v1, %v11278_v22  ;;  %v11289_v22 = vld [vmem:[#allocation97_spill] sm:$0xff] }
 0x929   :  { %4116 = vadd.xlane.f32.xlu1 %v4115_v6  ;;  %v4130_v6 = vsel %vm98_vm0, %v4092_v23, 0.0 }
 0x92d   :  { %4122 = vadd.xlane.f32.xlu1 %v4121_v47  ;;  %v4127_v47 = vsel %vm98_vm0, %v4091_v60, 0.0 }
 0x937   :  { %v3763_v17 = vpop.xlane.xlu0 %3762 }
 0x938   :  { %v10083_v10 = vsel %vm4824_vm1, %v9892_v59, %v3763_v17  ;;  %v11280_v59 = vld [vmem:[#allocation9_spill] sm:$0xff]  ;;  %v11287_v17 = vld [vmem:[#allocation39_spill] sm:$0xff] }
 0x939   :  { %v11281_v8 = vpack.i.bf16 %v11280_v59, %v11276_v48  ;;  %v4090_v0 = vmul.f32 %v9750_v1, %v11280_v59  ;;  %v11286_v48 = vld [vmem:[#allocation47_spill] sm:$0xff]  ;;  %v4142_v59 = vsel %vm98_vm0, %v4096_v63, 0.0 }
 0x93a   :  { %v4094_v11 = vmul.f32 %v9750_v1, %v11286_v48 }
 0x93b   :  { %v4102_v54 = vpop.xlane.xlu0 %4101  ;;  %v4124_v4 = vsel %vm98_vm0, %v4090_v0, 0.0 }
 0x93c   :  { %v4843_v62 = vsel %vm4841_vm4, %v9795_v16, %v4102_v54  ;;  %v4093_v54 = vmul.f32 %v9750_v1, %v11287_v17 }
 0x93d   :  { %4860 = vst.msk [vmem:[%s10375_s12 + $0x8] sm:$0xff] %vm4858_vm5, %v4843_v62  ;;  %v4136_v62 = vsel %vm98_vm0, %v4094_v11, 0.0 }
 0x93e   :  { %5894 = vrot.lane.b32.xlu1 %v11279_v15, %s6003_s4  ;;  %5889 = vrot.lane.b32.xlu0 %v11281_v8, %s6003_s4  ;;  %v4133_v13 = vsel %vm98_vm0, %v4093_v54, 0.0  ;;  %v4095_v15 = vmul.f32 %v9750_v1, %v11289_v22 }
 0x93f   :  { %v5865_v16 = vpop.permute.xlu0 %5864 }
 0x940   :  { %v5867_v55 = vunpack.i.h.bf16 %v5865_v16  ;;  %v5866_v42 = vunpack.i.l.bf16 %v5865_v16  ;;  %v3766_v43 = vpop.xlane.xlu1 %3765  ;;  %v4139_v8 = vsel %vm98_vm0, %v4095_v15, 0.0 }
 0x941   :  { %v10107_v20 = vsel %vm4824_vm1, %v9896_v45, %v3766_v43  ;;  %v11290_v43 = vld [vmem:[#allocation66_spill] sm:$0xff] }
 0x942   :  { %v10110_v36 = vsel %vm4545_vm2, %v4592_v58, %v5867_v55  ;;  %v10113_v19 = vsel %vm4545_vm2, %v4591_v41, %v5866_v42  ;;  %v5687_v5 = vunpack.i.h.bf16 %v11290_v43  ;;  %v5686_v58 = vunpack.i.l.bf16 %v11290_v43 }
 0x943   :  { %v5702_v41 = vunpack.i.h.bf16 %v11291_v50 }
 0x944   :  { %v4105_v7 = vpop.xlane.xlu1 %4104 }
 0x945   :  { %v4844_v2 = vsel %vm4841_vm4, %v9806_v26, %v4105_v7  ;;  %v5701_v7 = vunpack.i.l.bf16 %v11291_v50 }
 0x946   :  { %4861 = vst.msk [vmem:[%s10375_s12 + $0x10] sm:$0xff] %vm4858_vm5, %v4844_v2  ;;  %v11292_v2 = vld [vmem:[#allocation109_spill] sm:$0xff] }
 0x947   :  { %v5761_v14 = vunpack.i.l.bf16 %v11292_v2 }
 0x948   :  { %v5875_v45 = vpop.permute.xlu1 %5874 }
 0x949   :  { %v5877_v52 = vunpack.i.h.bf16 %v5875_v45  ;;  %v5876_v31 = vunpack.i.l.bf16 %v5875_v45  ;;  %v11293_v45 = vld [vmem:[#allocation46_spill] sm:$0xff] }
 0x94b   :  { %v10128_v26 = vsel %vm4545_vm2, %v4594_v34, %v5877_v52  ;;  %v10131_v39 = vsel %vm4545_vm2, %v4593_v51, %v5876_v31  ;;  %v4534_v52 = vsel %vm98_vm0, %v11293_v45, %v5687_v5  ;;  %v11294_v31 = vld [vmem:[#allocation60_spill] sm:$0xff] }
 0x94c   :  { %v4551_v51 = vsel %vm4545_vm2, %v4534_v52, %v5702_v41 }
 0x95d   :  { %4125 = vadd.xlane.f32.xlu0 %v4124_v4 }
 0x961   :  { %4131 = vadd.xlane.f32.xlu0 %v4130_v6 }
 0x962   :  { %4128 = vadd.xlane.f32.xlu1 %v4127_v47  ;;  %v11295_v47 = vpack.i.bf16 %v11288_v25, %v11289_v22  ;;  %v11298_v25 = vpack.i.bf16 %v11286_v48, %v11287_v17  ;;  %v11299_v22 = vld [vmem:[#allocation113_spill] sm:$0xff] }
 0x965   :  { %4137 = vadd.xlane.f32.xlu0 %v4136_v62 }
 0x966   :  { %4134 = vadd.xlane.f32.xlu1 %v4133_v13 }
 0x969   :  { %4143 = vadd.xlane.f32.xlu0 %v4142_v59  ;;  %v11297_v59 = vld [vmem:[#allocation101_spill] sm:$0xff] }
 0x96a   :  { %4140 = vadd.xlane.f32.xlu1 %v4139_v8  ;;  %v5712_v8 = vunpack.i.h.bf16 %v11297_v59 }
 0x970   :  { %v3769_v16 = vpop.xlane.xlu0 %3768 }
 0x971   :  { %v10156_v55 = vsel %vm4824_vm1, %v9932_v28, %v3769_v16  ;;  %v5762_v28 = vunpack.i.h.bf16 %v11292_v2  ;;  %v5767_v16 = vunpack.i.h.bf16 %v11299_v22 }
 0x973   :  { %v4568_v23 = vsel %vm4562_vm3, %v4551_v51, %v5762_v28  ;;  %v11303_v51 = vld [vmem:[#allocation102_spill] sm:$0xff] }
 0x974   :  { %v4108_v42 = vpop.xlane.xlu0 %4107 }
 0x975   :  { %v4845_v1 = vsel %vm4841_vm4, %v9847_v9, %v4108_v42  ;;  %v4533_v9 = vsel %vm98_vm0, %v11294_v31, %v5686_v58  ;;  %v5766_v42 = vunpack.i.l.bf16 %v11299_v22  ;;  %v11301_v58 = vld [vmem:[#allocation63_spill] sm:$0xff]  ;;  %v11308_v22 = vld [vmem:[#allocation105_spill] sm:$0xff] }
 0x976   :  { %4862 = vst.msk [vmem:[%s10375_s12 + $0x18] sm:$0xff] %vm4858_vm5, %v4845_v1  ;;  %v4550_v0 = vsel %vm4545_vm2, %v4533_v9, %v5701_v7 }
 0x977   :  { %v4567_v60 = vsel %vm4562_vm3, %v4550_v0, %v5761_v14  ;;  %v5721_v0 = vunpack.i.l.bf16 %v11303_v51 }
 0x978   :  { %v5880_v30 = vpop.permute.xlu0 %5879 }
 0x979   :  { %v5882_v40 = vunpack.i.h.bf16 %v5880_v30  ;;  %v5881_v34 = vunpack.i.l.bf16 %v5880_v30  ;;  %v3772_v38 = vpop.xlane.xlu1 %3771 }
 0x97a   :  { %v10178_v4 = vsel %vm4824_vm1, %v9950_v24, %v3772_v38  ;;  %v11296_v24 = vld [vmem:[#allocation41_spill] sm:$0xff] }
 0x97b   :  { %v4616_v6 = vsel %vm4562_vm3, %v9866_v18, %v5882_v40  ;;  %v4615_v11 = vsel %vm4562_vm3, %v9869_v27, %v5881_v34  ;;  %5904 = vrot.lane.b32.xlu1 %v11295_v47, %s6003_s4  ;;  %v5697_v13 = vunpack.i.h.bf16 %v11296_v24  ;;  %v5696_v15 = vunpack.i.l.bf16 %v11296_v24  ;;  %v11307_v24 = vld [vmem:[#allocation104_spill] sm:$0xff] }
 0x97c   :  { %v5223_v54 = vpack.c.bf16 %v4616_v6, %v4568_v23  ;;  %v5222_v62 = vpack.c.bf16 %v4615_v11, %v4567_v60  ;;  %v5711_v27 = vunpack.i.l.bf16 %v11297_v59  ;;  %v5722_v60 = vunpack.i.h.bf16 %v11303_v51  ;;  %v11304_v6 = vld [vmem:[#allocation33_spill] sm:$0xff] }
 0x97d   :  { %v4111_v63 = vpop.xlane.xlu1 %4110  ;;  %v4535_v1 = vsel %vm98_vm0, %v11301_v58, %v5696_v15  ;;  %v5772_v11 = vunpack.i.h.bf16 %v11304_v6  ;;  %v5771_v47 = vunpack.i.l.bf16 %v11304_v6  ;;  %v11312_v6 = vld [vmem:[#allocation88_spill] sm:$0xff] }
 0x97e   :  { %4728 = vst [vmem:[#allocation3 + $0x28] sm:$0xff] %v5223_v54  ;;  %4727 = vst [vmem:[#allocation3 + $0x20] sm:$0xff] %v5222_v62  ;;  %v4846_v18 = vsel %vm4841_vm4, %v9853_v49, %v4111_v63  ;;  %v11300_v49 = vld [vmem:[#allocation49_spill] sm:$0xff]  ;;  %v4552_v7 = vsel %vm4545_vm2, %v4535_v1, %v5711_v27  ;;  %v11306_v62 = vld [vmem:[#allocation67_spill] sm:$0xff] }
 0x97f   :  { %4863 = vst.msk [vmem:[%s10375_s12 + $0x20] sm:$0xff] %vm4858_vm5, %v4846_v18  ;;  %5899 = vrot.lane.b32.xlu0 %v11298_v25, %s6003_s4  ;;  %v4536_v5 = vsel %vm98_vm0, %v11300_v49, %v5697_v13  ;;  %v4569_v48 = vsel %vm4562_vm3, %v4552_v7, %v5766_v42  ;;  %v5717_v13 = vunpack.i.h.bf16 %v11307_v24  ;;  %v5731_v42 = vunpack.i.l.bf16 %v11308_v22 }
 0x980   :  { %v4553_v2 = vsel %vm4545_vm2, %v4536_v5, %v5712_v8 }
 0x981   :  { %v5885_v43 = vpop.permute.xlu1 %5884  ;;  %v4570_v17 = vsel %vm4562_vm3, %v4553_v2, %v5767_v16  ;;  %v5732_v16 = vunpack.i.h.bf16 %v11308_v22  ;;  %v11317_v22 = vld [vmem:[#allocation71_spill] sm:$0xff] }
 0x982   :  { %v5887_v50 = vunpack.i.h.bf16 %v5885_v43  ;;  %v5886_v41 = vunpack.i.l.bf16 %v5885_v43 }
 0x984   :  { %v4618_v28 = vsel %vm4562_vm3, %v9875_v3, %v5887_v50  ;;  %v4617_v14 = vsel %vm4562_vm3, %v9872_v21, %v5886_v41  ;;  %v11302_v3 = vld [vmem:[#allocation98_spill] sm:$0xff]  ;;  %v11309_v50 = vld [vmem:[#allocation21_spill] sm:$0xff] }
 0x985   :  { %v5225_v30 = vpack.c.bf16 %v4618_v28, %v4570_v17  ;;  %v5224_v45 = vpack.c.bf16 %v4617_v14, %v4569_v48  ;;  %v5707_v21 = vunpack.i.h.bf16 %v11302_v3  ;;  %v5706_v34 = vunpack.i.l.bf16 %v11302_v3  ;;  %v11310_v17 = vld [vmem:[#allocation64_spill] sm:$0xff]  ;;  %v11311_v14 = vld [vmem:[#allocation69_spill] sm:$0xff] }
 0x986   :  { %v5777_v41 = vunpack.i.h.bf16 %v11309_v50  ;;  %v5776_v7 = vunpack.i.l.bf16 %v11309_v50  ;;  %v4540_v28 = vsel %vm98_vm0, %v11310_v17, %v5717_v13  ;;  %v11315_v13 = vld [vmem:[#allocation110_spill] sm:$0xff] }
 0x987   :  { %4730 = vst [vmem:[#allocation3 + $0x38] sm:$0xff] %v5225_v30  ;;  %4729 = vst [vmem:[#allocation3 + $0x30] sm:$0xff] %v5224_v45  ;;  %v4537_v63 = vsel %vm98_vm0, %v11306_v62, %v5706_v34 }
 0x988   :  { %v4554_v18 = vsel %vm4545_vm2, %v4537_v63, %v5721_v0 }
 0x989   :  { %v4571_v5 = vsel %vm4562_vm3, %v4554_v18, %v5771_v47  ;;  %v11313_v47 = vld [vmem:[#allocation91_spill] sm:$0xff] }
 0x9a9   :  { %v3775_v52 = vpop.xlane.xlu0 %3774 }
 0x9aa   :  { %v10220_v31 = vsel %vm4824_vm1, %v9936_v32, %v3775_v52  ;;  %v4557_v52 = vsel %vm4545_vm2, %v4540_v28, %v5732_v16 }
 0x9ad   :  { %v4114_v9 = vpop.xlane.xlu0 %4113 }
 0x9ae   :  { %v4847_v40 = vsel %vm4841_vm4, %v9904_v56, %v4114_v9  ;;  %v4574_v9 = vsel %vm4562_vm3, %v4557_v52, %v5777_v41 }
 0x9af   :  { %4864 = vst.msk [vmem:[%s10375_s12 + $0x28] sm:$0xff] %vm4858_vm5, %v4847_v40 }
 0x9b1   :  { %v4120_v38 = vpop.xlane.xlu0 %4119 }
 0x9b2   :  { %v4849_v32 = vsel %vm4841_vm4, %v9944_v12, %v4120_v38  ;;  %v4117_v23 = vpop.xlane.xlu1 %4116  ;;  %v11305_v12 = vld [vmem:[#allocation56_spill] sm:$0xff] }
 0x9b3   :  { %4866 = vst.msk [vmem:[%s10375_s12 + $0x38] sm:$0xff] %vm4858_vm5, %v4849_v32  ;;  %v4848_v56 = vsel %vm4841_vm4, %v9908_v37, %v4117_v23  ;;  %v4538_v54 = vsel %vm98_vm0, %v11305_v12, %v5707_v21  ;;  %v5716_v37 = vunpack.i.l.bf16 %v11307_v24  ;;  %v5736_v12 = vunpack.i.l.bf16 %v11313_v47 }
 0x9b4   :  { %4865 = vst.msk [vmem:[%s10375_s12 + $0x30] sm:$0xff] %vm4858_vm5, %v4848_v56  ;;  %v4555_v25 = vsel %vm4545_vm2, %v4538_v54, %v5722_v60  ;;  %v11314_v54 = vld [vmem:[#allocation106_spill] sm:$0xff] }
 0x9b5   :  { %v5890_v15 = vpop.permute.xlu0 %5889  ;;  %v4572_v49 = vsel %vm4562_vm3, %v4555_v25, %v5772_v11  ;;  %v5726_v11 = vunpack.i.l.bf16 %v11312_v6  ;;  %v5742_v62 = vunpack.i.h.bf16 %v11314_v54  ;;  %v5741_v63 = vunpack.i.l.bf16 %v11314_v54 }
 0x9b6   :  { %v5892_v59 = vunpack.i.h.bf16 %v5890_v15  ;;  %v5891_v8 = vunpack.i.l.bf16 %v5890_v15  ;;  %v4123_v27 = vpop.xlane.xlu1 %4122  ;;  %v5756_v15 = vunpack.i.l.bf16 %v11315_v13 }
 0x9b7   :  { %v4850_v43 = vsel %vm4841_vm4, %v9958_v35, %v4123_v27 }
 0x9b8   :  { %v4620_v58 = vsel %vm4562_vm3, %v9966_v33, %v5892_v59  ;;  %v4619_v1 = vsel %vm4562_vm3, %v9963_v44, %v5891_v8  ;;  %4867 = vst.msk [vmem:[%s10375_s12 + $0x40] sm:$0xff] %vm4858_vm5, %v4850_v43  ;;  %v4539_v33 = vsel %vm98_vm0, %v11311_v14, %v5716_v37  ;;  %v11316_v59 = vld [vmem:[#allocation116_spill] sm:$0xff] }
 0x9b9   :  { %v5227_v35 = vpack.c.bf16 %v4620_v58, %v4572_v49  ;;  %v5226_v2 = vpack.c.bf16 %v4619_v1, %v4571_v5  ;;  %v4556_v45 = vsel %vm4545_vm2, %v4539_v33, %v5731_v42  ;;  %v5782_v8 = vunpack.i.h.bf16 %v11316_v59  ;;  %v11318_v42 = vld [vmem:[#allocation72_spill] sm:$0xff]  ;;  %v11320_v1 = vld [vmem:[#allocation77_spill] sm:$0xff] }
 0x9ba   :  { %v5895_v48 = vpop.permute.xlu1 %5894  ;;  %v4573_v40 = vsel %vm4562_vm3, %v4556_v45, %v5776_v7  ;;  %v5781_v27 = vunpack.i.l.bf16 %v11316_v59  ;;  %v4541_v43 = vsel %vm98_vm0, %v11318_v42, %v5726_v11  ;;  %v5786_v49 = vunpack.i.l.bf16 %v9545_v46  ;;  %v11319_v5 = vld [vmem:[#allocation76_spill] sm:$0xff] }
 0x9bb   :  { %4732 = vst [vmem:[#allocation3 + $0x48] sm:$0xff] %v5227_v35  ;;  %4731 = vst [vmem:[#allocation3 + $0x40] sm:$0xff] %v5226_v2  ;;  %v5897_v44 = vunpack.i.h.bf16 %v5895_v48  ;;  %v5896_v30 = vunpack.i.l.bf16 %v5895_v48  ;;  %v4558_v50 = vsel %vm4545_vm2, %v4541_v43, %v5741_v63 }
 0x9bc   :  { %v4575_v14 = vsel %vm4562_vm3, %v4558_v50, %v5781_v27 }
 0x9bd   :  { %v4622_v3 = vsel %vm4562_vm3, %v9976_v53, %v5897_v44  ;;  %v4621_v21 = vsel %vm4562_vm3, %v9973_v57, %v5896_v30 }
 0x9be   :  { %v5229_v34 = vpack.c.bf16 %v4622_v3, %v4574_v9  ;;  %v5228_v38 = vpack.c.bf16 %v4621_v21, %v4573_v40 }
 0x9c0   :  { %4734 = vst [vmem:[#allocation3 + $0x58] sm:$0xff] %v5229_v34  ;;  %4733 = vst [vmem:[#allocation3 + $0x50] sm:$0xff] %v5228_v38 }
 0x9e6   :  { %v4126_v51 = vpop.xlane.xlu0 %4125 }
 0x9e7   :  { %v4851_v0 = vsel %vm4841_vm4, %v10002_v61, %v4126_v51 }
 0x9e8   :  { %4868 = vst.msk [vmem:[%s10375_s12 + $0x48] sm:$0xff] %vm4858_vm5, %v4851_v0 }
 0x9ea   :  { %v4132_v32 = vpop.xlane.xlu0 %4131 }
 0x9eb   :  { %v4853_v53 = vsel %vm4841_vm4, %v10083_v10, %v4132_v32  ;;  %v4129_v23 = vpop.xlane.xlu1 %4128 }
 0x9ec   :  { %4870 = vst.msk [vmem:[%s10375_s12 + $0x58] sm:$0xff] %vm4858_vm5, %v4853_v53  ;;  %v4852_v57 = vsel %vm4841_vm4, %v10027_v29, %v4129_v23  ;;  %v5727_v29 = vunpack.i.h.bf16 %v11312_v6 }
 0x9ed   :  { %4869 = vst.msk [vmem:[%s10375_s12 + $0x50] sm:$0xff] %vm4858_vm5, %v4852_v57 }
 0x9ee   :  { %v4138_v61 = vpop.xlane.xlu0 %4137  ;;  %v4542_v16 = vsel %vm98_vm0, %v11317_v22, %v5727_v29 }
 0x9ef   :  { %v4855_v60 = vsel %vm4841_vm4, %v10156_v55, %v4138_v61  ;;  %v4135_v56 = vpop.xlane.xlu1 %4134  ;;  %v5737_v55 = vunpack.i.h.bf16 %v11313_v47  ;;  %v4559_v41 = vsel %vm4545_vm2, %v4542_v16, %v5742_v62 }
 0x9f0   :  { %4872 = vst.msk [vmem:[%s10375_s12 + $0x68] sm:$0xff] %vm4858_vm5, %v4855_v60  ;;  %v4854_v10 = vsel %vm4841_vm4, %v10107_v20, %v4135_v56  ;;  %v5757_v20 = vunpack.i.h.bf16 %v11315_v13  ;;  %v4576_v28 = vsel %vm4562_vm3, %v4559_v41, %v5782_v8 }
 0x9f1   :  { %4871 = vst.msk [vmem:[%s10375_s12 + $0x60] sm:$0xff] %vm4858_vm5, %v4854_v10  ;;  %v4544_v58 = vsel %vm98_vm0, %v11319_v5, %v5737_v55 }
 0x9f2   :  { %v4144_v24 = vpop.xlane.xlu0 %4143 }
 0x9f3   :  { %v4857_v37 = vsel %vm4841_vm4, %v10220_v31, %v4144_v24  ;;  %v4141_v18 = vpop.xlane.xlu1 %4140  ;;  %v5787_v31 = vunpack.i.h.bf16 %v9545_v46  ;;  %v4561_v46 = vsel %vm4545_vm2, %v4544_v58, %v5757_v20 }
 0x9f4   :  { %4874 = vst.msk [vmem:[%s10375_s12 + $0x78] sm:$0xff] %vm4858_vm5, %v4857_v37  ;;  %v4856_v25 = vsel %vm4841_vm4, %v10178_v4, %v4141_v18  ;;  %v4543_v4 = vsel %vm98_vm0, %v11320_v1, %v5736_v12 }
 0x9f5   :  { %4873 = vst.msk [vmem:[%s10375_s12 + $0x70] sm:$0xff] %vm4858_vm5, %v4856_v25  ;;  %v4560_v35 = vsel %vm4545_vm2, %v4543_v4, %v5756_v15  ;;  %s6006_s12 = smov [#allocation3]   ;;  %v4578_v30 = vsel %vm4562_vm3, %v4561_v46, %v5787_v31 }
 0x9f6   :  { %v5900_v7 = vpop.permute.xlu0 %5899  ;;  %s4880_s22 = sshll.u32 %s6006_s12, 4  ;;  %v4577_v45 = vsel %vm4562_vm3, %v4560_v35, %v5786_v49  ;;  %s4881_s22 = int_to_ptr.vmem [resolvable:$true] %s4880_s22 }
 0x9f7   :  { %v5902_v2 = vunpack.i.h.bf16 %v5900_v7  ;;  %v5901_v48 = vunpack.i.l.bf16 %v5900_v7  ;;  %v5905_v17 = vpop.permute.xlu1 %5904  ;;  %s5979_s3 = scalar_lea.vmem %s4881_s22, 2048  ;;  %p5984_p1 = scmp.lt.s32.totalorder %s4881_s22, %s4881_s22 }
 0x9f8   :  { %v5907_v33 = vunpack.i.h.bf16 %v5905_v17  ;;  %v5906_v44 = vunpack.i.l.bf16 %v5905_v17  ;;  %p5980_p0 = scmp.ne.s32.totalorder %s4881_s22, %s5979_s3  ;;  %p5985_p2 = scmp.lt.s32.totalorder %s5979_s3, %s5979_s3 }
 0x9f9   :  { %v4623_v52 = vsel %vm4562_vm3, %v10113_v19, %v5901_v48  ;;  %v4624_v9 = vsel %vm4562_vm3, %v10110_v36, %v5902_v2 }
 0x9fa   :  { %v5230_v40 = vpack.c.bf16 %v4623_v52, %v4575_v14  ;;  %v5231_v3 = vpack.c.bf16 %v4624_v9, %v4576_v28  ;;  %v4625_v21 = vsel %vm4562_vm3, %v10131_v39, %v5906_v44  ;;  %v4626_v34 = vsel %vm4562_vm3, %v10128_v26, %v5907_v33  ;;  %p5986_p3 = por %p5985_p2, %p5984_p1 }
 0x9fb   :  { %v5232_v38 = vpack.c.bf16 %v4625_v21, %v4577_v45  ;;  %v5233_v51 = vpack.c.bf16 %v4626_v34, %v4578_v30 }
 0x9fc   :  { %4735 = vst [vmem:[#allocation3 + $0x60] sm:$0xff] %v5230_v40  ;;  %4736 = vst [vmem:[#allocation3 + $0x68] sm:$0xff] %v5231_v3  ;;  %p5987_p4 = pnand %p5986_p3, %p5980_p0 }
 0x9fd   :  { %4737 = vst [vmem:[#allocation3 + $0x70] sm:$0xff] %v5232_v38  ;;  %4738 = vst [vmem:[#allocation3 + $0x78] sm:$0xff] %v5233_v51 }
 0x9fe   :  { %5990 = shalt.err (!%p5987_p4)
}
 0x9ff   :  { %s6007_s23 = smov 128   ;;  %s6008_s24 = smov 8  }
 0xa00   :  { %4886 = dma.vmem_to_hbm [thread:$0]  %s4881_s22, 2048, %s10374_s11, [#allocation4], %s6007_s23, %s6007_s23, %s6008_s24  }
 0xa01   :  { %5999 = dma.done.wait [#allocation4], 2048  }
 0xa02   :  { %6000 = vsyncadd [#allocation4], 4294965248 }
 0xa03   :  { %4894 = vsyncpa [#allocation4], 1 }

</bundles_post_ra>
